<compile_context>
chip_gen: v5e
topology: v5e:2x2
jax: 0.10.0
libtpu: 0.0.40
codegen_flags: <defaults>
</compile_context>

<pallas_src>
import functools

import jax
import jax.numpy as jnp
from jax import lax
from jax.experimental import pallas as pl
from jax.experimental.pallas import tpu as pltpu


def _round_up(x: int, m: int) -> int:
    return ((x + m - 1) // m) * m


def _cdiv(a: int, b: int) -> int:
    return (a + b - 1) // b


_MIN_TN = 256  # full MXU tile height on v6e/v7x (>= v5e's 128)


def _vmem_capacity_bytes() -> int:
    """Physical VMEM per core; conservative fallback if the query fails."""
    try:
        return int(pltpu.get_tpu_info().vmem_capacity_bytes)
    except Exception:
        return 64 * 1024 * 1024  # v7x per-TensorCore VMEM (smallest of the gens)


# ----------------------------------------------------------------------------
# Kernels
# ----------------------------------------------------------------------------
def _reid_single_pass_kernel(feat_ref, lut_ref, pid_ref,      # inputs
                             loss_ref, corr_ref,               # per-row outputs
                             *, l2_norm: bool, scale: float, num_classes: int,
                             mask_classes: bool, matmul_dtype):
    """One class tile covers all classes: plain (non-online) softmax."""
    # Row-normalize (+ fold in scale) the feature tile; the LUT arrives
    # pre-normalized bf16 from the wrapper, so the hot path is MXU + epilogue.
    x = feat_ref[...].astype(jnp.float32)                         # (TN, Dp)
    if l2_norm:
        norm = jnp.sqrt(jnp.sum(x * x, axis=-1, keepdims=True))
        x = x * (jnp.float32(scale) / jnp.maximum(norm, 1e-12))
    elif scale != 1.0:
        x = x * jnp.float32(scale)

    logits = lax.dot_general(
        x.astype(matmul_dtype), lut_ref[...],
        dimension_numbers=(((1,), (1,)), ((), ())),
        preferred_element_type=jnp.float32)                       # (TN, Cp)

    pids = pid_ref[...]                                           # (TN, 1)
    cls_idx = lax.broadcasted_iota(jnp.int32, logits.shape, 1)
    if mask_classes:
        logits = jnp.where(cls_idx < num_classes, logits, jnp.float32(-1e30))

    row_max = jnp.max(logits, axis=-1, keepdims=True)
    lse = row_max + jnp.log(
        jnp.sum(jnp.exp(logits - row_max), axis=-1, keepdims=True))
    tgt = jnp.sum(jnp.where(cls_idx == pids, logits, 0.0),
                  axis=-1, keepdims=True)
    loss_ref[...] = lse - tgt

    # argmax (first-occurrence tie-break, like torch.argmax on the row).
    cand = jnp.where(logits == row_max, cls_idx, jnp.int32(2147483647))
    arg = jnp.min(cand, axis=-1, keepdims=True)
    corr_ref[...] = (arg == pids).astype(jnp.float32)


def _reid_streaming_kernel(feat_ref, lut_ref, pid_ref,          # inputs
                           loss_ref, corr_ref,                   # per-row outputs
                           xn_ref, m_ref, l_ref, t_ref, idx_ref, # VMEM scratch
                           *, l2_norm: bool, scale: float, num_classes: int,
                           tc: int, mask_classes: bool, matmul_dtype):
    """Class axis streamed: online logsumexp + running argmax + target logit."""
    j = pl.program_id(1)
    nj = pl.num_programs(1)

    @pl.when(j == 0)
    def _():
        x = feat_ref[...].astype(jnp.float32)                     # (TN, Dp)
        if l2_norm:
            norm = jnp.sqrt(jnp.sum(x * x, axis=-1, keepdims=True))
            x = x * (jnp.float32(scale) / jnp.maximum(norm, 1e-12))
        elif scale != 1.0:
            x = x * jnp.float32(scale)
        xn_ref[...] = x.astype(matmul_dtype)
        m_ref[...] = jnp.full(m_ref.shape, -jnp.inf, jnp.float32)
        l_ref[...] = jnp.zeros(l_ref.shape, jnp.float32)
        t_ref[...] = jnp.zeros(t_ref.shape, jnp.float32)
        idx_ref[...] = jnp.zeros(idx_ref.shape, jnp.int32)

    # LUT tile is already l2-normalized bf16 (wrapper) -> pure MXU here.
    logits = lax.dot_general(
        xn_ref[...], lut_ref[...],
        dimension_numbers=(((1,), (1,)), ((), ())),
        preferred_element_type=jnp.float32)                       # (TN, TC)

    pids = pid_ref[...]                                           # (TN, 1)
    cls_idx = j * tc + lax.broadcasted_iota(jnp.int32, logits.shape, 1)
    if mask_classes:
        logits = jnp.where(cls_idx < num_classes, logits, jnp.float32(-1e30))

    # Online logsumexp update.
    tile_max = jnp.max(logits, axis=-1, keepdims=True)            # (TN, 1)
    m_old = m_ref[...]
    m_new = jnp.maximum(m_old, tile_max)
    l_ref[...] = (l_ref[...] * jnp.exp(m_old - m_new)
                  + jnp.sum(jnp.exp(logits - m_new), axis=-1, keepdims=True))
    m_ref[...] = m_new

    # Target-logit extraction fused into the same tile sweep.
    t_ref[...] = t_ref[...] + jnp.sum(
        jnp.where(cls_idx == pids, logits, 0.0), axis=-1, keepdims=True)

    # Running argmax (first-occurrence tie-break, tiles scanned in order).
    cand = jnp.where(logits == tile_max, cls_idx, jnp.int32(2147483647))
    tile_arg = jnp.min(cand, axis=-1, keepdims=True)
    idx_ref[...] = jnp.where(tile_max > m_old, tile_arg, idx_ref[...])

    @pl.when(j == nj - 1)
    def _():
        loss_ref[...] = m_ref[...] + jnp.log(l_ref[...]) - t_ref[...]
        corr_ref[...] = (idx_ref[...] == pids).astype(jnp.float32)


# ----------------------------------------------------------------------------
# Wrapper
# ----------------------------------------------------------------------------
def criterion_reid(features, pids, lut, *, cls_type="oim",
                   matmul_dtype=jnp.bfloat16):
    """features: (N, D) float, pids: (N,) int, lut: (C, D) float.

    Returns (loss_ide, acc) matching the PyTorch training forward.
    """
    n, d = features.shape
    c, d2 = lut.shape
    assert d2 == d, (d, d2)
    l2_norm = (cls_type == "oim")
    scale = 30.0 if cls_type == "oim" else 1.0

    mm_bytes = jnp.dtype(matmul_dtype).itemsize
    feat_bytes = jnp.dtype(features.dtype).itemsize
    vmem_cap = _vmem_capacity_bytes()
    budget = int(vmem_cap * 0.55)  # headroom for hidden temporaries / outputs

    # Pad D only when not lane-aligned (typical ReID dims 256/512/2048 are);
    # the LUT pad is fused into the wrapper normalize+cast pass below.
    d_pad = d if d % 128 == 0 else _round_up(d, 128)

    # ---- class tiling: single pass if the normalized bf16 LUT is resident ----
    c_pad_min = _round_up(c, 128)
    single_lut_budget = min(vmem_cap // 5, 24 * 1024 * 1024)
    single_pass = c_pad_min * d_pad * mm_bytes <= single_lut_budget
    if single_pass:
        tc = c_pad_min
    else:
        per_buf = max(2 * 1024 * 1024, min(8 * 1024 * 1024, vmem_cap // 16))
        tc = (per_buf // (d_pad * mm_bytes)) // 128 * 128
        tc = max(128, min(tc, c_pad_min))
    c_pad = _round_up(c, tc)

    # ---- batch tiling ----
    if single_pass and n > _MIN_TN:
        # >= 2 N-steps so a 2-TensorCore chip (v7x) can shard the parallel
        # axis; on one core the repeated LUT block index skips the re-DMA.
        tn = max(_MIN_TN, _round_up(_cdiv(n, 2), 128))
    else:
        # Cover the whole batch in one tile: each extra N tile re-streams the
        # full LUT when in streaming mode.
        tn = _round_up(max(n, _MIN_TN), 128)
    tn = min(tn, 2048)

    def est_vmem(tn_):
        b = 2 * tn_ * d_pad * feat_bytes          # feature block, double-buffered
        b += 2 * tc * d_pad * mm_bytes            # LUT block, double-buffered
        b += tn_ * tc * 4                         # f32 logits temporary
        b += tn_ * (d_pad + tc) * mm_bytes        # bf16 staging / where temps
        if not single_pass:
            b += tn_ * d_pad * mm_bytes           # cached normalized-x scratch
        b += 8 * tn_ * 4                          # per-row scratch + outputs
        return b

    while tn > _MIN_TN and est_vmem(tn) > budget:
        tn = max(_MIN_TN, _round_up(tn // 2, 128))

    n_pad = _round_up(n, tn)

    # ---- wrapper-side prep: LUT l2-norm + cast + pad in one fused pass ------
    w = lut.astype(jnp.float32)
    if l2_norm:
        w = w / jnp.maximum(
            jnp.sqrt(jnp.sum(w * w, axis=-1, keepdims=True)), 1e-12)
    w = w.astype(matmul_dtype)
    if (c_pad, d_pad) != (c, d):
        w = jnp.pad(w, ((0, c_pad - c), (0, d_pad - d)))

    feats_p = features
    if (n_pad, d_pad) != (n, d):
        feats_p = jnp.pad(features, ((0, n_pad - n), (0, d_pad - d)))
    pids_p = jnp.pad(pids.astype(jnp.int32), (0, n_pad - n)).reshape(n_pad, 1)

    mask_classes = (c_pad != c)
    cost = pl.CostEstimate(
        flops=2 * n_pad * c_pad * d_pad,
        transcendentals=n_pad * c_pad,
        bytes_accessed=((n_pad // tn) * c_pad * d_pad * mm_bytes
                        + n_pad * d_pad * feat_bytes + 3 * n_pad * 4))
    vmem_limit = min(int(vmem_cap * 0.9), 128 * 1024 * 1024)

    if single_pass:
        kernel = functools.partial(
            _reid_single_pass_kernel,
            l2_norm=l2_norm, scale=scale, num_classes=c,
            mask_classes=mask_classes, matmul_dtype=matmul_dtype)
        grid = (n_pad // tn,)
        in_specs = [
            pl.BlockSpec((tn, d_pad), lambda i: (i, 0)),   # features
            pl.BlockSpec((tc, d_pad), lambda i: (0, 0)),   # whole LUT (resident)
            pl.BlockSpec((tn, 1), lambda i: (i, 0)),       # pids
        ]
        out_specs = (pl.BlockSpec((tn, 1), lambda i: (i, 0)),
                     pl.BlockSpec((tn, 1), lambda i: (i, 0)))
        scratch = []
        dims = ("parallel",)
    else:
        kernel = functools.partial(
            _reid_streaming_kernel,
            l2_norm=l2_norm, scale=scale, num_classes=c, tc=tc,
            mask_classes=mask_classes, matmul_dtype=matmul_dtype)
        grid = (n_pad // tn, c_pad // tc)
        in_specs = [
            pl.BlockSpec((tn, d_pad), lambda i, j: (i, 0)),   # features
            pl.BlockSpec((tc, d_pad), lambda i, j: (j, 0)),   # LUT stream (C, D)
            pl.BlockSpec((tn, 1), lambda i, j: (i, 0)),       # pids
        ]
        out_specs = (pl.BlockSpec((tn, 1), lambda i, j: (i, 0)),
                     pl.BlockSpec((tn, 1), lambda i, j: (i, 0)))
        scratch = [
            pltpu.VMEM((tn, d_pad), matmul_dtype),   # cached normalized x
            pltpu.VMEM((tn, 1), jnp.float32),        # running max
            pltpu.VMEM((tn, 1), jnp.float32),        # running sum-exp
            pltpu.VMEM((tn, 1), jnp.float32),        # target logit
            pltpu.VMEM((tn, 1), jnp.int32),          # running argmax
        ]
        dims = ("parallel", "arbitrary")

    loss_rows, corr_rows = pl.pallas_call(
        kernel,
        out_shape=(jax.ShapeDtypeStruct((n_pad, 1), jnp.float32),
                   jax.ShapeDtypeStruct((n_pad, 1), jnp.float32)),
        grid_spec=pltpu.PrefetchScalarGridSpec(
            num_scalar_prefetch=0,
            grid=grid,
            in_specs=in_specs,
            out_specs=out_specs,
            scratch_shapes=scratch),
        compiler_params=pltpu.CompilerParams(
            dimension_semantics=dims,
            vmem_limit_bytes=vmem_limit),
        cost_estimate=cost,
    )(feats_p, w, pids_p)

    loss = 0.5 * jnp.mean(loss_rows[:n, 0])
    acc = jnp.mean(corr_rows[:n, 0])
    return loss, acc


# ----------------------------------------------------------------------------
# Pure-JAX reference (for sanity checking)
# ----------------------------------------------------------------------------
def _reference(features, pids, lut, *, cls_type="oim", matmul_dtype=jnp.float32):
    x = features.astype(jnp.float32)
    w = lut.astype(jnp.float32)
    if cls_type == "oim":
        x = x * (jnp.float32(30.0) / jnp.maximum(
            jnp.sqrt(jnp.sum(x * x, axis=-1, keepdims=True)), 1e-12))
        w = w / jnp.maximum(
            jnp.sqrt(jnp.sum(w * w, axis=-1, keepdims=True)), 1e-12)
    logits = jnp.dot(x.astype(matmul_dtype), w.astype(matmul_dtype).T,
                     preferred_element_type=jnp.float32)
    lse = jax.scipy.special.logsumexp(logits, axis=-1)
    tgt = jnp.take_along_axis(logits, pids[:, None], axis=-1)[:, 0]
    loss = 0.5 * jnp.mean(lse - tgt)
    acc = jnp.mean((jnp.argmax(logits, axis=-1) == pids).astype(jnp.float32))
    return loss, acc


if __name__ == "__main__":
    # Small deterministic setup consistent with the module:
    #   feat_dim = 32, num_train_pids = 16, batch N = 8, cls_type = 'oim'
    N, FEAT_DIM, NUM_PIDS = 8, 32, 16
    CLS_TYPE = "oim"

    key = jax.random.PRNGKey(0)
    k_feat, k_lut, k_pid = jax.random.split(key, 3)

    features = jax.random.normal(k_feat, (N, FEAT_DIM), dtype=jnp.float32)
    # Deterministic "classifier" lookup table (OIM LUT / linear weight), (C, D).
    lut = jax.random.normal(k_lut, (NUM_PIDS, FEAT_DIM), dtype=jnp.float32)
    pids = jax.random.randint(k_pid, (N,), 0, NUM_PIDS, dtype=jnp.int32)

    loss, acc = criterion_reid(features, pids, lut, cls_type=CLS_TYPE)
    loss = jax.block_until_ready(loss)
    acc = jax.block_until_ready(acc)

    # Reference matching the kernel numerics (bf16 MXU operands, f32 accumulate).
    ref_loss, ref_acc = _reference(features, pids, lut, cls_type=CLS_TYPE,
                                   matmul_dtype=jnp.bfloat16)
    assert jnp.allclose(loss, ref_loss, atol=5e-3, rtol=5e-3), (loss, ref_loss)
    assert jnp.allclose(acc, ref_acc, atol=1e-6), (acc, ref_acc)

    # Loose sanity check vs. full-f32 math (bf16 matmul adds ~1e-2 logit noise).
    f32_loss, _ = _reference(features, pids, lut, cls_type=CLS_TYPE,
                             matmul_dtype=jnp.float32)
    assert jnp.allclose(loss, f32_loss, atol=0.25, rtol=0.1), (loss, f32_loss)

    print("KERNEL_OK")
</pallas_src>

<mosaic_0001>
module attributes {stable_mosaic.version = 11 : i64} {
  func.func @_reid_single_pass_kernel(%arg0: i32, %arg1: memref<256x128xf32, #tpu.memory_space<vmem>>, %arg2: memref<128x128xbf16, #tpu.memory_space<vmem>>, %arg3: memref<256x1xi32, #tpu.memory_space<vmem>>, %arg4: memref<256x1xf32, #tpu.memory_space<vmem>>, %arg5: memref<256x1xf32, #tpu.memory_space<vmem>>) attributes {dimension_semantics = [#tpu.dimension_semantics<parallel>], iteration_bounds = array<i64: 1>, scalar_prefetch = 0 : i64, scratch_operands = 0 : i64, tpu.core_type = #tpu.core_type<tc>, window_params = [{transform_indices = @transform_0, window_bounds = array<i64: 256, 128>}, {pipeline_mode = #tpu.pipeline_mode<synchronous>, transform_indices = @transform_1, window_bounds = array<i64: 128, 128>}, {transform_indices = @transform_2, window_bounds = array<i64: 256, 1>}, {transform_indices = @transform_3, window_bounds = array<i64: 256, 1>}, {transform_indices = @transform_4, window_bounds = array<i64: 256, 1>}]} {
    %c0 = arith.constant 0 : index
    %c0_0 = arith.constant 0 : index
    %0 = vector.load %arg1[%c0, %c0_0] : memref<256x128xf32, #tpu.memory_space<vmem>>, vector<256x128xf32>
    %1 = arith.mulf %0, %0 : vector<256x128xf32>
    %cst = arith.constant dense<0.000000e+00> : vector<256xf32>
    %2 = vector.multi_reduction <add>, %1, %cst [1] : vector<256x128xf32> to vector<256xf32>
    %3 = vector.shape_cast %2 : vector<256xf32> to vector<256x1xf32>
    %4 = math.sqrt %3 : vector<256x1xf32>
    %cst_1 = arith.constant 9.99999996E-13 : f32
    %5 = vector.broadcast %cst_1 : f32 to vector<256x1xf32>
    %6 = arith.maximumf %4, %5 : vector<256x1xf32>
    %cst_2 = arith.constant 3.000000e+01 : f32
    %7 = vector.broadcast %cst_2 : f32 to vector<256x1xf32>
    %8 = arith.divf %7, %6 : vector<256x1xf32>
    %9 = vector.broadcast %8 : vector<256x1xf32> to vector<256x128xf32>
    %10 = arith.mulf %0, %9 : vector<256x128xf32>
    %11 = arith.truncf %10 : vector<256x128xf32> to vector<256x128xbf16>
    %c0_3 = arith.constant 0 : index
    %c0_4 = arith.constant 0 : index
    %12 = vector.load %arg2[%c0_3, %c0_4] : memref<128x128xbf16, #tpu.memory_space<vmem>>, vector<128x128xbf16>
    %cst_5 = arith.constant dense<0.000000e+00> : vector<256x128xf32>
    %13 = tpu.matmul %11, %12, %cst_5 {dimension_numbers = #tpu.dot_dimension_numbers<[1], [1], [0], [0], [0, 0, 1, 0], [], []>} : vector<256x128xbf16>, vector<128x128xbf16>, vector<256x128xf32> -> vector<256x128xf32>
    %c0_6 = arith.constant 0 : index
    %c0_7 = arith.constant 0 : index
    %14 = vector.load %arg3[%c0_6, %c0_7] : memref<256x1xi32, #tpu.memory_space<vmem>>, vector<256x1xi32>
    %15 = tpu.iota {dimensions = array<i32: 1>} : vector<256x128xi32>
    %c16_i32 = arith.constant 16 : i32
    %16 = vector.broadcast %c16_i32 : i32 to vector<256x128xi32>
    %17 = arith.cmpi slt, %15, %16 : vector<256x128xi32>
    %cst_8 = arith.constant -1.000000e+30 : f32
    %18 = vector.broadcast %cst_8 : f32 to vector<256x128xf32>
    %19 = arith.select %17, %13, %18 : vector<256x128xi1>, vector<256x128xf32>
    %cst_9 = arith.constant dense<0xFF800000> : vector<256xf32>
    %20 = vector.multi_reduction <maximumf>, %19, %cst_9 [1] : vector<256x128xf32> to vector<256xf32>
    %21 = vector.shape_cast %20 : vector<256xf32> to vector<256x1xf32>
    %22 = vector.broadcast %21 : vector<256x1xf32> to vector<256x128xf32>
    %23 = arith.subf %19, %22 : vector<256x128xf32>
    %24 = math.exp %23 : vector<256x128xf32>
    %cst_10 = arith.constant dense<0.000000e+00> : vector<256xf32>
    %25 = vector.multi_reduction <add>, %24, %cst_10 [1] : vector<256x128xf32> to vector<256xf32>
    %26 = vector.shape_cast %25 : vector<256xf32> to vector<256x1xf32>
    %27 = math.log %26 : vector<256x1xf32>
    %28 = arith.addf %21, %27 : vector<256x1xf32>
    %29 = vector.broadcast %14 : vector<256x1xi32> to vector<256x128xi32>
    %30 = arith.cmpi eq, %15, %29 : vector<256x128xi32>
    %cst_11 = arith.constant 0.000000e+00 : f32
    %31 = vector.broadcast %cst_11 : f32 to vector<256x128xf32>
    %32 = arith.select %30, %19, %31 : vector<256x128xi1>, vector<256x128xf32>
    %cst_12 = arith.constant dense<0.000000e+00> : vector<256xf32>
    %33 = vector.multi_reduction <add>, %32, %cst_12 [1] : vector<256x128xf32> to vector<256xf32>
    %34 = vector.shape_cast %33 : vector<256xf32> to vector<256x1xf32>
    %35 = arith.subf %28, %34 : vector<256x1xf32>
    %c0_13 = arith.constant 0 : index
    %c0_14 = arith.constant 0 : index
    %36 = vector.load %arg4[%c0_13, %c0_14] : memref<256x1xf32, #tpu.memory_space<vmem>>, vector<256x1xf32>
    tpu.vector_store %arg4[%c0_13, %c0_14], %35 {strides = array<i32>} : memref<256x1xf32, #tpu.memory_space<vmem>>, vector<256x1xf32>,
    %37 = vector.broadcast %21 : vector<256x1xf32> to vector<256x128xf32>
    %38 = arith.cmpf oeq, %19, %37 : vector<256x128xf32>
    %c2147483647_i32 = arith.constant 2147483647 : i32
    %39 = vector.broadcast %c2147483647_i32 : i32 to vector<256x128xi32>
    %40 = arith.select %38, %15, %39 : vector<256x128xi1>, vector<256x128xi32>
    %cst_15 = arith.constant dense<2147483647> : vector<256xi32>
    %41 = vector.multi_reduction <minsi>, %40, %cst_15 [1] : vector<256x128xi32> to vector<256xi32>
    %42 = vector.shape_cast %41 : vector<256xi32> to vector<256x1xi32>
    %43 = arith.cmpi eq, %42, %14 : vector<256x1xi32>
    %44 = arith.extui %43 : vector<256x1xi1> to vector<256x1xi32>
    %45 = arith.sitofp %44 : vector<256x1xi32> to vector<256x1xf32>
    %c0_16 = arith.constant 0 : index
    %c0_17 = arith.constant 0 : index
    %46 = vector.load %arg5[%c0_16, %c0_17] : memref<256x1xf32, #tpu.memory_space<vmem>>, vector<256x1xf32>
    tpu.vector_store %arg5[%c0_16, %c0_17], %45 {strides = array<i32>} : memref<256x1xf32, #tpu.memory_space<vmem>>, vector<256x1xf32>,
    return
  }
  func.func @transform_0(%arg0: i32) -> (i32, i32) {
    %c0_i32 = arith.constant 0 : i32
    %c0_i32_0 = arith.constant 0 : i32
    return %arg0, %c0_i32 : i32, i32
  }
  func.func @transform_1(%arg0: i32) -> (i32, i32) {
    %c0_i32 = arith.constant 0 : i32
    %c0_i32_0 = arith.constant 0 : i32
    %c0_i32_1 = arith.constant 0 : i32
    return %c0_i32, %c0_i32_0 : i32, i32
  }
  func.func @transform_2(%arg0: i32) -> (i32, i32) {
    %c0_i32 = arith.constant 0 : i32
    %c0_i32_0 = arith.constant 0 : i32
    return %arg0, %c0_i32 : i32, i32
  }
  func.func @transform_3(%arg0: i32) -> (i32, i32) {
    %c0_i32 = arith.constant 0 : i32
    %c0_i32_0 = arith.constant 0 : i32
    return %arg0, %c0_i32 : i32, i32
  }
  func.func @transform_4(%arg0: i32) -> (i32, i32) {
    %c0_i32 = arith.constant 0 : i32
    %c0_i32_0 = arith.constant 0 : i32
    return %arg0, %c0_i32 : i32, i32
  }
}

</mosaic_0001>

<bundles_post_ra>
// kernel: tpu_custom_call.1
= control target key start
LH: loop header
LB: loop body
LE: loop exit
PB: predicated region body
PF: predicated region fallthrough
CT: control target
= control target key end

     0   :  { %10 = vsyncpa [#allocation3], 0  ;;  %s3030_s18 = smov [#allocation2]   ;;  %s3031_s20 = smov 64   ;;  %s5989_s0 = inlined_call_operand.vmem [shape: f32[256,128], index: 0, kind: input, shape index: {}]   ;;  %s5990_s1 = inlined_call_operand.hbm [shape: bf16[128,128], index: 1, kind: input, shape index: {}]   ;;  %s5991_s2 = inlined_call_operand.vmem [shape: s32[256,1], index: 2, kind: input, shape index: {}]   ;;  %s5992_s3 = inlined_call_operand.vmem [shape: f32[256,1], index: 3, kind: output, shape index: {0}]   ;;  %s5993_s4 = inlined_call_operand.vmem [shape: f32[256,1], index: 4, kind: output, shape index: {1}]  }
   0x1   :  { %s17_s17 = sshll.u32 %s5990_s1, 4  ;;  %s19_s19 = sshll.u32 %s3030_s18, 4  ;;  %s18_s17 = int_to_ptr.hbm [resolvable:$true] %s17_s17  ;;  %s20_s19 = int_to_ptr.vmem [resolvable:$true] %s19_s19 }
   0x2   :  { %s3032_s21 = smov 4  }
   0x3   :  { %25 = dma.hbm_to_vmem [thread:$0]  %s18_s17, 1024, %s20_s19, [#allocation3], %s3031_s20, %s3031_s20, %s3032_s21  }
   0x4   :  { %3028 = dma.done.wait [#allocation3], 1024  }
   0x5   :  { %3029 = vsyncadd [#allocation3], 4294966272  ;;  %v36_v0 = vld [vmem:[%s5989_s0 + $0x20] sm:$0xff]  ;;  %v34_v1 = vld [vmem:[%s5989_s0 + $0x10] sm:$0xff] }
   0x6   :  { %v3072_v2 = vld [vmem:[%s5989_s0] sm:$0xff]  ;;  %v68_v3 = vmul.f32 %v36_v0, %v36_v0  ;;  %v66_v4 = vmul.f32 %v34_v1, %v34_v1  ;;  %v37_v6 = vld [vmem:[%s5989_s0 + $0x28] sm:$0xff]  ;;  %v35_v7 = vld [vmem:[%s5989_s0 + $0x18] sm:$0xff] }
   0x7   :  { %v64_v5 = vmul.f32 %v3072_v2, %v3072_v2  ;;  %v3085_v8 = vld [vmem:[%s5989_s0 + $0x8] sm:$0xff]  ;;  %v69_v9 = vmul.f32 %v37_v6, %v37_v6  ;;  %v67_v10 = vmul.f32 %v35_v7, %v35_v7  ;;  %v40_v12 = vld [vmem:[%s5989_s0 + $0x40] sm:$0xff]  ;;  %v39_v13 = vld [vmem:[%s5989_s0 + $0x38] sm:$0xff] }
   0x8   :  { %104 = vadd.xlane.f32.xlu2 %v68_v3  ;;  %100 = vadd.xlane.f32.xlu1 %v66_v4  ;;  %v65_v11 = vmul.f32 %v3085_v8, %v3085_v8  ;;  %v38_v14 = vld [vmem:[%s5989_s0 + $0x30] sm:$0xff]  ;;  %v72_v15 = vmul.f32 %v40_v12, %v40_v12  ;;  %v71_v16 = vmul.f32 %v39_v13, %v39_v13  ;;  %v43_v18 = vld [vmem:[%s5989_s0 + $0x58] sm:$0xff]  ;;  %v41_v20 = vld [vmem:[%s5989_s0 + $0x48] sm:$0xff] }
   0x9   :  { %96 = vadd.xlane.f32.xlu0 %v64_v5  ;;  %v70_v17 = vmul.f32 %v38_v14, %v38_v14  ;;  %v42_v19 = vld [vmem:[%s5989_s0 + $0x50] sm:$0xff]  ;;  %v75_v21 = vmul.f32 %v43_v18, %v43_v18  ;;  %v73_v23 = vmul.f32 %v41_v20, %v41_v20  ;;  %v45_v25 = vld [vmem:[%s5989_s0 + $0x68] sm:$0xff]  ;;  %v44_v26 = vld [vmem:[%s5989_s0 + $0x60] sm:$0xff]  ;;  %v3033_v5 = vmov 0  }
   0xa   :  { %v74_v22 = vmul.f32 %v42_v19, %v42_v19  ;;  %v46_v24 = vld [vmem:[%s5989_s0 + $0x70] sm:$0xff]  ;;  %v77_v28 = vmul.f32 %v45_v25, %v45_v25  ;;  %v76_v29 = vmul.f32 %v44_v26, %v44_v26  ;;  %v49_v30 = vld [vmem:[%s5989_s0 + $0x88] sm:$0xff]  ;;  %v48_v31 = vld [vmem:[%s5989_s0 + $0x80] sm:$0xff]  ;;  %2685 = vset.pattern.permute.xlu2 %v3033_v5  ;;  %2683 = vset.pattern.permute.xlu0 %v3033_v5 }
   0xb   :  { %v78_v27 = vmul.f32 %v46_v24, %v46_v24  ;;  %v47_v32 = vld [vmem:[%s5989_s0 + $0x78] sm:$0xff]  ;;  %v81_v33 = vmul.f32 %v49_v30, %v49_v30  ;;  %v80_v34 = vmul.f32 %v48_v31, %v48_v31  ;;  %v52_v36 = vld [vmem:[%s5989_s0 + $0xa0] sm:$0xff]  ;;  %v50_v39 = vld [vmem:[%s5989_s0 + $0x90] sm:$0xff]  ;;  %2684 = vset.pattern.permute.xlu1 %v3033_v5 }
   0xc   :  { %v79_v35 = vmul.f32 %v47_v32, %v47_v32  ;;  %v51_v37 = vld [vmem:[%s5989_s0 + $0x98] sm:$0xff]  ;;  %v84_v40 = vmul.f32 %v52_v36, %v52_v36  ;;  %v82_v42 = vmul.f32 %v50_v39, %v50_v39  ;;  %v54_v44 = vld [vmem:[%s5989_s0 + $0xb0] sm:$0xff]  ;;  %v53_v46 = vld [vmem:[%s5989_s0 + $0xa8] sm:$0xff] }
   0xd   :  { %v2653_v38 = vld [vmem:[#allocation2 + $0x38] sm:$0xff]  ;;  %v83_v41 = vmul.f32 %v51_v37, %v51_v37  ;;  %v2652_v45 = vld [vmem:[#allocation2 + $0x30] sm:$0xff]  ;;  %v86_v48 = vmul.f32 %v54_v44, %v54_v44  ;;  %v85_v49 = vmul.f32 %v53_v46, %v53_v46  ;;  %v57_v50 = vld [vmem:[%s5989_s0 + $0xc8] sm:$0xff] }
   0xe   :  { %1168 = vmatpush.bf16.xpose.msra.mxu0 %v2653_v38  ;;  %2654 = vmatpush.bf16.xpose.msra.mxu1 %v2653_v38  ;;  %v55_v43 = vld [vmem:[%s5989_s0 + $0xb8] sm:$0xff]  ;;  %v58_v51 = vld [vmem:[%s5989_s0 + $0xd0] sm:$0xff]  ;;  %v56_v52 = vld [vmem:[%s5989_s0 + $0xc0] sm:$0xff]  ;;  %v89_v53 = vmul.f32 %v57_v50, %v57_v50 }
   0xf   :  { %2655 = vmatpush.bf16.xpose.msra.mxu2 %v2653_v38  ;;  %2656 = vmatpush.bf16.xpose.msra.mxu3 %v2653_v38  ;;  %v87_v47 = vmul.f32 %v55_v43, %v55_v43  ;;  %v90_v54 = vmul.f32 %v58_v51, %v58_v51  ;;  %v88_v55 = vmul.f32 %v56_v52, %v56_v52  ;;  %v61_v56 = vld [vmem:[%s5989_s0 + $0xe8] sm:$0xff]  ;;  %v60_v57 = vld [vmem:[%s5989_s0 + $0xe0] sm:$0xff]  ;;  %v59_v58 = vld [vmem:[%s5989_s0 + $0xd8] sm:$0xff] }
  0x10   :  { %106 = vadd.xlane.f32.xlu2 %v69_v9  ;;  %102 = vadd.xlane.f32.xlu1 %v67_v10  ;;  %v93_v59 = vmul.f32 %v61_v56, %v61_v56  ;;  %v92_v60 = vmul.f32 %v60_v57, %v60_v57  ;;  %v91_v61 = vmul.f32 %v59_v58, %v59_v58  ;;  %v63_v62 = vld [vmem:[%s5989_s0 + $0xf8] sm:$0xff]  ;;  %v62_v63 = vld [vmem:[%s5989_s0 + $0xf0] sm:$0xff]  ;;  %v2651_v3 = vld [vmem:[#allocation2 + $0x28] sm:$0xff] }
  0x11   :  { %98 = vadd.xlane.f32.xlu0 %v65_v11  ;;  %v95_v0 = vmul.f32 %v63_v62, %v63_v62  ;;  %v94_v1 = vmul.f32 %v62_v63, %v62_v63  ;;  %v2650_v4 = vld [vmem:[#allocation2 + $0x20] sm:$0xff]  ;;  %v1259_v6 = vld [vmem:[%s5991_s2 + $0x10] sm:$0xff]  ;;  %v2649_v9 = vld [vmem:[#allocation2 + $0x18] sm:$0xff] }
  0x12   :  { %v1257_v7 = vld [vmem:[%s5991_s2] sm:$0xff]  ;;  %v1260_v13 = vld [vmem:[%s5991_s2 + $0x18] sm:$0xff]  ;;  %v1258_v18 = vld [vmem:[%s5991_s2 + $0x8] sm:$0xff] }
  0x13   :  { %v1264_v14 = vld [vmem:[%s5991_s2 + $0x38] sm:$0xff]  ;;  %v1262_v20 = vld [vmem:[%s5991_s2 + $0x28] sm:$0xff]  ;;  %v1261_v30 = vld [vmem:[%s5991_s2 + $0x20] sm:$0xff] }
  0x14   :  { %v2647_v25 = vld [vmem:[#allocation2 + $0x8] sm:$0xff]  ;;  %v1268_v52 = vld [vmem:[%s5991_s2 + $0x58] sm:$0xff] }
  0x15   :  { %v1270_v38 = vld [vmem:[%s5991_s2 + $0x68] sm:$0xff] }
  0x16   :  { %1169 = vmatpush.bf16.xpose.msra.mxu0 %v2652_v45  ;;  %2657 = vmatpush.bf16.xpose.msra.mxu1 %v2652_v45 }
  0x17   :  { %2658 = vmatpush.bf16.xpose.msra.mxu2 %v2652_v45  ;;  %2659 = vmatpush.bf16.xpose.msra.mxu3 %v2652_v45 }
  0x18   :  { %112 = vadd.xlane.f32.xlu2 %v72_v15  ;;  %110 = vadd.xlane.f32.xlu1 %v71_v16  ;;  %v2648_v15 = vld [vmem:[#allocation2 + $0x10] sm:$0xff] }
  0x19   :  { %108 = vadd.xlane.f32.xlu0 %v70_v17 }
  0x1e   :  { %1170 = vmatpush.bf16.xpose.msra.mxu0 %v2651_v3  ;;  %2660 = vmatpush.bf16.xpose.msra.mxu1 %v2651_v3 }
  0x1f   :  { %2661 = vmatpush.bf16.xpose.msra.mxu2 %v2651_v3  ;;  %2662 = vmatpush.bf16.xpose.msra.mxu3 %v2651_v3 }
  0x20   :  { %118 = vadd.xlane.f32.xlu2 %v75_v21  ;;  %116 = vadd.xlane.f32.xlu1 %v74_v22 }
  0x21   :  { %114 = vadd.xlane.f32.xlu0 %v73_v23  ;;  %v1267_v23 = vld [vmem:[%s5991_s2 + $0x50] sm:$0xff] }
  0x26   :  { %1171 = vmatpush.bf16.xpose.msra.mxu0 %v2650_v4  ;;  %2663 = vmatpush.bf16.xpose.msra.mxu1 %v2650_v4 }
  0x27   :  { %2664 = vmatpush.bf16.xpose.msra.mxu2 %v2650_v4  ;;  %2665 = vmatpush.bf16.xpose.msra.mxu3 %v2650_v4 }
  0x28   :  { %124 = vadd.xlane.f32.xlu2 %v78_v27  ;;  %122 = vadd.xlane.f32.xlu1 %v77_v28 }
  0x29   :  { %120 = vadd.xlane.f32.xlu0 %v76_v29 }
  0x2e   :  { %1172 = vmatpush.bf16.xpose.msra.mxu0 %v2649_v9  ;;  %2666 = vmatpush.bf16.xpose.msra.mxu1 %v2649_v9 }
  0x2f   :  { %2667 = vmatpush.bf16.xpose.msra.mxu2 %v2649_v9  ;;  %2668 = vmatpush.bf16.xpose.msra.mxu3 %v2649_v9 }
  0x30   :  { %130 = vadd.xlane.f32.xlu2 %v81_v33  ;;  %128 = vadd.xlane.f32.xlu1 %v80_v34  ;;  %v1265_v33 = vld [vmem:[%s5991_s2 + $0x40] sm:$0xff] }
  0x31   :  { %126 = vadd.xlane.f32.xlu0 %v79_v35 }
  0x36   :  { %1173 = vmatpush.bf16.xpose.msra.mxu0 %v2648_v15  ;;  %2669 = vmatpush.bf16.xpose.msra.mxu1 %v2648_v15 }
  0x37   :  { %2670 = vmatpush.bf16.xpose.msra.mxu2 %v2648_v15  ;;  %2671 = vmatpush.bf16.xpose.msra.mxu3 %v2648_v15 }
  0x38   :  { %136 = vadd.xlane.f32.xlu2 %v84_v40  ;;  %134 = vadd.xlane.f32.xlu1 %v83_v41  ;;  %v2646_v40 = vld [vmem:[#allocation2] sm:$0xff] }
  0x39   :  { %132 = vadd.xlane.f32.xlu0 %v82_v42 }
  0x3e   :  { %1174 = vmatpush.bf16.xpose.msra.mxu0 %v2647_v25  ;;  %2672 = vmatpush.bf16.xpose.msra.mxu1 %v2647_v25 }
  0x3f   :  { %2673 = vmatpush.bf16.xpose.msra.mxu2 %v2647_v25  ;;  %2674 = vmatpush.bf16.xpose.msra.mxu3 %v2647_v25 }
  0x40   :  { %142 = vadd.xlane.f32.xlu2 %v87_v47  ;;  %140 = vadd.xlane.f32.xlu1 %v86_v48  ;;  %v1263_v47 = vld [vmem:[%s5991_s2 + $0x30] sm:$0xff] }
  0x41   :  { %138 = vadd.xlane.f32.xlu0 %v85_v49 }
  0x46   :  { %1175 = vmatpush.bf16.xpose.msra.mxu0 %v2646_v40  ;;  %2675 = vmatpush.bf16.xpose.msra.mxu1 %v2646_v40 }
  0x47   :  { %2676 = vmatpush.bf16.xpose.msra.mxu2 %v2646_v40  ;;  %2677 = vmatpush.bf16.xpose.msra.mxu3 %v2646_v40 }
  0x48   :  { %146 = vadd.xlane.f32.xlu1 %v89_v53  ;;  %148 = vadd.xlane.f32.xlu2 %v90_v54 }
  0x49   :  { %144 = vadd.xlane.f32.xlu0 %v88_v55 }
  0x50   :  { %154 = vadd.xlane.f32.xlu2 %v93_v59  ;;  %152 = vadd.xlane.f32.xlu1 %v92_v60  ;;  %v1273_v60 = vld [vmem:[%s5991_s2 + $0x80] sm:$0xff] }
  0x51   :  { %150 = vadd.xlane.f32.xlu0 %v91_v61 }
  0x58   :  { %158 = vadd.xlane.f32.xlu1 %v95_v0 }
  0x59   :  { %156 = vadd.xlane.f32.xlu0 %v94_v1 }
  0x68   :  { %1651 = vperm.xlu2 %2685, %v1259_v6  }
  0x6d   :  { %1645 = vperm.xlu0 %2683, %v1257_v7  }
  0x70   :  { %1654 = vperm.xlu2 %2685, %v1260_v13  }
  0x71   :  { %1648 = vperm.xlu1 %2684, %v1258_v18  }
  0x75   :  { %1666 = vperm.xlu0 %2683, %v1264_v14  }
  0x78   :  { %1660 = vperm.xlu2 %2685, %v1262_v20  }
  0x79   :  { %1657 = vperm.xlu1 %2684, %v1261_v30  }
  0x7b   :  { %v3173_v10 = vpop.xlane.xlu2 %104  ;;  %v3175_v11 = vpop.xlane.xlu1 %100 }
  0x7c   :  { %v3177_v12 = vpop.xlane.xlu0 %96  ;;  %2686 = vrsqrt.f32 %v3173_v10  ;;  %vm215_vm0 = vcmp.eq.f32.partialorder %v3173_v10, inf  ;;  %vm191_vm1 = vcmp.eq.f32.partialorder %v3175_v11, inf }
  0x7d   :  { %2688 = vrsqrt.f32 %v3175_v11  ;;  %1675 = vperm.xlu0 %2683, %v1267_v23   ;;  %vm167_vm2 = vcmp.eq.f32.partialorder %v3177_v12, inf  ;;  %v170_v23 = vand.u32 2147483648, %v3177_v12  ;;  %vm169_vm7 = vcmp.eq.f32.partialorder %v3177_v12, 0.0 }
  0x7e   :  { %2690 = vrsqrt.f32 %v3177_v12 }
  0x80   :  { %1669 = vperm.xlu2 %2685, %v1265_v33  }
  0x81   :  { %1663 = vperm.xlu1 %2684, %v1263_v47  }
  0x82   :  { %v3200_v21 = vpop.eup %2686 }
  0x83   :  { %v3188_v16 = vpop.xlane.xlu2 %106  ;;  %v3190_v17 = vpop.xlane.xlu1 %102  ;;  %v209_v26 = vmul.f32 %v3200_v21, %v3173_v10 }
  0x84   :  { %v3195_v19 = vpop.xlane.xlu0 %98  ;;  %v3202_v22 = vpop.eup %2688  ;;  %2692 = vrsqrt.f32 %v3188_v16  ;;  %vm227_vm3 = vcmp.eq.f32.partialorder %v3188_v16, inf  ;;  %vm203_vm4 = vcmp.eq.f32.partialorder %v3190_v17, inf }
  0x85   :  { %v3207_v24 = vpop.eup %2690  ;;  %v185_v27 = vmul.f32 %v3202_v22, %v3175_v11  ;;  %2694 = vrsqrt.f32 %v3190_v17  ;;  %v210_v34 = vmul.f32 %v3200_v21, %v209_v26  ;;  %1684 = vperm.xlu0 %2683, %v1270_v38   ;;  %v182_v47 = vand.u32 2147483648, %v3195_v19 }
  0x86   :  { %v161_v31 = vmul.f32 %v3207_v24, %v3177_v12  ;;  %2696 = vrsqrt.f32 %v3195_v19  ;;  %vm179_vm5 = vcmp.eq.f32.partialorder %v3195_v19, inf  ;;  %vm181_vm9 = vcmp.eq.f32.partialorder %v3195_v19, 0.0 }
  0x87   :  { %v186_v35 = vmul.f32 %v3202_v22, %v185_v27  ;;  %v211_v42 = vmul.f32 0.5, %v210_v34 }
  0x88   :  { %v162_v37 = vmul.f32 %v3207_v24, %v161_v31  ;;  %1678 = vperm.xlu2 %2685, %v1268_v52  }
  0x89   :  { %v187_v43 = vmul.f32 0.5, %v186_v35  ;;  %v212_v54 = vsub.f32 1.5, %v211_v42 }
  0x8a   :  { %v3232_v36 = vpop.eup %2692  ;;  %v163_v48 = vmul.f32 0.5, %v162_v37 }
  0x8b   :  { %v3215_v28 = vpop.xlane.xlu2 %112  ;;  %v3217_v29 = vpop.xlane.xlu1 %110  ;;  %v221_v44 = vmul.f32 %v3232_v36, %v3188_v16  ;;  %v188_v55 = vsub.f32 1.5, %v187_v43  ;;  %v213_v63 = vmul.f32 %v3200_v21, %v212_v54 }
  0x8c   :  { %v3225_v32 = vpop.xlane.xlu0 %108  ;;  %2698 = vrsqrt.f32 %v3215_v28  ;;  %v3239_v39 = vpop.eup %2694  ;;  %v164_v58 = vsub.f32 1.5, %v163_v48  ;;  %vm263_vm6 = vcmp.eq.f32.partialorder %v3215_v28, inf  ;;  %vm251_vm8 = vcmp.eq.f32.partialorder %v3217_v29, inf }
  0x8d   :  { %v3241_v41 = vpop.eup %2696  ;;  %2700 = vrsqrt.f32 %v3217_v29  ;;  %v197_v49 = vmul.f32 %v3239_v39, %v3190_v17  ;;  %v222_v56 = vmul.f32 %v3232_v36, %v221_v44  ;;  %1693 = vperm.xlu0 %2683, %v1273_v60   ;;  %v189_v0 = vmul.f32 %v3202_v22, %v188_v55 }
  0x8e   :  { %v173_v51 = vmul.f32 %v3241_v41, %v3195_v19  ;;  %2702 = vrsqrt.f32 %v3225_v32  ;;  %v165_v7 = vmul.f32 %v3207_v24, %v164_v58  ;;  %v214_v22 = vmul.f32 %v213_v63, %v3173_v10 }
  0x8f   :  { %v198_v59 = vmul.f32 %v3239_v39, %v197_v49  ;;  %v223_v1 = vmul.f32 0.5, %v222_v56  ;;  %v190_v25 = vmul.f32 %v189_v0, %v3175_v11  ;;  %vm239_vm11 = vcmp.eq.f32.partialorder %v3225_v32, inf }
  0x90   :  { %v174_v61 = vmul.f32 %v3241_v41, %v173_v51  ;;  %v166_v33 = vmul.f32 %v165_v7, %v3177_v12  ;;  %v3323_v44 = vsel %vm215_vm0, %v3173_v10, %v214_v22 }
  0x91   :  { %v199_v9 = vmul.f32 0.5, %v198_v59  ;;  %v224_v26 = vsub.f32 1.5, %v223_v1  ;;  %v3332_v51 = vsel %vm191_vm1, %v3175_v11, %v190_v25 }
  0x92   :  { %v3262_v53 = vpop.eup %2698  ;;  %v175_v18 = vmul.f32 0.5, %v174_v61 }
  0x93   :  { %v3246_v45 = vpop.xlane.xlu2 %118  ;;  %v3248_v46 = vpop.xlane.xlu1 %116  ;;  %v257_v62 = vmul.f32 %v3262_v53, %v3215_v28  ;;  %v200_v34 = vsub.f32 1.5, %v199_v9  ;;  %v225_v52 = vmul.f32 %v3232_v36, %v224_v26 }
  0x94   :  { %v3255_v50 = vpop.xlane.xlu0 %114  ;;  %v3266_v57 = vpop.eup %2700  ;;  %2704 = vrsqrt.f32 %v3246_v45  ;;  %v176_v38 = vsub.f32 1.5, %v175_v18  ;;  %vm299_vm10 = vcmp.eq.f32.partialorder %v3246_v45, inf  ;;  %vm287_vm12 = vcmp.eq.f32.partialorder %v3248_v46, inf }
  0x95   :  { %2706 = vrsqrt.f32 %v3248_v46  ;;  %v245_v3 = vmul.f32 %v3266_v57, %v3217_v29  ;;  %v3292_v14 = vpop.eup %2702  ;;  %v258_v20 = vmul.f32 %v3262_v53, %v257_v62  ;;  %v201_v59 = vmul.f32 %v3239_v39, %v200_v34 }
  0x96   :  { %2708 = vrsqrt.f32 %v3255_v50  ;;  %v233_v37 = vmul.f32 %v3292_v14, %v3225_v32  ;;  %v168_v62 = vsel %vm167_vm2, %v3177_v12, %v166_v33  ;;  %v177_v63 = vmul.f32 %v3241_v41, %v176_v38 }
  0x97   :  { %v246_v30 = vmul.f32 %v3266_v57, %v245_v3  ;;  %v259_v40 = vmul.f32 0.5, %v258_v20  ;;  %v226_v41 = vmul.f32 %v225_v52, %v3188_v16  ;;  %v202_v26 = vmul.f32 %v201_v59, %v3190_v17 }
  0x98   :  { %v234_v60 = vmul.f32 %v3292_v14, %v233_v37  ;;  %v178_v37 = vmul.f32 %v177_v63, %v3195_v19  ;;  %vm275_vm14 = vcmp.eq.f32.partialorder %v3255_v50, inf }
  0x99   :  { %v247_v54 = vmul.f32 0.5, %v246_v30  ;;  %v260_v0 = vsub.f32 1.5, %v259_v40  ;;  %v3385_v59 = vsel %vm227_vm3, %v3188_v16, %v226_v41  ;;  %v3393_v63 = vsel %vm203_vm4, %v3190_v17, %v202_v26 }
  0x9a   :  { %v3297_v21 = vpop.eup %2704  ;;  %v235_v30 = vmul.f32 0.5, %v234_v60 }
  0x9b   :  { %v3283_v4 = vpop.xlane.xlu2 %124  ;;  %v3285_v5 = vpop.xlane.xlu1 %122  ;;  %v293_v42 = vmul.f32 %v3297_v21, %v3246_v45  ;;  %v248_v22 = vsub.f32 1.5, %v247_v54  ;;  %v261_v38 = vmul.f32 %v3262_v53, %v260_v0 }
  0x9c   :  { %6052 = vst [vmem:[#allocation5_spill] sm:$0xff] %v3283_v4  ;;  %2710 = vrsqrt.f32 %v3283_v4  ;;  %v3290_v13 = vpop.xlane.xlu0 %120  ;;  %v3303_v24 = vpop.eup %2706  ;;  %v236_v0 = vsub.f32 1.5, %v235_v30  ;;  %vm335_vm13 = vcmp.eq.f32.partialorder %v3283_v4, inf  ;;  %vm323_vm15 = vcmp.eq.f32.partialorder %v3285_v5, inf }
  0x9d   :  { %2712 = vrsqrt.f32 %v3285_v5  ;;  %v3308_v31 = vpop.eup %2708  ;;  %v281_v49 = vmul.f32 %v3303_v24, %v3248_v46  ;;  %v294_v39 = vmul.f32 %v3297_v21, %v293_v42  ;;  %v249_v53 = vmul.f32 %v3266_v57, %v248_v22 }
  0x9e   :  { %2714 = vrsqrt.f32 %v3290_v13  ;;  %v269_v55 = vmul.f32 %v3308_v31, %v3255_v50  ;;  %v180_v57 = vsel %vm179_vm5, %v3195_v19, %v178_v37  ;;  %v262_v22 = vmul.f32 %v261_v38, %v3215_v28  ;;  %v1266_v19 = vld [vmem:[%s5991_s2 + $0x48] sm:$0xff] }
  0x9f   :  { %v282_v7 = vmul.f32 %v3303_v24, %v281_v49  ;;  %v295_v40 = vmul.f32 0.5, %v294_v39  ;;  %v250_v3 = vmul.f32 %v249_v53, %v3217_v29  ;;  %v171_v53 = vsel %vm169_vm7, %v170_v23, %v168_v62  ;;  %1672 = vperm.xlu1 %2684, %v1266_v19  }
  0xa0   :  { %v270_v25 = vmul.f32 %v3308_v31, %v269_v55  ;;  %vm311_vm0 = vcmp.eq.f32.partialorder %v3290_v13, inf  ;;  %vm193_vm5 = vcmp.eq.f32.partialorder %v3175_v11, 0.0 }
  0xa1   :  { %v283_v52 = vmul.f32 0.5, %v282_v7 }
  0xa2   :  { %v3318_v43 = vpop.eup %2710  ;;  %v271_v60 = vmul.f32 0.5, %v270_v25  ;;  %v296_v25 = vsub.f32 1.5, %v295_v40 }
  0xa3   :  { %v3338_v56 = vpop.xlane.xlu2 %130  ;;  %v3340_v58 = vpop.eup %2712  ;;  %v329_v61 = vmul.f32 %v3318_v43, %v3283_v4  ;;  %v284_v26 = vsub.f32 1.5, %v283_v52  ;;  %v237_v52 = vmul.f32 %v3292_v14, %v236_v0 }
  0xa4   :  { %2716 = vrsqrt.f32 %v3338_v56  ;;  %v3348_v36 = vpop.xlane.xlu1 %128  ;;  %v317_v9 = vmul.f32 %v3340_v58, %v3285_v5  ;;  %v3361_v18 = vpop.xlane.xlu0 %126  ;;  %v272_v42 = vsub.f32 1.5, %v271_v60  ;;  %v3428_v60 = vsel %vm263_vm6, %v3215_v28, %v262_v22 }
  0xa5   :  { %v3363_v20 = vpop.eup %2714  ;;  %2718 = vrsqrt.f32 %v3348_v36  ;;  %v330_v33 = vmul.f32 %v3318_v43, %v329_v61  ;;  %v285_v0 = vmul.f32 %v3303_v24, %v284_v26  ;;  %v238_v24 = vmul.f32 %v237_v52, %v3225_v32 }
  0xa6   :  { %v305_v34 = vmul.f32 %v3363_v20, %v3290_v13  ;;  %v318_v54 = vmul.f32 %v3340_v58, %v317_v9  ;;  %2720 = vrsqrt.f32 %v3361_v18  ;;  %v273_v22 = vmul.f32 %v3308_v31, %v272_v42 }
  0xa7   :  { %v331_v7 = vmul.f32 0.5, %v330_v33  ;;  %v3461_v42 = vmax.f32 %v171_v53, 1e-12  ;;  %vm371_vm1 = vcmp.eq.f32.partialorder %v3338_v56, inf  ;;  %vm205_vm6 = vcmp.eq.f32.partialorder %v3190_v17, 0.0 }
  0xa8   :  { %v306_v55 = vmul.f32 %v3363_v20, %v305_v34  ;;  %v319_v34 = vmul.f32 0.5, %v318_v54 }
  0xa9   :  { %v332_v39 = vsub.f32 1.5, %v331_v7  ;;  %vm581_vm2 = vweird.f32 %v3461_v42 }
  0xaa   :  { %v3376_v49 = vpop.eup %2716  ;;  %v307_v33 = vmul.f32 0.5, %v306_v55  ;;  %v320_v12 = vsub.f32 1.5, %v319_v34 }
  0xab   :  { %v365_v61 = vmul.f32 %v3376_v49, %v3338_v56  ;;  %v3397_v9 = vpop.xlane.xlu2 %136  ;;  %v3399_v41 = vpop.eup %2718  ;;  %v333_v26 = vmul.f32 %v3318_v43, %v332_v39  ;;  %v286_v43 = vmul.f32 %v285_v0, %v3248_v46 }
  0xac   :  { %2722 = vrsqrt.f32 %v3397_v9  ;;  %v3408_v1 = vpop.xlane.xlu1 %134  ;;  %v353_v38 = vmul.f32 %v3399_v41, %v3348_v36  ;;  %v3415_v40 = vpop.eup %2720  ;;  %v308_v62 = vsub.f32 1.5, %v307_v33  ;;  %v321_v39 = vmul.f32 %v3340_v58, %v320_v12  ;;  %v1276_v58 = vld [vmem:[%s5991_s2 + $0x98] sm:$0xff] }
  0xad   :  { %v366_v37 = vmul.f32 %v3376_v49, %v365_v61  ;;  %v3419_v55 = vpop.xlane.xlu0 %132  ;;  %v297_v61 = vmul.f32 %v3297_v21, %v296_v25  ;;  %v341_v14 = vmul.f32 %v3415_v40, %v3361_v18  ;;  %2724 = vrsqrt.f32 %v3408_v1  ;;  %1702 = vperm.xlu0 %2683, %v1276_v58  }
  0xae   :  { %v3444_v21 = vsel %vm251_vm8, %v3217_v29, %v250_v3  ;;  %v354_v54 = vmul.f32 %v3399_v41, %v353_v38  ;;  %2726 = vrsqrt.f32 %v3419_v55  ;;  %v183_v3 = vsel %vm181_vm9, %v182_v47, %v180_v57  ;;  %v1271_v47 = vld [vmem:[%s5991_s2 + $0x70] sm:$0xff] }
  0xaf   :  { %v367_v25 = vmul.f32 0.5, %v366_v37  ;;  %v342_v34 = vmul.f32 %v3415_v40, %v341_v14  ;;  %v298_v33 = vmul.f32 %v297_v61, %v3246_v45  ;;  %v309_v37 = vmul.f32 %v3363_v20, %v308_v62  ;;  %1687 = vperm.xlu2 %2685, %v1271_v47  }
  0xb0   :  { %v3466_v38 = vmax.f32 %v183_v3, 1e-12  ;;  %v274_v61 = vmul.f32 %v273_v22, %v3255_v50  ;;  %v355_v23 = vmul.f32 0.5, %v354_v54  ;;  %2728 = vrcp.f32 %v3461_v42  ;;  %v1279_v54 = vld [vmem:[%s5991_s2 + $0xb0] sm:$0xff] }
  0xb1   :  { %v368_v14 = vsub.f32 1.5, %v367_v25  ;;  %v3484_v20 = vsel %vm239_vm11, %v3225_v32, %v238_v24  ;;  %v334_v57 = vmul.f32 %v333_v26, %v3283_v4  ;;  %v343_v53 = vmul.f32 0.5, %v342_v34 }
  0xb2   :  { %v3439_v7 = vpop.eup %2722  ;;  %v3493_v12 = vsel %vm299_vm10, %v3246_v45, %v298_v33  ;;  %2730 = vrcp.f32 %v3466_v38  ;;  %v3503_v24 = vsel %vm287_vm12, %v3248_v46, %v286_v43  ;;  %v322_v26 = vmul.f32 %v321_v39, %v3285_v5 }
  0xb3   :  { %v401_v31 = vmul.f32 %v3439_v7, %v3397_v9  ;;  %v3468_v52 = vpop.eup %2724  ;;  %v310_v34 = vmul.f32 %v309_v37, %v3290_v13  ;;  %v3509_v3 = vpop.xlane.xlu2 %142  ;;  %v3516_v19 = vsel %vm275_vm14, %v3255_v50, %v274_v61  ;;  %v369_v47 = vmul.f32 %v3376_v49, %v368_v14  ;;  %v1274_v14 = vld [vmem:[%s5991_s2 + $0x88] sm:$0xff] }
  0xb4   :  { %v3488_v0 = vpop.xlane.xlu1 %140  ;;  %v3498_v25 = vpop.eup %2726  ;;  %v389_v33 = vmul.f32 %v3468_v52, %v3408_v1  ;;  %v356_v43 = vsub.f32 1.5, %v355_v23  ;;  %v3523_v39 = vsel %vm335_vm13, %v3283_v4, %v334_v57  ;;  %v344_v37 = vsub.f32 1.5, %v343_v53  ;;  %v1269_v23 = vld [vmem:[%s5991_s2 + $0x60] sm:$0xff] }
  0xb5   :  { %v402_v22 = vmul.f32 %v3439_v7, %v401_v31  ;;  %v3511_v31 = vpop.xlane.xlu0 %138  ;;  %6053 = vst [vmem:[#allocation6_spill] sm:$0xff] %v3523_v39  ;;  %v377_v49 = vmul.f32 %v3498_v25, %v3419_v55  ;;  %2732 = vrsqrt.f32 %v3509_v3  ;;  %v3542_v57 = vsel %vm323_vm15, %v3285_v5, %v322_v26  ;;  %1681 = vperm.xlu1 %2684, %v1269_v23  }
  0xb6   :  { %v2729_v27 = vpop.eup %2728  ;;  %6054 = vst [vmem:[#allocation7_spill] sm:$0xff] %v3542_v57  ;;  %v3547_v53 = vsel %vm311_vm0, %v3290_v13, %v310_v34  ;;  %v370_v26 = vmul.f32 %v369_v47, %v3338_v56  ;;  %v357_v58 = vmul.f32 %v3399_v41, %v356_v43  ;;  %v585_v34 = vand.u32 2147483647, %v3461_v42  ;;  %1711 = vperm.xlu0 %2683, %v1279_v54  }
  0xb7   :  { %v3527_v6 = vmul.f32 0.5, %v402_v22  ;;  %6055 = vst [vmem:[#allocation8_spill] sm:$0xff] %v3547_v53  ;;  %v390_v22 = vmul.f32 %v3468_v52, %v389_v33  ;;  %v577_v62 = vmul.f32 %v2729_v27, %v3461_v42  ;;  %v345_v48 = vmul.f32 %v3415_v40, %v344_v37  ;;  %1696 = vperm.xlu2 %2685, %v1274_v14  }
  0xb8   :  { %v3555_v61 = vpop.eup %2730  ;;  %v378_v47 = vmul.f32 %v3498_v25, %v377_v49  ;;  %v587_v41 = vand.u32 2147483648, %v3461_v42  ;;  %2734 = vrsqrt.f32 %v3488_v0  ;;  %vm582_vm3 = vweird.f32 %v2729_v27 }
  0xb9   :  { %v578_v35 = vsub.f32 1.0, %v577_v62  ;;  %v592_v33 = vmul.f32 %v3555_v61, %v3466_v38  ;;  %v404_v15 = vsub.f32 1.5, %v3527_v6  ;;  %v391_v43 = vmul.f32 0.5, %v390_v22  ;;  %vm583_vm8 = vmor %vm581_vm2, %vm582_vm3 }
  0xba   :  { %vm3573_vm4 = vcmp.eq.f32.partialorder %v585_v34, 8.507059e+37  ;;  %v600_v6 = vand.u32 2147483647, %v3466_v38  ;;  %v602_v49 = vand.u32 2147483648, %v3466_v38  ;;  %2736 = vrsqrt.f32 %v3511_v31 }
  0xbb   :  { %v579_v30 = vmul.f32 %v2729_v27, %v578_v35  ;;  %v593_v40 = vsub.f32 1.0, %v592_v33  ;;  %v3571_v37 = vpop.eup %2732  ;;  %vm597_vm7 = vweird.f32 %v3555_v61  ;;  %v379_v34 = vmul.f32 0.5, %v378_v47  ;;  %v3611_v23 = vpop.xlane.xlu2 %148 }
  0xbc   :  { %v3569_v62 = vpop.xlane.xlu1 %146  ;;  %v437_v14 = vmul.f32 %v3571_v37, %v3509_v3  ;;  %v588_v33 = vor.u32 1.1754944e-38, %v587_v41  ;;  %vm596_vm9 = vweird.f32 %v3466_v38  ;;  %vm359_vm10 = vcmp.eq.f32.partialorder %v3348_v36, inf }
  0xbd   :  { %v580_v35 = vadd.f32 %v2729_v27, %v579_v30  ;;  %v594_v54 = vmul.f32 %v3555_v61, %v593_v40  ;;  %v3586_v22 = vpop.xlane.xlu0 %144  ;;  %2738 = vrsqrt.f32 %v3569_v62  ;;  %v392_v30 = vsub.f32 1.5, %v391_v43  ;;  %vm3601_vm12 = vmor %vm596_vm9, %vm597_vm7 }
  0xbe   :  { %v438_v4 = vmul.f32 %v3571_v37, %v437_v14  ;;  %v2735_v57 = vpop.eup %2734  ;;  %vm407_vm11 = vcmp.eq.f32.partialorder %v3397_v9, inf  ;;  %vm601_vm13 = vcmp.eq.f32.partialorder %v600_v6, 8.507059e+37  ;;  %2740 = vrsqrt.f32 %v3586_v22 }
  0xbf   :  { %v584_v39 = vsel %vm583_vm8, %v2729_v27, %v580_v35  ;;  %v595_v40 = vadd.f32 %v3555_v61, %v594_v54  ;;  %v603_v27 = vor.u32 1.1754944e-38, %v602_v49  ;;  %vm347_vm14 = vcmp.eq.f32.partialorder %v3361_v18, inf }
  0xc0   :  { %v589_v42 = vsel %vm3573_vm4, %v588_v33, %v584_v39  ;;  %v439_v43 = vmul.f32 0.5, %v438_v4  ;;  %v425_v39 = vmul.f32 %v2735_v57, %v3488_v0  ;;  %v3613_v35 = vpop.eup %2736  ;;  %vm265_vm15 = vcmp.eq.f32.partialorder %v3215_v28, 0.0 }
  0xc1   :  { %v590_v47 = vmul.f32 30.0, %v589_v42  ;;  %v599_v41 = vsel %vm3601_vm12, %v3555_v61, %v595_v40  ;;  %v3619_v6 = vsel %vm371_vm1, %v3338_v56, %v370_v26  ;;  %v358_v49 = vmul.f32 %v357_v58, %v3348_v36 }
  0xc2   :  { %v380_v54 = vsub.f32 1.5, %v379_v34  ;;  %v604_v14 = vsel %vm601_vm13, %v603_v27, %v599_v41  ;;  %v346_v61 = vmul.f32 %v345_v48, %v3361_v18  ;;  %v405_v4 = vmul.f32 %v3439_v7, %v404_v15 }
  0xc3   :  { %v605_v33 = vmul.f32 30.0, %v604_v14  ;;  %v426_v40 = vmul.f32 %v2735_v57, %v425_v39  ;;  %v3624_v42 = vpop.eup %2738  ;;  %v393_v38 = vmul.f32 %v3468_v52, %v392_v30  ;;  %vm395_vm0 = vcmp.eq.f32.partialorder %v3408_v1, inf }
  0xc4   :  { %v1056_v53 = vmul.f32 %v590_v47, %v3072_v2  ;;  %v413_v26 = vmul.f32 %v3613_v35, %v3511_v31  ;;  %2742 = vrsqrt.f32 %v3611_v23  ;;  %vm383_vm1 = vcmp.eq.f32.partialorder %v3419_v55, inf  ;;  %v3636_v34 = vpop.eup %2740 }
  0xc5   :  { %v1057_v48 = vmul.f32 %v605_v33, %v3085_v8  ;;  %v440_v15 = vsub.f32 1.5, %v439_v43  ;;  %v427_v7 = vmul.f32 0.5, %v426_v40  ;;  %v461_v58 = vmul.f32 %v3624_v42, %v3569_v62 }
  0xc6   :  { %v381_v52 = vmul.f32 %v3498_v25, %v380_v54  ;;  %v414_v2 = vmul.f32 %v3613_v35, %v413_v26  ;;  %v6060_v30 = vand.u32 2147483648, %v3175_v11  ;;  %v6061_v8 = vand.u32 2147483648, %v3190_v17 }
  0xc7   :  { %vm277_vm2 = vcmp.eq.f32.partialorder %v3255_v50, 0.0  ;;  %v406_v41 = vmul.f32 %v405_v4, %v3397_v9  ;;  %v1088_v43 = vpack.c.bf16 %v1057_v48, %v1056_v53  ;;  %v428_v25 = vsub.f32 1.5, %v427_v7 }
  0xc8   :  { %v195_v27 = vsel %vm193_vm5, %v6060_v30, %v3332_v51  ;;  %v207_v47 = vsel %vm205_vm6, %v6061_v8, %v3393_v63  ;;  %v462_v39 = vmul.f32 %v3624_v42, %v461_v58  ;;  %v415_v54 = vmul.f32 0.5, %v414_v2  ;;  %v1277_v8 = vld [vmem:[%s5991_s2 + $0xa0] sm:$0xff] }
  0xc9   :  { %v449_v14 = vmul.f32 %v3636_v34, %v3586_v22  ;;  %v3655_v11 = vmax.f32 %v195_v27, 1e-12  ;;  %v3657_v51 = vmax.f32 %v207_v47, 1e-12  ;;  %v3662_v17 = vsel %vm359_vm10, %v3348_v36, %v358_v49  ;;  %1176 = vmatmul.bf16.vlgmr.msra.gmra.mxu0 %v1088_v43  ;;  %v1272_v27 = vld [vmem:[%s5991_s2 + $0x78] sm:$0xff]  ;;  %v1282_v47 = vld [vmem:[%s5991_s2 + $0xc8] sm:$0xff]  ;;  %1705 = vperm.xlu2 %2685, %v1277_v8  }
  0xca   :  { %v394_v63 = vmul.f32 %v393_v38, %v3408_v1  ;;  %v441_v53 = vmul.f32 %v3571_v37, %v440_v15  ;;  %v463_v4 = vmul.f32 0.5, %v462_v39  ;;  %v3666_v33 = vpop.eup %2742  ;;  %v3671_v40 = vsel %vm347_vm14, %v3361_v18, %v346_v61  ;;  %1690 = vperm.xlu1 %2684, %v1272_v27   ;;  %1720 = vperm.xlu0 %2683, %v1282_v47   ;;  %v1275_v27 = vld [vmem:[%s5991_s2 + $0x90] sm:$0xff]  ;;  %v1280_v8 = vld [vmem:[%s5991_s2 + $0xb8] sm:$0xff] }
  0xcb   :  { %v382_v26 = vmul.f32 %v381_v52, %v3419_v55  ;;  %v450_v48 = vmul.f32 %v3636_v34, %v449_v14  ;;  %2744 = vrcp.f32 %v3655_v11  ;;  %v3679_v49 = vsel %vm407_vm11, %v3397_v9, %v406_v41 }
  0xcc   :  { %vm443_vm3 = vcmp.eq.f32.partialorder %v3509_v3, inf  ;;  %v429_v37 = vmul.f32 %v2735_v57, %v428_v25  ;;  %v473_v38 = vmul.f32 %v3666_v33, %v3611_v23  ;;  %v416_v15 = vsub.f32 1.5, %v415_v54 }
  0xcd   :  { %v464_v7 = vsub.f32 1.5, %v463_v4  ;;  %2746 = vrcp.f32 %v3657_v51  ;;  %v3689_v58 = vsel %vm395_vm0, %v3408_v1, %v394_v63  ;;  %v442_v52 = vmul.f32 %v441_v53, %v3509_v3 }
  0xce   :  { %v451_v2 = vmul.f32 0.5, %v450_v48  ;;  %v6062_v57 = vand.u32 2147483648, %v3215_v28  ;;  %v3709_v41 = vsel %vm383_vm1, %v3419_v55, %v382_v26  ;;  %vm431_vm4 = vcmp.eq.f32.partialorder %v3488_v0, inf  ;;  %v3763_v28 = vpop.xlane.xlu0 %150 }
  0xcf   :  { %vm217_vm5 = vcmp.eq.f32.partialorder %v3173_v10, 0.0  ;;  %vm229_vm6 = vcmp.eq.f32.partialorder %v3188_v16, 0.0  ;;  %v430_v43 = vmul.f32 %v429_v37, %v3488_v0  ;;  %vm419_vm7 = vcmp.eq.f32.partialorder %v3511_v31, inf }
  0xd0   :  { %v267_v30 = vsel %vm265_vm15, %v6062_v57, %v3428_v60  ;;  %v422_v60 = vand.u32 2147483648, %v3511_v31  ;;  %vm467_vm8 = vcmp.eq.f32.partialorder %v3569_v62, inf  ;;  %v470_v25 = vand.u32 2147483648, %v3569_v62 }
  0xd1   :  { %v458_v39 = vand.u32 2147483648, %v3586_v22  ;;  %v474_v54 = vmul.f32 %v3666_v33, %v473_v38  ;;  %v2745_v14 = vpop.eup %2744  ;;  %v417_v63 = vmul.f32 %v3613_v35, %v416_v15  ;;  %v465_v53 = vmul.f32 %v3624_v42, %v464_v7  ;;  %1714 = vperm.xlu2 %2685, %v1280_v8  }
  0xd2   :  { %v6063_v4 = vand.u32 2147483648, %v3255_v50  ;;  %v3729_v48 = vmax.f32 %v267_v30, 1e-12  ;;  %v3734_v37 = vsel %vm443_vm3, %v3509_v3, %v442_v52  ;;  %v452_v38 = vsub.f32 1.5, %v451_v2  ;;  %1699 = vperm.xlu1 %2684, %v1275_v27  }
  0xd3   :  { %v607_v35 = vmul.f32 %v2745_v14, %v3655_v11  ;;  %v2747_v15 = vpop.eup %2746  ;;  %vm611_vm9 = vweird.f32 %v3655_v11  ;;  %v615_v42 = vand.u32 2147483647, %v3655_v11  ;;  %v617_v50 = vand.u32 2147483648, %v3655_v11 }
  0xd4   :  { %v279_v26 = vsel %vm277_vm2, %v6063_v4, %v3516_v19  ;;  %v3746_v7 = vsel %vm431_vm4, %v3488_v0, %v430_v43  ;;  %v475_v52 = vmul.f32 0.5, %v474_v54  ;;  %v622_v30 = vmul.f32 %v2747_v15, %v3657_v51  ;;  %v1285_v43 = vld [vmem:[%s5991_s2 + $0xe0] sm:$0xff] }
  0xd5   :  { %v3741_v19 = vmax.f32 %v279_v26, 1e-12  ;;  %v608_v2 = vsub.f32 1.0, %v607_v35  ;;  %v418_v47 = vmul.f32 %v417_v63, %v3511_v31  ;;  %v466_v4 = vmul.f32 %v465_v53, %v3569_v62  ;;  %1729 = vperm.xlu0 %2683, %v1285_v43  }
  0xd6   :  { %v630_v26 = vand.u32 2147483647, %v3657_v51  ;;  %2748 = vrcp.f32 %v3729_v48  ;;  %v453_v54 = vmul.f32 %v3636_v34, %v452_v38  ;;  %vm612_vm10 = vweird.f32 %v2745_v14 }
  0xd7   :  { %v609_v35 = vmul.f32 %v2745_v14, %v608_v2  ;;  %v623_v61 = vsub.f32 1.0, %v622_v30  ;;  %vm3765_vm11 = vcmp.eq.f32.partialorder %v615_v42, 8.507059e+37  ;;  %v618_v63 = vor.u32 1.1754944e-38, %v617_v50  ;;  %vm613_vm15 = vmor %vm611_vm9, %vm612_vm10 }
  0xd8   :  { %v632_v53 = vand.u32 2147483648, %v3657_v51  ;;  %2750 = vrcp.f32 %v3741_v19  ;;  %vm301_vm12 = vcmp.eq.f32.partialorder %v3246_v45, 0.0  ;;  %vm289_vm13 = vcmp.eq.f32.partialorder %v3248_v46, 0.0 }
  0xd9   :  { %v476_v34 = vsub.f32 1.5, %v475_v52  ;;  %v610_v38 = vadd.f32 %v2745_v14, %v609_v35  ;;  %v624_v2 = vmul.f32 %v2747_v15, %v623_v61  ;;  %vm627_vm14 = vweird.f32 %v2747_v15 }
  0xda   :  { %v3776_v42 = vsel %vm419_vm7, %v3511_v31, %v418_v47  ;;  %v3781_v50 = vsel %vm467_vm8, %v3569_v62, %v466_v4  ;;  %vm626_vm0 = vweird.f32 %v3657_v51  ;;  %2752 = vrsqrt.f32 %v3763_v28 }
  0xdb   :  { %v454_v61 = vmul.f32 %v453_v54, %v3586_v22  ;;  %vm455_vm1 = vcmp.eq.f32.partialorder %v3586_v22, inf  ;;  %v614_v52 = vsel %vm613_vm15, %v2745_v14, %v610_v38  ;;  %v625_v30 = vadd.f32 %v2747_v15, %v624_v2  ;;  %vm628_vm3 = vmor %vm626_vm0, %vm627_vm14 }
  0xdc   :  { %vm631_vm2 = vcmp.eq.f32.partialorder %v630_v26, 8.507059e+37  ;;  %v2749_v27 = vpop.eup %2748  ;;  %v619_v8 = vsel %vm3765_vm11, %v618_v63, %v614_v52  ;;  %v633_v47 = vor.u32 1.1754944e-38, %v632_v53  ;;  %v6066_v11 = vand.u32 2147483648, %v3173_v10 }
  0xdd   :  { %v6067_v4 = vand.u32 2147483648, %v3188_v16  ;;  %v477_v26 = vmul.f32 %v3666_v33, %v476_v34  ;;  %v620_v43 = vmul.f32 30.0, %v619_v8  ;;  %v629_v54 = vsel %vm628_vm3, %v2747_v15, %v625_v30  ;;  %v2942_v34 = vld [vmem:[%s5989_s0 + $0x10] sm:$0xff]  ;;  %v2943_v30 = vld [vmem:[%s5989_s0 + $0x18] sm:$0xff] }
  0xde   :  { %v219_v51 = vsel %vm217_vm5, %v6066_v11, %v3323_v44  ;;  %v697_v57 = vmul.f32 %v2749_v27, %v3729_v48  ;;  %v2751_v35 = vpop.eup %2750  ;;  %v634_v63 = vsel %vm631_vm2, %v633_v47, %v629_v54  ;;  %vm701_vm4 = vweird.f32 %v3729_v48 }
  0xdf   :  { %v231_v14 = vsel %vm229_vm6, %v6067_v4, %v3385_v59  ;;  %v3805_v53 = vmax.f32 %v219_v51, 1e-12  ;;  %v635_v44 = vmul.f32 30.0, %v634_v63  ;;  %v705_v2 = vand.u32 2147483647, %v3729_v48 }
  0xe0   :  { %v3807_v10 = vmax.f32 %v231_v14, 1e-12  ;;  %v698_v38 = vsub.f32 1.0, %v697_v57  ;;  %v712_v16 = vmul.f32 %v2751_v35, %v3741_v19  ;;  %v3811_v59 = vpop.eup %2752  ;;  %vm702_vm5 = vweird.f32 %v2749_v27 }
  0xe1   :  { %v707_v33 = vand.u32 2147483648, %v3729_v48  ;;  %v720_v15 = vand.u32 2147483647, %v3741_v19  ;;  %2754 = vrcp.f32 %v3805_v53  ;;  %v1058_v52 = vmul.f32 %v2942_v34, %v620_v43  ;;  %vm703_vm8 = vmor %vm701_vm4, %vm702_vm5 }
  0xe2   :  { %v1059_v8 = vmul.f32 %v2943_v30, %v635_v44  ;;  %v699_v47 = vmul.f32 %v2749_v27, %v698_v38  ;;  %v713_v11 = vsub.f32 1.0, %v712_v16  ;;  %v722_v51 = vand.u32 2147483648, %v3741_v19 }
  0xe3   :  { %v485_v4 = vmul.f32 %v3811_v59, %v3763_v28  ;;  %2756 = vrcp.f32 %v3807_v10  ;;  %v6068_v14 = vand.u32 2147483648, %v3248_v46  ;;  %vm373_vm6 = vcmp.eq.f32.partialorder %v3338_v56, 0.0 }
  0xe4   :  { %v1089_v54 = vpack.c.bf16 %v1059_v8, %v1058_v52  ;;  %v700_v57 = vadd.f32 %v2749_v27, %v699_v47  ;;  %v714_v63 = vmul.f32 %v2751_v35, %v713_v11  ;;  %vm717_vm7 = vweird.f32 %v2751_v35 }
  0xe5   :  { %v291_v43 = vsel %vm289_vm13, %v6068_v14, %v3503_v24  ;;  %v3835_v44 = vsel %vm455_vm1, %v3586_v22, %v454_v61  ;;  %vm706_vm9 = vcmp.eq.f32.partialorder %v705_v2, 8.507059e+37  ;;  %v708_v38 = vor.u32 1.1754944e-38, %v707_v33 }
  0xe6   :  { %v6069_v46 = vand.u32 2147483648, %v3246_v45  ;;  %vm361_vm10 = vcmp.eq.f32.partialorder %v3348_v36, 0.0  ;;  %1181 = vmatmul.bf16.gmra.mxu0 %v1089_v54  ;;  %v704_v16 = vsel %vm703_vm8, %v2749_v27, %v700_v57  ;;  %v715_v34 = vadd.f32 %v2751_v35, %v714_v63  ;;  %v2945_v63 = vld [vmem:[%s5989_s0 + $0x48] sm:$0xff] }
  0xe7   :  { %vm716_vm11 = vweird.f32 %v3741_v19  ;;  %v3847_v61 = vmax.f32 %v291_v43, 1e-12  ;;  %v2755_v52 = vpop.eup %2754  ;;  %v709_v48 = vsel %vm706_vm9, %v708_v38, %v704_v16  ;;  %vm721_vm14 = vcmp.eq.f32.partialorder %v720_v15, 8.507059e+37 }
  0xe8   :  { %v303_v24 = vsel %vm301_vm12, %v6069_v46, %v3493_v12  ;;  %vm718_vm13 = vmor %vm716_vm11, %vm717_vm7  ;;  %v723_v2 = vor.u32 1.1754944e-38, %v722_v51  ;;  %v486_v33 = vmul.f32 %v3811_v59, %v485_v4  ;;  %v710_v30 = vmul.f32 30.0, %v709_v48  ;;  %v1283_v48 = vld [vmem:[%s5991_s2 + $0xd0] sm:$0xff] }
  0xe9   :  { %v719_v8 = vsel %vm718_vm13, %v2751_v35, %v715_v34  ;;  %v637_v45 = vmul.f32 %v2755_v52, %v3805_v53  ;;  %v3851_v12 = vmax.f32 %v303_v24, 1e-12  ;;  %v3853_v47 = vpop.eup %2756  ;;  %v3856_v27 = vmul.f32 %v477_v26, %v3611_v23  ;;  %v2944_v26 = vld [vmem:[%s5989_s0 + $0x40] sm:$0xff]  ;;  %v1278_v34 = vld [vmem:[%s5991_s2 + $0xa8] sm:$0xff]  ;;  %1723 = vperm.xlu2 %2685, %v1283_v48  }
  0xea   :  { %v724_v19 = vsel %vm721_vm14, %v723_v2, %v719_v8  ;;  %v645_v11 = vand.u32 2147483647, %v3805_v53  ;;  %2758 = vrcp.f32 %v3847_v61  ;;  %v647_v4 = vand.u32 2147483648, %v3805_v53  ;;  %v1288_v2 = vld [vmem:[%s5991_s2 + $0xf8] sm:$0xff]  ;;  %1708 = vperm.xlu1 %2684, %v1278_v34  }
  0xeb   :  { %v725_v15 = vmul.f32 30.0, %v724_v19  ;;  %v638_v51 = vsub.f32 1.0, %v637_v45  ;;  %v660_v35 = vand.u32 2147483647, %v3807_v10  ;;  %v487_v14 = vmul.f32 0.5, %v486_v33  ;;  %1738 = vperm.xlu0 %2683, %v1288_v2  }
  0xec   :  { %vm642_vm12 = vweird.f32 %v2755_v52  ;;  %v652_v43 = vmul.f32 %v3853_v47, %v3807_v10  ;;  %v662_v54 = vand.u32 2147483648, %v3807_v10  ;;  %v1064_v57 = vmul.f32 %v2944_v26, %v710_v30 }
  0xed   :  { %v1065_v38 = vmul.f32 %v2945_v63, %v725_v15  ;;  %v639_v46 = vmul.f32 %v2755_v52, %v638_v51  ;;  %2760 = vrcp.f32 %v3851_v12  ;;  %vm479_vm15 = vcmp.eq.f32.partialorder %v3611_v23, inf }
  0xee   :  { %vm641_vm0 = vweird.f32 %v3805_v53  ;;  %vm3874_vm1 = vcmp.eq.f32.partialorder %v645_v11, 8.507059e+37  ;;  %v653_v16 = vsub.f32 1.0, %v652_v43  ;;  %vm656_vm2 = vweird.f32 %v3807_v10  ;;  %v1286_v10 = vld [vmem:[%s5991_s2 + $0xe8] sm:$0xff] }
  0xef   :  { %v1092_v53 = vpack.c.bf16 %v1065_v38, %v1064_v57  ;;  %v640_v33 = vadd.f32 %v2755_v52, %v639_v46  ;;  %v648_v30 = vor.u32 1.1754944e-38, %v647_v4  ;;  %vm3888_vm3 = vcmp.eq.f32.partialorder %v660_v35, 8.507059e+37  ;;  %vm643_vm4 = vmor %vm641_vm0, %vm642_vm12  ;;  %v3905_v35 = vpop.xlane.xlu2 %154 }
  0xf0   :  { %v2759_v45 = vpop.eup %2758  ;;  %v654_v19 = vmul.f32 %v3853_v47, %v653_v16  ;;  %vm657_vm5 = vweird.f32 %v3853_v47  ;;  %v6074_v11 = vand.u32 2147483648, %v3348_v36  ;;  %v6075_v51 = vand.u32 2147483648, %v3338_v56  ;;  %v1281_v16 = vld [vmem:[%s5991_s2 + $0xc0] sm:$0xff] }
  0xf1   :  { %1196 = vmatmul.bf16.vlgmr.msra.gmra.mxu1 %v1092_v53  ;;  %v488_v43 = vsub.f32 1.5, %v487_v14  ;;  %v644_v26 = vsel %vm643_vm4, %v2755_v52, %v640_v33  ;;  %v663_v57 = vor.u32 1.1754944e-38, %v662_v54  ;;  %v727_v63 = vmul.f32 %v2759_v45, %v3847_v61  ;;  %1732 = vperm.xlu2 %2685, %v1286_v10  }
  0xf2   :  { %v363_v15 = vsel %vm361_vm10, %v6074_v11, %v3662_v17  ;;  %v375_v4 = vsel %vm373_vm6, %v6075_v51, %v3619_v6  ;;  %v649_v38 = vsel %vm3874_vm1, %v648_v30, %v644_v26  ;;  %v655_v36 = vadd.f32 %v3853_v47, %v654_v19  ;;  %vm658_vm6 = vmor %vm656_vm2, %vm657_vm5  ;;  %1717 = vperm.xlu1 %2684, %v1281_v16   ;;  %v2947_v51 = vld [vmem:[%s5989_s0 + $0x28] sm:$0xff] }
  0xf3   :  { %v737_v17 = vand.u32 2147483648, %v3847_v61  ;;  %v3912_v46 = vmax.f32 %v363_v15, 1e-12  ;;  %v2761_v56 = vpop.eup %2760  ;;  %v728_v6 = vsub.f32 1.0, %v727_v63  ;;  %vm731_vm7 = vweird.f32 %v3847_v61 }
  0xf4   :  { %v3919_v52 = vmax.f32 %v375_v4, 1e-12  ;;  %2762 = vrsqrt.f32 %v3905_v35  ;;  %v650_v14 = vmul.f32 30.0, %v649_v38  ;;  %v659_v54 = vsel %vm658_vm6, %v3853_v47, %v655_v36 }
  0xf5   :  { %v742_v24 = vmul.f32 %v2761_v56, %v3851_v12  ;;  %2764 = vrcp.f32 %v3912_v46  ;;  %v664_v34 = vsel %vm3888_vm3, %v663_v57, %v659_v54  ;;  %v729_v48 = vmul.f32 %v2759_v45, %v728_v6 }
  0xf6   :  { %vm732_vm8 = vweird.f32 %v2759_v45  ;;  %v735_v2 = vand.u32 2147483647, %v3847_v61  ;;  %v489_v47 = vmul.f32 %v3811_v59, %v488_v43  ;;  %v665_v53 = vmul.f32 30.0, %v664_v34  ;;  %v2946_v59 = vld [vmem:[%s5989_s0 + $0x20] sm:$0xff] }
  0xf7   :  { %v738_v33 = vor.u32 1.1754944e-38, %v737_v17  ;;  %v743_v30 = vsub.f32 1.0, %v742_v24  ;;  %vm241_vm9 = vcmp.eq.f32.partialorder %v3225_v32, 0.0  ;;  %v730_v19 = vadd.f32 %v2759_v45, %v729_v48  ;;  %vm733_vm11 = vmor %vm731_vm7, %vm732_vm8 }
  0xf8   :  { %v750_v11 = vand.u32 2147483647, %v3851_v12  ;;  %v752_v15 = vand.u32 2147483648, %v3851_v12  ;;  %2766 = vrcp.f32 %v3919_v52  ;;  %vm253_vm10 = vcmp.eq.f32.partialorder %v3217_v29, 0.0 }
  0xf9   :  { %v1060_v8 = vmul.f32 %v2946_v59, %v650_v14  ;;  %v1061_v4 = vmul.f32 %v2947_v51, %v665_v53  ;;  %v744_v43 = vmul.f32 %v2761_v56, %v743_v30  ;;  %vm747_vm13 = vweird.f32 %v2761_v56  ;;  %v3960_v14 = vpop.xlane.xlu1 %152  ;;  %v2948_v53 = vld [vmem:[%s5989_s0 + $0x50] sm:$0xff]  ;;  %v2949_v59 = vld [vmem:[%s5989_s0 + $0x58] sm:$0xff] }
  0xfa   :  { %v3949_v26 = vpop.eup %2762  ;;  %v3955_v57 = vsel %vm479_vm15, %v3611_v23, %v3856_v27  ;;  %v734_v63 = vsel %vm733_vm11, %v2759_v45, %v730_v19  ;;  %vm736_vm14 = vcmp.eq.f32.partialorder %v735_v2, 8.507059e+37  ;;  %vm746_vm12 = vweird.f32 %v3851_v12 }
  0xfb   :  { %v2765_v38 = vpop.eup %2764  ;;  %v1090_v36 = vpack.c.bf16 %v1061_v4, %v1060_v8  ;;  %v739_v17 = vsel %vm736_vm14, %v738_v33, %v734_v63  ;;  %v745_v6 = vadd.f32 %v2761_v56, %v744_v43  ;;  %v509_v61 = vmul.f32 %v3949_v26, %v3905_v35  ;;  %vm748_vm0 = vmor %vm746_vm12, %vm747_vm13 }
  0xfc   :  { %v3963_v54 = vmul.f32 %v489_v47, %v3763_v28  ;;  %v740_v24 = vmul.f32 30.0, %v739_v17  ;;  %v753_v27 = vor.u32 1.1754944e-38, %v752_v15  ;;  %v817_v45 = vmul.f32 %v2765_v38, %v3912_v46 }
  0xfd   :  { %vm491_vm15 = vcmp.eq.f32.partialorder %v3763_v28, inf  ;;  %1186 = vmatmul.bf16.gmra.mxu0 %v1090_v36  ;;  %v749_v12 = vsel %vm748_vm0, %v2761_v56, %v745_v6  ;;  %vm751_vm1 = vcmp.eq.f32.partialorder %v750_v11, 8.507059e+37  ;;  %v827_v16 = vand.u32 2147483648, %v3912_v46 }
  0xfe   :  { %v510_v10 = vmul.f32 %v3949_v26, %v509_v61  ;;  %v2767_v34 = vpop.eup %2766  ;;  %vm313_vm2 = vcmp.eq.f32.partialorder %v3290_v13, 0.0  ;;  %v754_v48 = vsel %vm751_vm1, %v753_v27, %v749_v12  ;;  %v818_v2 = vsub.f32 1.0, %v817_v45 }
  0xff   :  { %vm821_vm3 = vweird.f32 %v3912_v46  ;;  %2768 = vrsqrt.f32 %v3960_v14  ;;  %v755_v47 = vmul.f32 30.0, %v754_v48  ;;  %v1066_v56 = vmul.f32 %v2948_v53, %v740_v24  ;;  %v6078_v53 = vld [vmem:[#allocation8_spill] sm:$0xff] }
 0x100   :  { %v825_v33 = vand.u32 2147483647, %v3912_v46  ;;  %v832_v30 = vmul.f32 %v2767_v34, %v3919_v52  ;;  %vm325_vm4 = vcmp.eq.f32.partialorder %v3285_v5, 0.0  ;;  %v819_v19 = vmul.f32 %v2765_v38, %v818_v2 }
 0x101   :  { %vm822_vm5 = vweird.f32 %v2765_v38  ;;  %v840_v11 = vand.u32 2147483647, %v3919_v52  ;;  %v511_v15 = vmul.f32 0.5, %v510_v10  ;;  %v1067_v8 = vmul.f32 %v2949_v59, %v755_v47  ;;  %v6080_v59 = vld [vmem:[#allocation7_spill] sm:$0xff] }
 0x102   :  { %v828_v51 = vor.u32 1.1754944e-38, %v827_v16  ;;  %v833_v4 = vsub.f32 1.0, %v832_v30  ;;  %v6076_v43 = vand.u32 2147483648, %v3225_v32  ;;  %v820_v36 = vadd.f32 %v2765_v38, %v819_v19  ;;  %vm823_vm6 = vmor %vm821_vm3, %vm822_vm5 }
 0x103   :  { %v842_v17 = vand.u32 2147483648, %v3919_v52  ;;  %v6077_v6 = vand.u32 2147483648, %v3217_v29  ;;  %v1093_v27 = vpack.c.bf16 %v1067_v8, %v1066_v56  ;;  %vm837_vm7 = vweird.f32 %v2767_v34 }
 0x104   :  { %v243_v63 = vsel %vm241_vm9, %v6076_v43, %v3484_v20  ;;  %v834_v45 = vmul.f32 %v2767_v34, %v833_v4  ;;  %v824_v20 = vsel %vm823_vm6, %v2765_v38, %v820_v36  ;;  %vm826_vm8 = vcmp.eq.f32.partialorder %v825_v33, 8.507059e+37  ;;  %v2951_v36 = vld [vmem:[%s5989_s0 + $0x88] sm:$0xff] }
 0x105   :  { %v255_v61 = vsel %vm253_vm10, %v6077_v6, %v3444_v21  ;;  %v3993_v24 = vmax.f32 %v243_v63, 1e-12  ;;  %v3999_v32 = vpop.eup %2768  ;;  %v512_v16 = vsub.f32 1.5, %v511_v15  ;;  %vm385_vm9 = vcmp.eq.f32.partialorder %v3419_v55, 0.0  ;;  %1201 = vmatmul.bf16.gmra.mxu1 %v1093_v27  ;;  %v2950_v15 = vld [vmem:[%s5989_s0 + $0x80] sm:$0xff] }
 0x106   :  { %v3997_v12 = vmax.f32 %v255_v61, 1e-12  ;;  %v829_v29 = vsel %vm826_vm8, %v828_v51, %v824_v20  ;;  %v835_v21 = vadd.f32 %v2767_v34, %v834_v45  ;;  %vm836_vm10 = vweird.f32 %v3919_v52 }
 0x107   :  { %2770 = vrcp.f32 %v3993_v24  ;;  %v497_v46 = vmul.f32 %v3999_v32, %v3960_v14  ;;  %v494_v10 = vand.u32 2147483648, %v3763_v28  ;;  %v830_v48 = vmul.f32 30.0, %v829_v29  ;;  %vm838_vm11 = vmor %vm836_vm10, %vm837_vm7 }
 0x108   :  { %v843_v38 = vor.u32 1.1754944e-38, %v842_v17  ;;  %2772 = vrcp.f32 %v3997_v12  ;;  %v839_v2 = vsel %vm838_vm11, %v2767_v34, %v835_v21  ;;  %vm841_vm13 = vcmp.eq.f32.partialorder %v840_v11, 8.507059e+37 }
 0x109   :  { %v498_v47 = vmul.f32 %v3999_v32, %v497_v46  ;;  %v6079_v56 = vand.u32 2147483648, %v3290_v13  ;;  %vm397_vm14 = vcmp.eq.f32.partialorder %v3408_v1, 0.0  ;;  %v4020_v33 = vsel %vm491_vm15, %v3763_v28, %v3963_v54 }
 0x10a   :  { %v844_v30 = vsel %vm841_vm13, %v843_v38, %v839_v2  ;;  %v513_v34 = vmul.f32 %v3949_v26, %v512_v16  ;;  %v675_v19 = vand.u32 2147483647, %v3993_v24  ;;  %v1072_v13 = vmul.f32 %v2950_v15, %v830_v48 }
 0x10b   :  { %v315_v52 = vsel %vm313_vm2, %v6079_v56, %v6078_v53  ;;  %v845_v11 = vmul.f32 30.0, %v844_v30  ;;  %vm515_vm12 = vcmp.eq.f32.partialorder %v3905_v35, inf  ;;  %v6081_v8 = vand.u32 2147483648, %v3285_v5  ;;  %v1284_v30 = vld [vmem:[%s5991_s2 + $0xd8] sm:$0xff] }
 0x10c   :  { %v518_v4 = vand.u32 2147483648, %v3905_v35  ;;  %v499_v26 = vmul.f32 0.5, %v498_v47  ;;  %v4034_v43 = vmax.f32 %v315_v52, 1e-12  ;;  %v506_v6 = vand.u32 2147483648, %v3960_v14  ;;  %1726 = vperm.xlu1 %2684, %v1284_v30   ;;  %v1287_v30 = vld [vmem:[%s5991_s2 + $0xf0] sm:$0xff] }
 0x10d   :  { %v327_v54 = vsel %vm325_vm4, %v6081_v8, %v6080_v59  ;;  %v2771_v51 = vpop.eup %2770  ;;  %v1073_v17 = vmul.f32 %v2951_v36, %v845_v11  ;;  %vm671_vm0 = vweird.f32 %v3993_v24  ;;  %v514_v27 = vmul.f32 %v513_v34, %v3905_v35 }
 0x10e   :  { %v4036_v63 = vmax.f32 %v327_v54, 1e-12  ;;  %v667_v61 = vmul.f32 %v2771_v51, %v3993_v24  ;;  %v2773_v5 = vpop.eup %2772  ;;  %vm4045_vm15 = vcmp.eq.f32.partialorder %v675_v19, 8.507059e+37  ;;  %v677_v20 = vand.u32 2147483648, %v3993_v24 }
 0x10f   :  { %2774 = vrcp.f32 %v4034_v43  ;;  %vm457_vm1 = vcmp.eq.f32.partialorder %v3586_v22, 0.0  ;;  %v1096_v16 = vpack.c.bf16 %v1073_v17, %v1072_v13  ;;  %v682_v21 = vmul.f32 %v2773_v5, %v3997_v12  ;;  %v2953_v22 = vld [vmem:[%s5989_s0 + $0x38] sm:$0xff] }
 0x110   :  { %v668_v29 = vsub.f32 1.0, %v667_v61  ;;  %v690_v46 = vand.u32 2147483647, %v3997_v12  ;;  %v500_v48 = vsub.f32 1.5, %v499_v26  ;;  %v692_v38 = vand.u32 2147483648, %v3997_v12 }
 0x111   :  { %2776 = vrcp.f32 %v4036_v63  ;;  %v6084_v2 = vand.u32 2147483648, %v3419_v55  ;;  %1216 = vmatmul.bf16.vlgmr.msra.gmra.mxu2 %v1096_v16  ;;  %vm672_vm2 = vweird.f32 %v2771_v51  ;;  %v683_v56 = vsub.f32 1.0, %v682_v21 }
 0x112   :  { %v669_v53 = vmul.f32 %v2771_v51, %v668_v29  ;;  %v765_v52 = vand.u32 2147483647, %v4034_v43  ;;  %v4068_v34 = vsel %vm515_vm12, %v3905_v35, %v514_v27  ;;  %v678_v19 = vor.u32 1.1754944e-38, %v677_v20  ;;  %vm673_vm6 = vmor %vm671_vm0, %vm672_vm2 }
 0x113   :  { %v387_v47 = vsel %vm385_vm9, %v6084_v2, %v3709_v41  ;;  %vm686_vm3 = vweird.f32 %v3997_v12  ;;  %vm687_vm4 = vweird.f32 %v2773_v5  ;;  %vm469_vm5 = vcmp.eq.f32.partialorder %v3569_v62, 0.0 }
 0x114   :  { %v670_v55 = vadd.f32 %v2771_v51, %v669_v53  ;;  %v684_v41 = vmul.f32 %v2773_v5, %v683_v56  ;;  %v6085_v11 = vand.u32 2147483648, %v3408_v1  ;;  %v4077_v13 = vmax.f32 %v387_v47, 1e-12  ;;  %vm688_vm10 = vmor %vm686_vm3, %vm687_vm4  ;;  %v4114_v47 = vpop.xlane.xlu1 %158  ;;  %1735 = vperm.xlu1 %2684, %v1287_v30  }
 0x115   :  { %v2775_v59 = vpop.eup %2774  ;;  %v501_v8 = vmul.f32 %v3999_v32, %v500_v48  ;;  %vm4083_vm7 = vcmp.eq.f32.partialorder %v690_v46, 8.507059e+37  ;;  %v693_v26 = vor.u32 1.1754944e-38, %v692_v38  ;;  %vm761_vm8 = vweird.f32 %v4034_v43 }
 0x116   :  { %v399_v15 = vsel %vm397_vm14, %v6085_v11, %v3689_v58  ;;  %v674_v36 = vsel %vm673_vm6, %v2771_v51, %v670_v55  ;;  %v685_v17 = vadd.f32 %v2773_v5, %v684_v41  ;;  %v757_v1 = vmul.f32 %v2775_v59, %v4034_v43  ;;  %v4180_v55 = vpop.xlane.xlu0 %156 }
 0x117   :  { %vm4089_vm9 = vcmp.eq.f32.partialorder %v765_v52, 8.507059e+37  ;;  %v2777_v32 = vpop.eup %2776  ;;  %v679_v24 = vsel %vm4045_vm15, %v678_v19, %v674_v36  ;;  %v767_v61 = vand.u32 2147483648, %v4034_v43  ;;  %v4099_v27 = vmax.f32 %v399_v15, 1e-12 }
 0x118   :  { %2778 = vrcp.f32 %v4077_v13  ;;  %v680_v51 = vmul.f32 30.0, %v679_v24  ;;  %v689_v20 = vsel %vm688_vm10, %v2773_v5, %v685_v17  ;;  %v758_v16 = vsub.f32 1.0, %v757_v1  ;;  %v2952_v5 = vld [vmem:[%s5989_s0 + $0x30] sm:$0xff] }
 0x119   :  { %v772_v29 = vmul.f32 %v2777_v32, %v4036_v63  ;;  %v694_v21 = vsel %vm4083_vm7, %v693_v26, %v689_v20  ;;  %vm762_vm11 = vweird.f32 %v2775_v59  ;;  %v780_v45 = vand.u32 2147483647, %v4036_v63 }
 0x11a   :  { %v459_v12 = vsel %vm457_vm1, %v458_v39, %v3835_v44  ;;  %v695_v46 = vmul.f32 30.0, %v694_v21  ;;  %v1062_v48 = vmul.f32 %v2952_v5, %v680_v51  ;;  %v759_v38 = vmul.f32 %v2775_v59, %v758_v16  ;;  %vm763_vm12 = vmor %vm761_vm8, %vm762_vm11 }
 0x11b   :  { %v773_v2 = vsub.f32 1.0, %v772_v29  ;;  %v768_v53 = vor.u32 1.1754944e-38, %v767_v61  ;;  %vm776_vm13 = vweird.f32 %v4036_v63  ;;  %v782_v56 = vand.u32 2147483648, %v4036_v63  ;;  %v6092_v61 = vld [vmem:[#allocation5_spill] sm:$0xff] }
 0x11c   :  { %2780 = vrcp.f32 %v4099_v27  ;;  %v1063_v39 = vmul.f32 %v2953_v22, %v695_v46  ;;  %v760_v44 = vadd.f32 %v2775_v59, %v759_v38  ;;  %vm777_vm14 = vweird.f32 %v2777_v32  ;;  %v2955_v46 = vld [vmem:[%s5989_s0 + $0x68] sm:$0xff] }
 0x11d   :  { %v774_v52 = vmul.f32 %v2777_v32, %v773_v2  ;;  %vm4128_vm0 = vcmp.eq.f32.partialorder %v780_v45, 8.507059e+37  ;;  %v471_v41 = vsel %vm469_vm5, %v470_v25, %v3781_v50  ;;  %v4137_v11 = vmax.f32 %v459_v12, 1e-12  ;;  %vm778_vm15 = vmor %vm776_vm13, %vm777_vm14 }
 0x11e   :  { %v2779_v19 = vpop.eup %2778  ;;  %2782 = vrsqrt.f32 %v4114_v47  ;;  %v1091_v15 = vpack.c.bf16 %v1063_v39, %v1062_v48  ;;  %v764_v54 = vsel %vm763_vm12, %v2775_v59, %v760_v44  ;;  %v783_v17 = vor.u32 1.1754944e-38, %v782_v56 }
 0x11f   :  { %v775_v26 = vadd.f32 %v2777_v32, %v774_v52  ;;  %v847_v43 = vmul.f32 %v2779_v19, %v4077_v13  ;;  %v769_v36 = vsel %vm4089_vm9, %v768_v53, %v764_v54  ;;  %v855_v62 = vand.u32 2147483647, %v4077_v13 }
 0x120   :  { %v4146_v25 = vmax.f32 %v471_v41, 1e-12  ;;  %1191 = vmatmul.bf16.gmra.mxu0 %v1091_v15  ;;  %v770_v50 = vmul.f32 30.0, %v769_v36  ;;  %2784 = vrcp.f32 %v4137_v11  ;;  %vm337_vm1 = vcmp.eq.f32.partialorder %v6092_v61, 0.0 }
 0x121   :  { %v779_v1 = vsel %vm778_vm15, %v2777_v32, %v775_v26  ;;  %v848_v24 = vsub.f32 1.0, %v847_v43  ;;  %v4151_v58 = vmul.f32 %v501_v8, %v3960_v14  ;;  %vm852_vm2 = vweird.f32 %v2779_v19  ;;  %v2954_v32 = vld [vmem:[%s5989_s0 + $0x60] sm:$0xff]  ;;  %v6099_v8 = vld [vmem:[#allocation6_spill] sm:$0xff] }
 0x122   :  { %v2781_v59 = vpop.eup %2780  ;;  %v784_v63 = vsel %vm4128_vm0, %v783_v17, %v779_v1  ;;  %v857_v51 = vand.u32 2147483648, %v4077_v13  ;;  %v1068_v16 = vmul.f32 %v2954_v32, %v770_v50  ;;  %vm851_vm3 = vweird.f32 %v4077_v13 }
 0x123   :  { %v785_v20 = vmul.f32 30.0, %v784_v63  ;;  %v849_v29 = vmul.f32 %v2779_v19, %v848_v24  ;;  %v862_v21 = vmul.f32 %v2781_v59, %v4099_v27  ;;  %vm4163_vm4 = vcmp.eq.f32.partialorder %v855_v62, 8.507059e+37  ;;  %vm853_vm6 = vmor %vm851_vm3, %vm852_vm2 }
 0x124   :  { %v4160_v45 = vpop.eup %2782  ;;  %v870_v12 = vand.u32 2147483647, %v4099_v27  ;;  %2786 = vrcp.f32 %v4146_v25  ;;  %vm349_vm5 = vcmp.eq.f32.partialorder %v3361_v18, 0.0  ;;  %v872_v2 = vand.u32 2147483648, %v4099_v27 }
 0x125   :  { %v1069_v5 = vmul.f32 %v2955_v46, %v785_v20  ;;  %v850_v48 = vadd.f32 %v2779_v19, %v849_v29  ;;  %v863_v38 = vsub.f32 1.0, %v862_v21  ;;  %v858_v13 = vor.u32 1.1754944e-38, %v857_v51  ;;  %v2956_v29 = vld [vmem:[%s5989_s0 + $0x90] sm:$0xff] }
 0x126   :  { %v945_v53 = vand.u32 2147483647, %v4137_v11  ;;  %v947_v56 = vand.u32 2147483648, %v4137_v11  ;;  %v533_v22 = vmul.f32 %v4160_v45, %v4114_v47  ;;  %v2785_v39 = vpop.eup %2784  ;;  %vm503_vm7 = vcmp.eq.f32.partialorder %v3960_v14, inf }
 0x127   :  { %v1094_v44 = vpack.c.bf16 %v1069_v5, %v1068_v16  ;;  %v854_v52 = vsel %vm853_vm6, %v2779_v19, %v850_v48  ;;  %v864_v30 = vmul.f32 %v2781_v59, %v863_v38  ;;  %vm867_vm8 = vweird.f32 %v2781_v59 }
 0x128   :  { %vm409_vm9 = vcmp.eq.f32.partialorder %v3397_v9, 0.0  ;;  %v859_v41 = vsel %vm4163_vm4, %v858_v13, %v854_v52  ;;  %vm866_vm10 = vweird.f32 %v4099_v27  ;;  %vm4186_vm11 = vcmp.eq.f32.partialorder %v870_v12, 8.507059e+37 }
 0x129   :  { %v937_v54 = vmul.f32 %v2785_v39, %v4137_v11  ;;  %1206 = vmatmul.bf16.gmra.mxu1 %v1094_v44  ;;  %v860_v26 = vmul.f32 30.0, %v859_v41  ;;  %v865_v19 = vadd.f32 %v2781_v59, %v864_v30  ;;  %v873_v43 = vor.u32 1.1754944e-38, %v872_v2  ;;  %vm868_vm13 = vmor %vm866_vm10, %vm867_vm8 }
 0x12a   :  { %v534_v36 = vmul.f32 %v4160_v45, %v533_v22  ;;  %v2787_v17 = vpop.eup %2786  ;;  %vm941_vm14 = vweird.f32 %v4137_v11  ;;  %vm4193_vm12 = vcmp.eq.f32.partialorder %v945_v53, 8.507059e+37  ;;  %2788 = vrsqrt.f32 %v4180_v55  ;;  %v2957_v53 = vld [vmem:[%s5989_s0 + $0x98] sm:$0xff] }
 0x12b   :  { %v938_v62 = vsub.f32 1.0, %v937_v54  ;;  %v869_v27 = vsel %vm868_vm13, %v2781_v59, %v865_v19  ;;  %v948_v1 = vor.u32 1.1754944e-38, %v947_v56  ;;  %v952_v24 = vmul.f32 %v2787_v17, %v4146_v25 }
 0x12c   :  { %v960_v63 = vand.u32 2147483647, %v4146_v25  ;;  %v874_v51 = vsel %vm4186_vm11, %v873_v43, %v869_v27  ;;  %vm942_vm0 = vweird.f32 %v2785_v39  ;;  %v535_v32 = vmul.f32 0.5, %v534_v36 }
 0x12d   :  { %v939_v20 = vmul.f32 %v2785_v39, %v938_v62  ;;  %vm421_vm15 = vcmp.eq.f32.partialorder %v3511_v31, 0.0  ;;  %v875_v16 = vmul.f32 30.0, %v874_v51  ;;  %v1074_v21 = vmul.f32 %v2956_v29, %v860_v26 }
 0x12e   :  { %v953_v59 = vsub.f32 1.0, %v952_v24  ;;  %v6100_v12 = vand.u32 2147483648, %v6092_v61  ;;  %v962_v48 = vand.u32 2147483648, %v4146_v25  ;;  %v6101_v38 = vand.u32 2147483648, %v3361_v18 }
 0x12f   :  { %v940_v5 = vadd.f32 %v2785_v39, %v939_v20  ;;  %vm481_vm2 = vcmp.eq.f32.partialorder %v3611_v23, 0.0  ;;  %v1075_v56 = vmul.f32 %v2957_v53, %v875_v16  ;;  %vm957_vm3 = vweird.f32 %v2787_v17  ;;  %v2959_v20 = vld [vmem:[%s5989_s0 + $0xc8] sm:$0xff] }
 0x130   :  { %v339_v46 = vsel %vm337_vm1, %v6100_v12, %v6099_v8  ;;  %v351_v2 = vsel %vm349_vm5, %v6101_v38, %v3671_v40  ;;  %vm943_vm1 = vmor %vm941_vm14, %vm942_vm0  ;;  %v954_v61 = vmul.f32 %v2787_v17, %v953_v59  ;;  %v2789_v44 = vpop.eup %2788  ;;  %vm956_vm4 = vweird.f32 %v4146_v25 }
 0x131   :  { %v4217_v13 = vmax.f32 %v339_v46, 1e-12  ;;  %v4226_v22 = vmax.f32 %v351_v2, 1e-12  ;;  %v944_v18 = vsel %vm943_vm1, %v2785_v39, %v940_v5  ;;  %v536_v40 = vsub.f32 1.5, %v535_v32  ;;  %vm958_vm6 = vmor %vm956_vm4, %vm957_vm3 }
 0x132   :  { %v1097_v52 = vpack.c.bf16 %v1075_v56, %v1074_v21  ;;  %v949_v30 = vsel %vm4193_vm12, %v948_v1, %v944_v18  ;;  %v955_v41 = vadd.f32 %v2787_v17, %v954_v61  ;;  %v521_v15 = vmul.f32 %v2789_v44, %v4180_v55 }
 0x133   :  { %2790 = vrcp.f32 %v4217_v13  ;;  %vm493_vm5 = vcmp.eq.f32.partialorder %v3763_v28, 0.0  ;;  %v4238_v11 = vsel %vm503_vm7, %v3960_v14, %v4151_v58  ;;  %v950_v39 = vmul.f32 30.0, %v949_v30 }
 0x134   :  { %vm961_vm8 = vcmp.eq.f32.partialorder %v960_v63, 8.507059e+37  ;;  %v963_v25 = vor.u32 1.1754944e-38, %v962_v48  ;;  %1221 = vmatmul.bf16.gmra.mxu2 %v1097_v52  ;;  %v959_v54 = vsel %vm958_vm6, %v2787_v17, %v955_v41  ;;  %v522_v26 = vmul.f32 %v2789_v44, %v521_v15  ;;  %v2958_v17 = vld [vmem:[%s5989_s0 + $0xc0] sm:$0xff] }
 0x135   :  { %2792 = vrcp.f32 %v4226_v22  ;;  %v6102_v19 = vand.u32 2147483648, %v3397_v9  ;;  %v537_v62 = vmul.f32 %v4160_v45, %v536_v40  ;;  %v542_v58 = vand.u32 2147483648, %v4114_v47 }
 0x136   :  { %v964_v36 = vsel %vm961_vm8, %v963_v25, %v959_v54  ;;  %v530_v50 = vand.u32 2147483648, %v4180_v55  ;;  %v1080_v1 = vmul.f32 %v2958_v17, %v950_v39  ;;  %v523_v24 = vmul.f32 0.5, %v522_v26 }
 0x137   :  { %v411_v43 = vsel %vm409_vm9, %v6102_v19, %v3679_v49  ;;  %v965_v27 = vmul.f32 30.0, %v964_v36  ;;  %v795_v63 = vand.u32 2147483647, %v4217_v13  ;;  %vm791_vm7 = vweird.f32 %v4217_v13  ;;  %v2963_v36 = vld [vmem:[%s5989_s0 + $0xa8] sm:$0xff] }
 0x138   :  { %v797_v9 = vand.u32 2147483648, %v4217_v13  ;;  %v423_v49 = vsel %vm421_vm15, %v422_v60, %v3776_v42  ;;  %v4260_v45 = vmax.f32 %v411_v43, 1e-12  ;;  %v524_v16 = vsub.f32 1.5, %v523_v24 }
 0x139   :  { %v2791_v51 = vpop.eup %2790  ;;  %v1081_v32 = vmul.f32 %v2959_v20, %v965_v27  ;;  %v810_v21 = vand.u32 2147483647, %v4226_v22  ;;  %v4268_v59 = vmul.f32 %v537_v62, %v4114_v47  ;;  %v812_v8 = vand.u32 2147483648, %v4226_v22 }
 0x13a   :  { %v787_v29 = vmul.f32 %v2791_v51, %v4217_v13  ;;  %v4271_v12 = vmax.f32 %v423_v49, 1e-12  ;;  %2794 = vrcp.f32 %v4260_v45  ;;  %vm4274_vm9 = vcmp.eq.f32.partialorder %v795_v63, 8.507059e+37 }
 0x13b   :  { %v2793_v31 = vpop.eup %2792  ;;  %v1100_v60 = vpack.c.bf16 %v1081_v32, %v1080_v1  ;;  %vm806_vm10 = vweird.f32 %v4226_v22  ;;  %v525_v5 = vmul.f32 %v2789_v44, %v524_v16  ;;  %v798_v48 = vor.u32 1.1754944e-38, %v797_v9 }
 0x13c   :  { %v788_v42 = vsub.f32 1.0, %v787_v29  ;;  %v802_v38 = vmul.f32 %v2793_v31, %v4226_v22  ;;  %v6105_v2 = vand.u32 2147483648, %v3611_v23  ;;  %vm792_vm11 = vweird.f32 %v2791_v51 }
 0x13d   :  { %1236 = vmatmul.bf16.vlgmr.msra.gmra.mxu3 %v1100_v60  ;;  %vm4285_vm13 = vcmp.eq.f32.partialorder %v810_v21, 8.507059e+37  ;;  %2796 = vrcp.f32 %v4271_v12  ;;  %vm445_vm14 = vcmp.eq.f32.partialorder %v3509_v3, 0.0  ;;  %vm433_vm12 = vcmp.eq.f32.partialorder %v3488_v0, 0.0 }
 0x13e   :  { %v483_v53 = vsel %vm481_vm2, %v6105_v2, %v3955_v57  ;;  %v789_v56 = vmul.f32 %v2791_v51, %v788_v42  ;;  %v803_v44 = vsub.f32 1.0, %v802_v38  ;;  %vm807_vm0 = vweird.f32 %v2793_v31  ;;  %vm793_vm2 = vmor %vm791_vm7, %vm792_vm11  ;;  %v2961_v42 = vld [vmem:[%s5989_s0 + $0x78] sm:$0xff] }
 0x13f   :  { %v813_v18 = vor.u32 1.1754944e-38, %v812_v8  ;;  %vm881_vm15 = vweird.f32 %v4260_v45  ;;  %v885_v57 = vand.u32 2147483647, %v4260_v45  ;;  %v887_v40 = vand.u32 2147483648, %v4260_v45  ;;  %vm808_vm3 = vmor %vm806_vm10, %vm807_vm0 }
 0x140   :  { %v790_v23 = vadd.f32 %v2791_v51, %v789_v56  ;;  %v495_v52 = vsel %vm493_vm5, %v494_v10, %v4020_v33  ;;  %v2795_v30 = vpop.eup %2794  ;;  %v4301_v41 = vmul.f32 %v525_v5, %v4180_v55  ;;  %v804_v15 = vmul.f32 %v2793_v31, %v803_v44 }
 0x141   :  { %v4306_v39 = vmax.f32 %v483_v53, 1e-12  ;;  %v4308_v25 = vmax.f32 %v495_v52, 1e-12  ;;  %v877_v26 = vmul.f32 %v2795_v30, %v4260_v45  ;;  %v900_v19 = vand.u32 2147483647, %v4271_v12 }
 0x142   :  { %v794_v54 = vsel %vm793_vm2, %v2791_v51, %v790_v23  ;;  %v902_v28 = vand.u32 2147483648, %v4271_v12  ;;  %v805_v33 = vadd.f32 %v2793_v31, %v804_v15  ;;  %vm896_vm1 = vweird.f32 %v4271_v12 }
 0x143   :  { %v799_v10 = vsel %vm4274_vm9, %v798_v48, %v794_v54  ;;  %2798 = vrcp.f32 %v4306_v39  ;;  %v2797_v13 = vpop.eup %2796  ;;  %v878_v43 = vsub.f32 1.0, %v877_v26  ;;  %vm882_vm4 = vweird.f32 %v2795_v30  ;;  %v2962_v26 = vld [vmem:[%s5989_s0 + $0xa0] sm:$0xff] }
 0x144   :  { %vm4320_vm5 = vcmp.eq.f32.partialorder %v885_v57, 8.507059e+37  ;;  %v888_v62 = vor.u32 1.1754944e-38, %v887_v40  ;;  %vm539_vm6 = vcmp.eq.f32.partialorder %v4114_v47, inf  ;;  %v800_v27 = vmul.f32 30.0, %v799_v10  ;;  %vm4338_vm10 = vmor %vm881_vm15, %vm882_vm4 }
 0x145   :  { %v809_v17 = vsel %vm808_vm3, %v2793_v31, %v805_v33  ;;  %v892_v1 = vmul.f32 %v2797_v13, %v4271_v12  ;;  %2800 = vrcp.f32 %v4308_v25  ;;  %vm527_vm8 = vcmp.eq.f32.partialorder %v4180_v55, inf  ;;  %v2960_v31 = vld [vmem:[%s5989_s0 + $0x70] sm:$0xff] }
 0x146   :  { %v814_v22 = vsel %vm4285_vm13, %v813_v18, %v809_v17  ;;  %v879_v24 = vmul.f32 %v2795_v30, %v878_v43  ;;  %vm4330_vm7 = vcmp.eq.f32.partialorder %v900_v19, 8.507059e+37  ;;  %v903_v51 = vor.u32 1.1754944e-38, %v902_v28 }
 0x147   :  { %vm505_vm9 = vcmp.eq.f32.partialorder %v3960_v14, 0.0  ;;  %v815_v9 = vmul.f32 30.0, %v814_v22  ;;  %v893_v20 = vsub.f32 1.0, %v892_v1  ;;  %vm971_vm11 = vweird.f32 %v4306_v39 }
 0x148   :  { %v975_v32 = vand.u32 2147483647, %v4306_v39  ;;  %vm517_vm13 = vcmp.eq.f32.partialorder %v3905_v35, 0.0  ;;  %v880_v16 = vadd.f32 %v2795_v30, %v879_v24  ;;  %vm897_vm0 = vweird.f32 %v2797_v13 }
 0x149   :  { %v977_v29 = vand.u32 2147483648, %v4306_v39  ;;  %v6114_v21 = vand.u32 2147483648, %v3488_v0  ;;  %v2799_v8 = vpop.eup %2798  ;;  %v1070_v60 = vmul.f32 %v2960_v31, %v800_v27  ;;  %v1071_v46 = vmul.f32 %v2961_v42, %v815_v9  ;;  %vm898_vm2 = vmor %vm896_vm1, %vm897_vm0  ;;  %v4450_v42 = vpop.permute.xlu2 %1651 }
 0x14a   :  { %v894_v5 = vmul.f32 %v2797_v13, %v893_v20  ;;  %v884_v38 = vsel %vm4338_vm10, %v2795_v30, %v880_v16  ;;  %v967_v0 = vmul.f32 %v2799_v8, %v4306_v39  ;;  %v990_v18 = vand.u32 2147483647, %v4308_v25 }
 0x14b   :  { %v435_v45 = vsel %vm433_vm12, %v6114_v21, %v3746_v7  ;;  %vm986_vm12 = vweird.f32 %v4308_v25  ;;  %v6115_v7 = vand.u32 2147483648, %v3509_v3  ;;  %v2801_v53 = vpop.eup %2800  ;;  %v1095_v56 = vpack.c.bf16 %v1071_v46, %v1070_v60  ;;  %v2965_v46 = vld [vmem:[%s5989_s0 + $0xd8] sm:$0xff] }
 0x14c   :  { %v4357_v48 = vmax.f32 %v435_v45, 1e-12  ;;  %v889_v61 = vsel %vm4320_vm5, %v888_v62, %v884_v38  ;;  %v895_v44 = vadd.f32 %v2797_v13, %v894_v5  ;;  %vm529_vm15 = vcmp.eq.f32.partialorder %v4180_v55, 0.0 }
 0x14d   :  { %v447_v2 = vsel %vm445_vm14, %v6115_v7, %v3734_v37  ;;  %v890_v23 = vmul.f32 30.0, %v889_v61  ;;  %v968_v57 = vsub.f32 1.0, %v967_v0  ;;  %vm972_vm3 = vweird.f32 %v2799_v8  ;;  %1211 = vmatmul.bf16.gmra.mxu1 %v1095_v56 }
 0x14e   :  { %v982_v3 = vmul.f32 %v2801_v53, %v4308_v25  ;;  %v899_v37 = vsel %vm898_vm2, %v2797_v13, %v895_v44  ;;  %v992_v40 = vand.u32 2147483648, %v4308_v25  ;;  %v4377_v52 = vmax.f32 %v447_v2, 1e-12  ;;  %vm4387_vm1 = vmor %vm971_vm11, %vm972_vm3 }
 0x14f   :  { %2802 = vrcp.f32 %v4357_v48  ;;  %v904_v30 = vsel %vm4330_vm7, %v903_v51, %v899_v37  ;;  %v969_v15 = vmul.f32 %v2799_v8, %v968_v57  ;;  %vm987_vm14 = vweird.f32 %v2801_v53 }
 0x150   :  { %v983_v54 = vsub.f32 1.0, %v982_v3  ;;  %v905_v12 = vmul.f32 30.0, %v904_v30  ;;  %v1076_v19 = vmul.f32 %v2962_v26, %v890_v23  ;;  %v978_v10 = vor.u32 1.1754944e-38, %v977_v29  ;;  %vm4407_vm7 = vmor %vm986_vm12, %vm987_vm14 }
 0x151   :  { %2804 = vrcp.f32 %v4377_v52  ;;  %v540_v33 = vsel %vm539_vm6, %v4114_v47, %v4268_v59  ;;  %vm541_vm4 = vcmp.eq.f32.partialorder %v4114_v47, 0.0  ;;  %v970_v13 = vadd.f32 %v2799_v8, %v969_v15  ;;  %v2967_v59 = vld [vmem:[%s5989_s0 + $0xb8] sm:$0xff] }
 0x152   :  { %vm976_vm5 = vcmp.eq.f32.partialorder %v975_v32, 8.507059e+37  ;;  %v984_v43 = vmul.f32 %v2801_v53, %v983_v54  ;;  %v528_v39 = vsel %vm527_vm8, %v4180_v55, %v4301_v41  ;;  %v1077_v62 = vmul.f32 %v2963_v36, %v905_v12 }
 0x153   :  { %vm4411_vm6 = vcmp.eq.f32.partialorder %v990_v18, 8.507059e+37  ;;  %v993_v17 = vor.u32 1.1754944e-38, %v992_v40  ;;  %v974_v41 = vsel %vm4387_vm1, %v2799_v8, %v970_v13  ;;  %v915_v22 = vand.u32 2147483647, %v4357_v48 }
 0x154   :  { %v985_v1 = vadd.f32 %v2801_v53, %v984_v43  ;;  %v507_v25 = vsel %vm505_vm9, %v506_v6, %v4238_v11  ;;  %v1098_v63 = vpack.c.bf16 %v1077_v62, %v1076_v19  ;;  %v979_v51 = vsel %vm976_vm5, %v978_v10, %v974_v41  ;;  %v2966_v10 = vld [vmem:[%s5989_s0 + $0xb0] sm:$0xff]  ;;  %v4503_v62 = vpop.permute.xlu2 %1654 }
 0x155   :  { %v2803_v24 = vpop.eup %2802  ;;  %v917_v9 = vand.u32 2147483648, %v4357_v48  ;;  %v519_v49 = vsel %vm517_vm13, %v518_v4, %v4068_v34  ;;  %v980_v20 = vmul.f32 30.0, %v979_v51  ;;  %vm926_vm8 = vweird.f32 %v4377_v52  ;;  %v2964_v4 = vld [vmem:[%s5989_s0 + $0xd0] sm:$0xff] }
 0x156   :  { %v989_v32 = vsel %vm4407_vm7, %v2801_v53, %v985_v1  ;;  %v907_v16 = vmul.f32 %v2803_v24, %v4357_v48  ;;  %1226 = vmatmul.bf16.gmra.mxu2 %v1098_v63  ;;  %v930_v11 = vand.u32 2147483647, %v4377_v52  ;;  %v4436_v29 = vmax.f32 %v507_v25, 1e-12 }
 0x157   :  { %v2805_v14 = vpop.eup %2804  ;;  %v994_v6 = vsel %vm4411_vm6, %v993_v17, %v989_v32  ;;  %v4438_v21 = vmax.f32 %v519_v49, 1e-12  ;;  %v1082_v34 = vmul.f32 %v2964_v4, %v980_v20  ;;  %vm912_vm9 = vweird.f32 %v2803_v24 }
 0x158   :  { %v995_v35 = vmul.f32 30.0, %v994_v6  ;;  %v908_v45 = vsub.f32 1.0, %v907_v16  ;;  %v922_v8 = vmul.f32 %v2805_v14, %v4377_v52  ;;  %v932_v31 = vand.u32 2147483648, %v4377_v52 }
 0x159   :  { %2806 = vrcp.f32 %v4436_v29  ;;  %v531_v60 = vsel %vm529_vm15, %v530_v50, %v528_v39  ;;  %vm927_vm10 = vweird.f32 %v2805_v14  ;;  %vm911_vm11 = vweird.f32 %v4357_v48 }
 0x15a   :  { %v1083_v5 = vmul.f32 %v2965_v46, %v995_v35  ;;  %v909_v38 = vmul.f32 %v2803_v24, %v908_v45  ;;  %v923_v0 = vsub.f32 1.0, %v922_v8  ;;  %vm4456_vm13 = vcmp.eq.f32.partialorder %v915_v22, 8.507059e+37  ;;  %vm913_vm0 = vmor %vm911_vm11, %vm912_vm9 }
 0x15b   :  { %2808 = vrcp.f32 %v4438_v21  ;;  %v918_v2 = vor.u32 1.1754944e-38, %v917_v9  ;;  %vm4464_vm12 = vmor %vm926_vm8, %vm927_vm10  ;;  %vm4468_vm15 = vcmp.eq.f32.partialorder %v930_v11, 8.507059e+37  ;;  %v933_v61 = vor.u32 1.1754944e-38, %v932_v31 }
 0x15c   :  { %v1101_v55 = vpack.c.bf16 %v1083_v5, %v1082_v34  ;;  %v910_v50 = vadd.f32 %v2803_v24, %v909_v38  ;;  %v924_v53 = vmul.f32 %v2805_v14, %v923_v0  ;;  %v543_v44 = vsel %vm541_vm4, %v542_v58, %v540_v33  ;;  %v1177_v34 = vpop.f32.mrf.mxu0 }
 0x15d   :  { %v4476_v18 = vmax.f32 %v531_v60, 1e-12  ;;  %vm1001_vm2 = vweird.f32 %v4436_v29  ;;  %v4479_v3 = vmax.f32 %v543_v44, 1e-12  ;;  %v1005_v52 = vand.u32 2147483647, %v4436_v29  ;;  %v4566_v44 = vpop.permute.xlu2 %1660 }
 0x15e   :  { %1241 = vmatmul.bf16.gmra.mxu3 %v1101_v55  ;;  %v914_v23 = vsel %vm913_vm0, %v2803_v24, %v910_v50  ;;  %v925_v57 = vadd.f32 %v2805_v14, %v924_v53  ;;  %v1007_v30 = vand.u32 2147483648, %v4436_v29  ;;  %v1020_v54 = vand.u32 2147483647, %v4438_v21  ;;  %v2968_v50 = vld [vmem:[%s5989_s0 + $0xe0] sm:$0xff] }
 0x15f   :  { %v2807_v37 = vpop.eup %2806  ;;  %v919_v40 = vsel %vm4456_vm13, %v918_v2, %v914_v23  ;;  %2810 = vrcp.f32 %v4476_v18  ;;  %v1022_v19 = vand.u32 2147483648, %v4438_v21  ;;  %vm4498_vm14 = vcmp.eq.f32.partialorder %v1005_v52, 8.507059e+37 }
 0x160   :  { %v920_v47 = vmul.f32 30.0, %v919_v40  ;;  %v929_v58 = vsel %vm4464_vm12, %v2805_v14, %v925_v57  ;;  %v997_v15 = vmul.f32 %v2807_v37, %v4436_v29  ;;  %vm1002_vm3 = vweird.f32 %v2807_v37 }
 0x161   :  { %v2809_v12 = vpop.eup %2808  ;;  %v934_v26 = vsel %vm4468_vm15, %v933_v61, %v929_v58  ;;  %2812 = vrcp.f32 %v4479_v3  ;;  %v1008_v36 = vor.u32 1.1754944e-38, %v1007_v30  ;;  %vm1016_vm1 = vweird.f32 %v4438_v21  ;;  %vm4511_vm5 = vmor %vm1001_vm2, %vm1002_vm3 }
 0x162   :  { %v935_v28 = vmul.f32 30.0, %v934_v26  ;;  %v1078_v33 = vmul.f32 %v2966_v10, %v920_v47  ;;  %v998_v13 = vsub.f32 1.0, %v997_v15  ;;  %v1012_v43 = vmul.f32 %v2809_v12, %v4438_v21 }
 0x163   :  { %vm1017_vm4 = vweird.f32 %v2809_v12  ;;  %vm4515_vm7 = vcmp.eq.f32.partialorder %v1020_v54, 8.507059e+37  ;;  %v1023_v24 = vor.u32 1.1754944e-38, %v1022_v19  ;;  %vm1031_vm6 = vweird.f32 %v4476_v18 }
 0x164   :  { %v1079_v27 = vmul.f32 %v2967_v59, %v935_v28  ;;  %v999_v17 = vmul.f32 %v2807_v37, %v998_v13  ;;  %v1013_v41 = vsub.f32 1.0, %v1012_v43  ;;  %v1289_v63 = vlaneseq  ;;  %vm4523_vm8 = vmor %vm1016_vm1, %vm1017_vm4  ;;  %v2971_v43 = vld [vmem:[%s5989_s0 + $0xf8] sm:$0xff] }
 0x165   :  { %v2811_v1 = vpop.eup %2810  ;;  %v1035_v14 = vand.u32 2147483647, %v4476_v18  ;;  %v1037_v6 = vand.u32 2147483648, %v4476_v18  ;;  %vm1046_vm9 = vweird.f32 %v4479_v3  ;;  %v1050_v38 = vand.u32 2147483647, %v4479_v3  ;;  %v1670_v19 = vpop.permute.xlu2 %1669 }
 0x166   :  { %v1099_v51 = vpack.c.bf16 %v1079_v27, %v1078_v33  ;;  %v1000_v9 = vadd.f32 %v2807_v37, %v999_v17  ;;  %v1014_v49 = vmul.f32 %v2809_v12, %v1013_v41  ;;  %v1027_v20 = vmul.f32 %v2811_v1, %v4476_v18  ;;  %v2969_v18 = vld [vmem:[%s5989_s0 + $0xe8] sm:$0xff]  ;;  %v2970_v33 = vld [vmem:[%s5989_s0 + $0xf0] sm:$0xff]  ;;  %v1649_v41 = vpop.permute.xlu1 %1648 }
 0x167   :  { %v2813_v32 = vpop.eup %2812  ;;  %v4530_v11 = vand.u32 127, %v1289_v63  ;;  %vm1032_vm10 = vweird.f32 %v2811_v1  ;;  %v1052_v0 = vand.u32 2147483648, %v4479_v3  ;;  %vm1036_vm15 = vcmp.eq.f32.partialorder %v1035_v14, 8.507059e+37 }
 0x168   :  { %1231 = vmatmul.bf16.gmra.mxu2 %v1099_v51  ;;  %v1004_v29 = vsel %vm4511_vm5, %v2807_v37, %v1000_v9  ;;  %v1015_v35 = vadd.f32 %v2809_v12, %v1014_v49  ;;  %v1028_v4 = vsub.f32 1.0, %v1027_v20  ;;  %v1042_v21 = vmul.f32 %v2813_v32, %v4479_v3  ;;  %vm4554_vm0 = vmor %vm1031_vm6, %vm1032_vm10  ;;  %v1646_v37 = vpop.permute.xlu0 %1645  ;;  %v1179_v49 = vpop.f32.mrf.mxu0 }
 0x169   :  { %v1009_v45 = vsel %vm4498_vm14, %v1008_v36, %v1004_v29  ;;  %vm1047_vm11 = vweird.f32 %v2813_v32  ;;  %vm1291_vm13 = vcmp.lt.s32.totalorder %v4530_v11, 16  ;;  %v1038_v40 = vor.u32 1.1754944e-38, %v1037_v6 }
 0x16a   :  { %v1010_v8 = vmul.f32 30.0, %v1009_v45  ;;  %v1019_v31 = vsel %vm4523_vm8, %v2809_v12, %v1015_v35  ;;  %v1029_v60 = vmul.f32 %v2811_v1, %v1028_v4  ;;  %v1043_v46 = vsub.f32 1.0, %v1042_v21  ;;  %vm4562_vm12 = vmor %vm1046_vm9, %vm1047_vm11 }
 0x16b   :  { %v1024_v5 = vsel %vm4515_vm7, %v1023_v24, %v1019_v31  ;;  %v4546_v7 = vsel %vm1291_vm13, %v1177_v34, -1e+30  ;;  %vm1051_vm2 = vcmp.eq.f32.partialorder %v1050_v38, 8.507059e+37  ;;  %v1053_v52 = vor.u32 1.1754944e-38, %v1052_v0 }
 0x16c   :  { %v1025_v55 = vmul.f32 30.0, %v1024_v5  ;;  %v1084_v2 = vmul.f32 %v2968_v50, %v1010_v8  ;;  %v1030_v53 = vadd.f32 %v2811_v1, %v1029_v60  ;;  %v1044_v48 = vmul.f32 %v2813_v32, %v1043_v46  ;;  %1324 = vmax.xlane.f32.xlu2 %v4546_v7 }
 0x16d   :  { %vm1740_vm3 = vcmp.eq.s32.totalorder %v4530_v11, %v1646_v37  ;;  %vm1748_vm14 = vcmp.eq.s32.totalorder %v4530_v11, %v1670_v19  ;;  %v4607_v20 = vsel %vm1291_vm13, %v1179_v49, -1e+30  ;;  %vm1741_vm4 = vcmp.eq.s32.totalorder %v4530_v11, %v1649_v41  ;;  %v1679_v60 = vpop.permute.xlu2 %1678 }
 0x16e   :  { %v1085_v23 = vmul.f32 %v2969_v18, %v1025_v55  ;;  %v1045_v57 = vadd.f32 %v2813_v32, %v1044_v48  ;;  %v1034_v3 = vsel %vm4554_vm0, %v2811_v1, %v1030_v53  ;;  %v1772_v54 = vsel %vm1740_vm3, %v4546_v7, 0.0  ;;  %v1197_v28 = vpop.f32.mrf.mxu1  ;;  %v4594_v22 = vpop.permute.xlu1 %1657 }
 0x16f   :  { %v1039_v58 = vsel %vm1036_vm15, %v1038_v40, %v1034_v3  ;;  %v4579_v10 = vsel %vm1291_vm13, %v1197_v28, -1e+30  ;;  %vm1742_vm8 = vcmp.eq.s32.totalorder %v4530_v11, %v4450_v42  ;;  %vm1743_vm9 = vcmp.eq.s32.totalorder %v4530_v11, %v4503_v62 }
 0x170   :  { %v1102_v30 = vpack.c.bf16 %v1085_v23, %v1084_v2  ;;  %v1049_v47 = vsel %vm4562_vm12, %v2813_v32, %v1045_v57  ;;  %v1040_v12 = vmul.f32 30.0, %v1039_v58  ;;  %1340 = vmax.xlane.f32.xlu1 %v4579_v10  ;;  %v1780_v36 = vsel %vm1748_vm14, %v4579_v10, 0.0  ;;  %v4590_v59 = vpop.permute.xlu0 %1666  ;;  %v1182_v21 = vpop.f32.mrf.mxu0 }
 0x171   :  { %v1054_v15 = vsel %vm1051_vm2, %v1053_v52, %v1049_v47  ;;  %v1773_v32 = vsel %vm1741_vm4, %v4607_v20, 0.0  ;;  %v4625_v34 = vsel %vm1291_vm13, %v1182_v21, -1e+30  ;;  %vm1744_vm10 = vcmp.eq.s32.totalorder %v4530_v11, %v4594_v22 }
 0x172   :  { %1246 = vmatmul.bf16.gmra.mxu3 %v1102_v30  ;;  %v1055_v26 = vmul.f32 30.0, %v1054_v15  ;;  %v1086_v13 = vmul.f32 %v2970_v33, %v1040_v12  ;;  %v1774_v61 = vsel %vm1742_vm8, %v4625_v34, 0.0  ;;  %vm1751_vm0 = vcmp.eq.s32.totalorder %v4530_v11, %v1679_v60 }
 0x173   :  { %vm1745_vm2 = vcmp.eq.s32.totalorder %v4530_v11, %v4566_v44  ;;  %vm1747_vm3 = vcmp.eq.s32.totalorder %v4530_v11, %v4590_v59 }
 0x174   :  { %1804 = vadd.xlane.f32.xlu2 %v1772_v54  ;;  %v1087_v39 = vmul.f32 %v2971_v43, %v1055_v26 }
 0x175   :  { %v4639_v38 = vpop.permute.xlu2 %1687 }
 0x176   :  { %v1103_v27 = vpack.c.bf16 %v1087_v39, %v1086_v13  ;;  %v4603_v9 = vpop.permute.xlu1 %1663  ;;  %v1199_v16 = vpop.f32.mrf.mxu1 }
 0x177   :  { %v4614_v6 = vsel %vm1291_vm13, %v1199_v16, -1e+30  ;;  %vm1746_vm15 = vcmp.eq.s32.totalorder %v4530_v11, %v4603_v9 }
 0x178   :  { %v1676_v17 = vpop.permute.xlu0 %1675  ;;  %v1184_v18 = vpop.f32.mrf.mxu0 }
 0x179   :  { %vm1750_vm7 = vcmp.eq.s32.totalorder %v4530_v11, %v1676_v17  ;;  %v4667_v42 = vsel %vm1291_vm13, %v1184_v18, -1e+30 }
 0x17a   :  { %v1775_v54 = vsel %vm1743_vm9, %v4667_v42, 0.0 }
 0x17c   :  { %1820 = vadd.xlane.f32.xlu2 %v1780_v36 }
 0x17d   :  { %v1697_v50 = vpop.permute.xlu2 %1696 }
 0x17e   :  { %v1673_v14 = vpop.permute.xlu1 %1672  ;;  %vm1757_vm6 = vcmp.eq.s32.totalorder %v4530_v11, %v1697_v50 }
 0x17f   :  { %vm1749_vm5 = vcmp.eq.s32.totalorder %v4530_v11, %v1673_v14 }
 0x180   :  { %v4592_v1 = vpop.permute.xlu0 %1684  ;;  %v1781_v35 = vsel %vm1749_vm5, %v4614_v6, 0.0  ;;  %v1187_v3 = vpop.f32.mrf.mxu0 }
 0x181   :  { %v4686_v15 = vsel %vm1291_vm13, %v1187_v3, -1e+30  ;;  %vm1753_vm12 = vcmp.eq.s32.totalorder %v4530_v11, %v4592_v1 }
 0x182   :  { %1251 = vmatmul.bf16.gmra.mxu3 %v1103_v27  ;;  %v1202_v45 = vpop.f32.mrf.mxu1  ;;  %v1776_v62 = vsel %vm1744_vm10, %v4686_v15, 0.0 }
 0x183   :  { %v4630_v8 = vsel %vm1291_vm13, %v1202_v45, -1e+30 }
 0x184   :  { %v1782_v31 = vsel %vm1750_vm7, %v4630_v8, 0.0 }
 0x185   :  { %v4703_v43 = vpop.permute.xlu2 %1705 }
 0x186   :  { %v1682_v56 = vpop.permute.xlu1 %1681 }
 0x187   :  { %vm1752_vm11 = vcmp.eq.s32.totalorder %v4530_v11, %v1682_v56 }
 0x188   :  { %v1694_v25 = vpop.permute.xlu0 %1693  ;;  %v1189_v41 = vpop.f32.mrf.mxu0 }
 0x189   :  { %vm1756_vm1 = vcmp.eq.s32.totalorder %v4530_v11, %v1694_v25  ;;  %v4730_v16 = vsel %vm1291_vm13, %v1189_v41, -1e+30 }
 0x18a   :  { %v1204_v52 = vpop.f32.mrf.mxu1  ;;  %v1777_v50 = vsel %vm1745_vm2, %v4730_v16, 0.0 }
 0x18b   :  { %v4677_v47 = vsel %vm1291_vm13, %v1204_v52, -1e+30 }
 0x18c   :  { %v1783_v13 = vsel %vm1751_vm0, %v4677_v47, 0.0 }
 0x18e   :  { %v4658_v37 = vpop.permute.xlu1 %1690 }
 0x18f   :  { %vm1755_vm14 = vcmp.eq.s32.totalorder %v4530_v11, %v4658_v37 }
 0x190   :  { %v4698_v28 = vpop.permute.xlu0 %1702 }
 0x191   :  { %vm1759_vm4 = vcmp.eq.s32.totalorder %v4530_v11, %v4698_v28 }
 0x194   :  { %v1217_v24 = vpop.f32.mrf.mxu2 }
 0x195   :  { %v4598_v63 = vsel %vm1291_vm13, %v1217_v24, -1e+30 }
 0x196   :  { %1356 = vmax.xlane.f32.xlu0 %v4598_v63  ;;  %v1788_v51 = vsel %vm1756_vm1, %v4598_v63, 0.0  ;;  %v4682_v58 = vpop.permute.xlu1 %1699  ;;  %vm1754_vm1 = vcmp.eq.s32.totalorder %v4530_v11, %v4639_v38 }
 0x197   :  { %1836 = vadd.xlane.f32.xlu1 %v1788_v51  ;;  %v4724_v51 = vpop.permute.xlu2 %1714 }
 0x198   :  { %v4720_v24 = vpop.permute.xlu0 %1711  ;;  %vm1763_vm10 = vcmp.eq.s32.totalorder %v4530_v11, %v4724_v51 }
 0x199   :  { %vm1762_vm5 = vcmp.eq.s32.totalorder %v4530_v11, %v4720_v24 }
 0x19c   :  { %v1219_v29 = vpop.f32.mrf.mxu2 }
 0x19d   :  { %v4620_v4 = vsel %vm1291_vm13, %v1219_v29, -1e+30  ;;  %v1192_v29 = vpop.f32.mrf.mxu0 }
 0x19e   :  { %1326 = vmax.xlane.f32.xlu0 %v4607_v20  ;;  %v1789_v2 = vsel %vm1757_vm6, %v4620_v4, 0.0  ;;  %v4705_v39 = vpop.permute.xlu1 %1708  ;;  %vm1760_vm6 = vcmp.eq.s32.totalorder %v4530_v11, %v4703_v43 }
 0x19f   :  { %1806 = vadd.xlane.f32.xlu1 %v1773_v32  ;;  %v4741_v45 = vpop.permute.xlu2 %1723  ;;  %vm1761_vm7 = vcmp.eq.s32.totalorder %v4530_v11, %v4705_v39 }
 0x1a6   :  { %1822 = vadd.xlane.f32.xlu0 %v1781_v35  ;;  %v1207_v12 = vpop.f32.mrf.mxu1  ;;  %v4726_v49 = vpop.permute.xlu1 %1717 }
 0x1a7   :  { %1358 = vmax.xlane.f32.xlu1 %v4620_v4  ;;  %v4694_v19 = vsel %vm1291_vm13, %v1207_v12, -1e+30  ;;  %v4739_v35 = vpop.permute.xlu0 %1720  ;;  %v4764_v56 = vpop.permute.xlu2 %1732  ;;  %vm1764_vm9 = vcmp.eq.s32.totalorder %v4530_v11, %v4726_v49 }
 0x1a8   :  { %v1784_v33 = vsel %vm1752_vm11, %v4694_v19, 0.0  ;;  %vm1765_vm8 = vcmp.eq.s32.totalorder %v4530_v11, %v4739_v35 }
 0x1ae   :  { %v1209_v32 = vpop.f32.mrf.mxu1  ;;  %v4751_v60 = vpop.permute.xlu1 %1726 }
 0x1af   :  { %1328 = vmax.xlane.f32.xlu1 %v4625_v34  ;;  %v4735_v14 = vsel %vm1291_vm13, %v1209_v32, -1e+30  ;;  %vm1767_vm0 = vcmp.eq.s32.totalorder %v4530_v11, %v4751_v60 }
 0x1b7   :  { %1824 = vadd.xlane.f32.xlu1 %v1782_v31  ;;  %v1222_v53 = vpop.f32.mrf.mxu2  ;;  %v4745_v31 = vsel %vm1291_vm13, %v1192_v29, -1e+30 }
 0x1b8   :  { %v4654_v48 = vsel %vm1291_vm13, %v1222_v53, -1e+30  ;;  %v4758_v53 = vpop.permute.xlu0 %1729 }
 0x1b9   :  { %vm1768_vm11 = vcmp.eq.s32.totalorder %v4530_v11, %v4758_v53 }
 0x1bf   :  { %v1224_v23 = vpop.f32.mrf.mxu2 }
 0x1c0   :  { %v1237_v46 = vpop.f32.mrf.mxu3  ;;  %v4671_v30 = vsel %vm1291_vm13, %v1224_v23, -1e+30  ;;  %v4783_v3 = vpop.permute.xlu0 %1738 }
 0x1c1   :  { %v4636_v5 = vsel %vm1291_vm13, %v1237_v46, -1e+30  ;;  %v1785_v46 = vsel %vm1753_vm12, %v4735_v14, 0.0  ;;  %vm1766_vm12 = vcmp.eq.s32.totalorder %v4530_v11, %v4741_v45 }
 0x1c2   :  { %6140 = vst [vmem:[#allocation8_spill] sm:$0xff] %v4636_v5  ;;  %1372 = vmax.xlane.f32.xlu2 %v4636_v5  ;;  %v1796_v43 = vsel %vm1764_vm9, %v4636_v5, 0.0 }
 0x1c8   :  { %v1239_v0 = vpop.f32.mrf.mxu3 }
 0x1c9   :  { %v4643_v55 = vsel %vm1291_vm13, %v1239_v0, -1e+30  ;;  %v1778_v0 = vsel %vm1746_vm15, %v4745_v31, 0.0  ;;  %vm1771_vm15 = vcmp.eq.s32.totalorder %v4530_v11, %v4783_v3 }
 0x1ca   :  { %6141 = vst [vmem:[#allocation7_spill] sm:$0xff] %v4643_v55  ;;  %1374 = vmax.xlane.f32.xlu0 %v4643_v55  ;;  %1342 = vmax.xlane.f32.xlu2 %v4614_v6  ;;  %v1212_v44 = vpop.f32.mrf.mxu1  ;;  %v1797_v24 = vsel %vm1765_vm8, %v4643_v55, 0.0 }
 0x1cb   :  { %v4781_v52 = vsel %vm1291_vm13, %v1212_v44, -1e+30  ;;  %v1791_v44 = vsel %vm1759_vm4, %v4671_v30, 0.0 }
 0x1cc   :  { %v1786_v29 = vsel %vm1754_vm1, %v4781_v52, 0.0 }
 0x1d2   :  { %1344 = vmax.xlane.f32.xlu0 %v4630_v8  ;;  %1838 = vadd.xlane.f32.xlu2 %v1789_v2 }
 0x1d9   :  { %v1227_v36 = vpop.f32.mrf.mxu2 }
 0x1da   :  { %1808 = vadd.xlane.f32.xlu0 %v1774_v61  ;;  %1360 = vmax.xlane.f32.xlu2 %v4654_v48  ;;  %v4709_v17 = vsel %vm1291_vm13, %v1227_v36, -1e+30  ;;  %v4767_v61 = vpop.permute.xlu1 %1735 }
 0x1df   :  { %v4790_v12 = vpop.xlane.xlu2 %1324 }
 0x1e0   :  { %v1388_v51 = vsub.f32 %v4546_v7, %v4790_v12  ;;  %vm1933_vm2 = vcmp.eq.f32.partialorder %v4546_v7, %v4790_v12 }
 0x1e1   :  { %v1242_v57 = vpop.f32.mrf.mxu3  ;;  %v1229_v21 = vpop.f32.mrf.mxu2  ;;  %v4910_v7 = vsel %vm1933_vm2, %v4530_v11, 2147483647 }
 0x1e2   :  { %v4662_v40 = vsel %vm1291_vm13, %v1242_v57, -1e+30  ;;  %1362 = vmax.xlane.f32.xlu0 %v4671_v30  ;;  %1330 = vmax.xlane.f32.xlu2 %v4667_v42  ;;  %v4771_v18 = vsel %vm1291_vm13, %v1229_v21, -1e+30  ;;  %v1194_v57 = vpop.f32.mrf.mxu0 }
 0x1e3   :  { %6142 = vst [vmem:[#allocation5_spill] sm:$0xff] %v4662_v40  ;;  %1376 = vmax.xlane.f32.xlu1 %v4662_v40 }
 0x1e4   :  { %6146 = vst [vmem:[#allocation11_spill] sm:$0xff] %v4771_v18 }
 0x1e7   :  { %v4813_v59 = vpop.xlane.xlu2 %1804 }
 0x1e9   :  { %v1244_v26 = vpop.f32.mrf.mxu3 }
 0x1ea   :  { %1332 = vmax.xlane.f32.xlu0 %v4686_v15  ;;  %1810 = vadd.xlane.f32.xlu2 %v1775_v54  ;;  %v4714_v22 = vsel %vm1291_vm13, %v1244_v26, -1e+30  ;;  %v4788_v54 = vsel %vm1291_vm13, %v1194_v57, -1e+30  ;;  %v4792_v26 = vpop.xlane.xlu1 %1340 }
 0x1eb   :  { %1346 = vmax.xlane.f32.xlu1 %v4677_v47  ;;  %6143 = vst [vmem:[#allocation6_spill] sm:$0xff] %v4714_v22  ;;  %v1232_v1 = vpop.f32.mrf.mxu2  ;;  %v1779_v36 = vsel %vm1747_vm3, %v4788_v54, 0.0  ;;  %v1396_v53 = vsub.f32 %v4579_v10, %v4792_v26  ;;  %vm1769_vm3 = vcmp.eq.s32.totalorder %v4530_v11, %v4764_v56 }
 0x1ec   :  { %v4775_v23 = vsel %vm1291_vm13, %v1232_v1, -1e+30 }
 0x1ed   :  { %6147 = vst [vmem:[#allocation12_spill] sm:$0xff] %v4775_v23  ;;  %v1794_v28 = vsel %vm1762_vm5, %v4775_v23, 0.0  ;;  %v1436_v45 = vmul.f32 1.442695, %v1396_v53  ;;  %vm1941_vm5 = vcmp.eq.f32.partialorder %v4579_v10, %v4792_v26 }
 0x1ef   :  { %v4834_v1 = vpop.xlane.xlu2 %1820 }
 0x1f2   :  { %1828 = vadd.xlane.f32.xlu0 %v1784_v33  ;;  %1826 = vadd.xlane.f32.xlu2 %v1783_v13 }
 0x1f3   :  { %1812 = vadd.xlane.f32.xlu1 %v1776_v62  ;;  %v1214_v62 = vpop.f32.mrf.mxu1  ;;  %v1234_v21 = vpop.f32.mrf.mxu2 }
 0x1f4   :  { %v4798_v13 = vsel %vm1291_vm13, %v1214_v62, -1e+30 }
 0x1f5   :  { %v1247_v27 = vpop.f32.mrf.mxu3  ;;  %v1787_v32 = vsel %vm1755_vm14, %v4798_v13, 0.0  ;;  %vm1770_vm14 = vcmp.eq.s32.totalorder %v4530_v11, %v4767_v61 }
 0x1f6   :  { %v4718_v25 = vsel %vm1291_vm13, %v1247_v27, -1e+30 }
 0x1f7   :  { %6144 = vst [vmem:[#allocation9_spill] sm:$0xff] %v4718_v25 }
 0x1fa   :  { %1380 = vmax.xlane.f32.xlu0 %v4718_v25  ;;  %1378 = vmax.xlane.f32.xlu2 %v4714_v22 }
 0x1fb   :  { %1364 = vmax.xlane.f32.xlu1 %v4709_v17 }
 0x1fd   :  { %v1249_v2 = vpop.f32.mrf.mxu3 }
 0x1fe   :  { %v4762_v9 = vsel %vm1291_vm13, %v1249_v2, -1e+30 }
 0x1ff   :  { %6145 = vst [vmem:[#allocation10_spill] sm:$0xff] %v4762_v9 }
 0x202   :  { %1350 = vmax.xlane.f32.xlu0 %v4735_v14  ;;  %1348 = vmax.xlane.f32.xlu2 %v4694_v19 }
 0x203   :  { %1334 = vmax.xlane.f32.xlu1 %v4730_v16 }
 0x205   :  { %v1252_v33 = vpop.f32.mrf.mxu3 }
 0x206   :  { %v4822_v38 = vsel %vm1291_vm13, %v1252_v33, -1e+30 }
 0x207   :  { %6150 = vst [vmem:[#allocation15_spill] sm:$0xff] %v4822_v38  ;;  %v1802_v3 = vsel %vm1770_vm14, %v4822_v38, 0.0 }
 0x209   :  { %v4803_v27 = vpop.xlane.xlu0 %1356 }
 0x20a   :  { %1816 = vadd.xlane.f32.xlu0 %v1778_v0  ;;  %1814 = vadd.xlane.f32.xlu2 %v1777_v50  ;;  %v4809_v41 = vpop.xlane.xlu1 %1836  ;;  %v4817_v0 = vsel %vm1291_vm13, %v1234_v21, -1e+30 }
 0x20b   :  { %1830 = vadd.xlane.f32.xlu1 %v1785_v46  ;;  %6148 = vst [vmem:[#allocation13_spill] sm:$0xff] %v4809_v41  ;;  %v1795_v39 = vsel %vm1763_vm10, %v4817_v0, 0.0 }
 0x20c   :  { %6149 = vst [vmem:[#allocation14_spill] sm:$0xff] %v4817_v0 }
 0x20d   :  { %v1254_v46 = vpop.f32.mrf.mxu3 }
 0x20e   :  { %v4826_v37 = vsel %vm1291_vm13, %v1254_v46, -1e+30  ;;  %vm1758_vm13 = vcmp.eq.s32.totalorder %v4530_v11, %v4682_v58  ;;  %v1793_v58 = vsel %vm1761_vm7, %v4771_v18, 0.0 }
 0x20f   :  { %6151 = vst [vmem:[#allocation16_spill] sm:$0xff] %v4826_v37  ;;  %v1790_v57 = vsel %vm1758_vm13, %v4654_v48, 0.0 }
 0x211   :  { %v4828_v50 = vpop.xlane.xlu0 %1326 }
 0x212   :  { %1368 = vmax.xlane.f32.xlu0 %v4775_v23  ;;  %1366 = vmax.xlane.f32.xlu2 %v4771_v18  ;;  %v4832_v2 = vpop.xlane.xlu1 %1806  ;;  %vm1934_vm13 = vcmp.eq.f32.partialorder %v4607_v20, %v4828_v50 }
 0x213   :  { %1382 = vmax.xlane.f32.xlu1 %v4762_v9  ;;  %6152 = vst [vmem:[#allocation17_spill] sm:$0xff] %v4832_v2 }
 0x219   :  { %v4843_v62 = vpop.xlane.xlu0 %1822 }
 0x21a   :  { %1338 = vmax.xlane.f32.xlu0 %v4788_v54  ;;  %1336 = vmax.xlane.f32.xlu2 %v4745_v31  ;;  %6153 = vst [vmem:[#allocation18_spill] sm:$0xff] %v4843_v62  ;;  %v4845_v33 = vpop.xlane.xlu1 %1358 }
 0x21b   :  { %1352 = vmax.xlane.f32.xlu1 %v4781_v52  ;;  %v1405_v56 = vsub.f32 %v4620_v4, %v4845_v33 }
 0x222   :  { %1834 = vadd.xlane.f32.xlu0 %v1787_v32  ;;  %1832 = vadd.xlane.f32.xlu2 %v1786_v29  ;;  %v1792_v32 = vsel %vm1760_vm6, %v4709_v17, 0.0  ;;  %v4865_v46 = vpop.xlane.xlu1 %1328 }
 0x223   :  { %1818 = vadd.xlane.f32.xlu1 %v1779_v36  ;;  %vm1935_vm1 = vcmp.eq.f32.partialorder %v4625_v34, %v4865_v46 }
 0x22a   :  { %1386 = vmax.xlane.f32.xlu0 %v4826_v37  ;;  %1384 = vmax.xlane.f32.xlu2 %v4822_v38  ;;  %v4886_v49 = vpop.xlane.xlu1 %1824 }
 0x22b   :  { %1370 = vmax.xlane.f32.xlu1 %v4817_v0  ;;  %6157 = vst [vmem:[#allocation22_spill] sm:$0xff] %v4886_v49  ;;  %v1454_v49 = vmul.f32 1.442695, %v1405_v56 }
 0x232   :  { %1840 = vadd.xlane.f32.xlu0 %v1790_v57  ;;  %1354 = vmax.xlane.f32.xlu2 %v4798_v13  ;;  %v1800_v57 = vsel %vm1768_vm11, %v4718_v25, 0.0 }
 0x233   :  { %1842 = vadd.xlane.f32.xlu1 %v1791_v44 }
 0x235   :  { %v4847_v36 = vpop.xlane.xlu2 %1372 }
 0x236   :  { %6154 = vst [vmem:[#allocation19_spill] sm:$0xff] %v4847_v36 }
 0x23a   :  { %1846 = vadd.xlane.f32.xlu0 %v1793_v58  ;;  %1844 = vadd.xlane.f32.xlu2 %v1792_v32  ;;  %v1798_v58 = vsel %vm1766_vm12, %v4662_v40, 0.0  ;;  %v1420_v32 = vmul.f32 1.442695, %v1388_v51  ;;  %v1404_v51 = vsub.f32 %v4598_v63, %v4803_v27 }
 0x23b   :  { %1848 = vadd.xlane.f32.xlu1 %v1794_v28  ;;  %v1799_v28 = vsel %vm1767_vm0, %v4714_v22, 0.0 }
 0x23c   :  { %2814 = vpow2.f32 %v1420_v32 }
 0x23d   :  { %v4858_v29 = vpop.xlane.xlu2 %1342  ;;  %v4860_v21 = vpop.xlane.xlu0 %1374  ;;  %2816 = vpow2.f32 %v1436_v45  ;;  %v1390_v45 = vsub.f32 %v4625_v34, %v4865_v46 }
 0x23e   :  { %6155 = vst [vmem:[#allocation20_spill] sm:$0xff] %v4860_v21  ;;  %v1413_v41 = vsub.f32 %v4643_v55, %v4860_v21  ;;  %vm1942_vm11 = vcmp.eq.f32.partialorder %v4614_v6, %v4858_v29 }
 0x23f   :  { %v1424_v2 = vmul.f32 1.442695, %v1390_v45 }
 0x242   :  { %1852 = vadd.xlane.f32.xlu0 %v1796_v43  ;;  %1850 = vadd.xlane.f32.xlu2 %v1795_v39  ;;  %v1803_v43 = vsel %vm1771_vm15, %v4826_v37, 0.0  ;;  %v1801_v39 = vsel %vm1769_vm3, %v4762_v9, 0.0  ;;  %vm1950_vm15 = vcmp.eq.f32.partialorder %v4620_v4, %v4845_v33 }
 0x243   :  { %1854 = vadd.xlane.f32.xlu1 %v1797_v24 }
 0x245   :  { %v4873_v44 = vpop.xlane.xlu2 %1838  ;;  %v4875_v35 = vpop.xlane.xlu0 %1344 }
 0x246   :  { %6156 = vst [vmem:[#allocation21_spill] sm:$0xff] %v4873_v44  ;;  %vm1943_vm12 = vcmp.eq.f32.partialorder %v4630_v8, %v4875_v35 }
 0x24a   :  { %1858 = vadd.xlane.f32.xlu0 %v1799_v28  ;;  %1856 = vadd.xlane.f32.xlu2 %v1798_v58  ;;  %v1998_v28 = vshra.s32 %v4910_v7, 16 }
 0x24b   :  { %1860 = vadd.xlane.f32.xlu1 %v1800_v57  ;;  %v1412_v57 = vsub.f32 %v4636_v5, %v4847_v36  ;;  %v2815_v5 = vpop.eup %2814 }
 0x24d   :  { %v4892_v24 = vpop.xlane.xlu2 %1360  ;;  %v4894_v60 = vpop.xlane.xlu0 %1808  ;;  %v1468_v58 = vmul.f32 1.442695, %v1412_v57  ;;  %v1389_v57 = vsub.f32 %v4607_v20, %v4828_v50  ;;  %v5076_v20 = vsel %vm1941_vm5, %v4530_v11, 2147483647  ;;  %vm1900_vm5 = vcmask 7168  }
 0x24e   :  { %6158 = vst [vmem:[#allocation23_spill] sm:$0xff] %v4894_v60  ;;  %v4923_v60 = vcvt.s32.f32 %v1998_v28 }
 0x24f   :  { %2818 = vpow2.f32 %v1468_v58  ;;  %v1422_v62 = vmul.f32 1.442695, %v1389_v57 }
 0x250   :  { %6160 = vst [vmem:[#allocation25_spill] sm:$0xff] %v4923_v60 }
 0x252   :  { %1864 = vadd.xlane.f32.xlu0 %v1802_v3  ;;  %1862 = vadd.xlane.f32.xlu2 %v1801_v39  ;;  %v2817_v39 = vpop.eup %2816  ;;  %v1397_v3 = vsub.f32 %v4614_v6, %v4858_v29 }
 0x253   :  { %1866 = vadd.xlane.f32.xlu1 %v1803_v43  ;;  %v1452_v43 = vmul.f32 1.442695, %v1404_v51 }
 0x255   :  { %v4919_v53 = vpop.xlane.xlu2 %1330  ;;  %v4921_v32 = vpop.xlane.xlu0 %1362  ;;  %2820 = vpow2.f32 %v1452_v43  ;;  %v1406_v43 = vsub.f32 %v4654_v48, %v4892_v24 }
 0x256   :  { %v4916_v61 = vpop.xlane.xlu1 %1376  ;;  %2822 = vpow2.f32 %v1454_v49  ;;  %v2819_v58 = vpop.eup %2818  ;;  %vm1936_vm7 = vcmp.eq.f32.partialorder %v4667_v42, %v4919_v53 }
 0x257   :  { %6159 = vst [vmem:[#allocation24_spill] sm:$0xff] %v4916_v61  ;;  %v1414_v49 = vsub.f32 %v4662_v40, %v4916_v61  ;;  %v1456_v45 = vmul.f32 1.442695, %v1406_v43 }
 0x25a   :  { %1500 = vadd.xlane.f32.xlu0 %v2817_v39  ;;  %2001 = vmin.xlane.f32.xlu2 %v4923_v60 }
 0x25b   :  { %1484 = vadd.xlane.f32.xlu1 %v2815_v5  ;;  %v1438_v5 = vmul.f32 1.442695, %v1397_v3  ;;  %v2821_v44 = vpop.eup %2820 }
 0x25c   :  { %v2823_v39 = vpop.eup %2822 }
 0x25d   :  { %v4934_v56 = vpop.xlane.xlu2 %1810  ;;  %v4936_v28 = vpop.xlane.xlu0 %1332  ;;  %2824 = vpow2.f32 %v1438_v5  ;;  %v1472_v5 = vmul.f32 1.442695, %v1414_v49 }
 0x25e   :  { %v4932_v51 = vpop.xlane.xlu1 %1346  ;;  %6161 = vst [vmem:[#allocation26_spill] sm:$0xff] %v4934_v56  ;;  %2826 = vpow2.f32 %v1424_v2  ;;  %v1470_v56 = vmul.f32 1.442695, %v1413_v41  ;;  %vm1937_vm6 = vcmp.eq.f32.partialorder %v4686_v15, %v4936_v28 }
 0x25f   :  { %2828 = vpow2.f32 %v1422_v62  ;;  %v1399_v62 = vsub.f32 %v4677_v47, %v4932_v51  ;;  %vm1944_vm8 = vcmp.eq.f32.partialorder %v4677_v47, %v4932_v51 }
 0x260   :  { %2830 = vpow2.f32 %v1456_v45 }
 0x261   :  { %2832 = vpow2.f32 %v1470_v56  ;;  %v1442_v40 = vmul.f32 1.442695, %v1399_v62 }
 0x262   :  { %1518 = vadd.xlane.f32.xlu0 %v2823_v39  ;;  %1516 = vadd.xlane.f32.xlu2 %v2821_v44  ;;  %v1391_v44 = vsub.f32 %v4667_v42, %v4919_v53  ;;  %v1398_v39 = vsub.f32 %v4630_v8, %v4875_v35  ;;  %2834 = vpow2.f32 %v1472_v5  ;;  %v1407_v5 = vsub.f32 %v4671_v30, %v4921_v32 }
 0x263   :  { %1532 = vadd.xlane.f32.xlu1 %v2819_v58  ;;  %v2825_v60 = vpop.eup %2824 }
 0x264   :  { %v2827_v2 = vpop.eup %2826  ;;  %v1426_v43 = vmul.f32 1.442695, %v1391_v44  ;;  %v1440_v45 = vmul.f32 1.442695, %v1398_v39 }
 0x265   :  { %v4946_v57 = vpop.xlane.xlu2 %1826  ;;  %v4948_v58 = vpop.xlane.xlu0 %1828 }
 0x266   :  { %v4944_v3 = vpop.xlane.xlu1 %1812  ;;  %6163 = vst [vmem:[#allocation28_spill] sm:$0xff] %v4946_v57  ;;  %v2829_v36 = vpop.eup %2828  ;;  %2836 = vpow2.f32 %v1426_v43 }
 0x267   :  { %6162 = vst [vmem:[#allocation27_spill] sm:$0xff] %v4944_v3  ;;  %v2831_v55 = vpop.eup %2830  ;;  %2838 = vpow2.f32 %v1440_v45 }
 0x268   :  { %6164 = vst [vmem:[#allocation29_spill] sm:$0xff] %v4948_v58  ;;  %v2833_v3 = vpop.eup %2832  ;;  %2840 = vpow2.f32 %v1442_v40 }
 0x26a   :  { %1488 = vadd.xlane.f32.xlu0 %v2827_v2  ;;  %1486 = vadd.xlane.f32.xlu2 %v2829_v36  ;;  %v2835_v36 = vpop.eup %2834 }
 0x26b   :  { %1502 = vadd.xlane.f32.xlu1 %v2825_v60 }
 0x26c   :  { %v2837_v58 = vpop.eup %2836 }
 0x26d   :  { %v4958_v49 = vpop.xlane.xlu2 %1378  ;;  %v4960_v60 = vpop.xlane.xlu0 %1380 }
 0x26e   :  { %v4956_v41 = vpop.xlane.xlu1 %1364  ;;  %6165 = vst [vmem:[#allocation30_spill] sm:$0xff] %v4958_v49  ;;  %v1415_v56 = vsub.f32 %v4714_v22, %v4958_v49 }
 0x26f   :  { %v1408_v2 = vsub.f32 %v4709_v17, %v4956_v41  ;;  %vm1953_vm14 = vcmp.eq.f32.partialorder %v4709_v17, %v4956_v41 }
 0x270   :  { %v1474_v39 = vmul.f32 1.442695, %v1415_v56 }
 0x271   :  { %v1460_v43 = vmul.f32 1.442695, %v1408_v2 }
 0x272   :  { %1536 = vadd.xlane.f32.xlu0 %v2835_v36  ;;  %1534 = vadd.xlane.f32.xlu2 %v2833_v3  ;;  %2842 = vpow2.f32 %v1474_v39  ;;  %v2839_v36 = vpop.eup %2838  ;;  %v1392_v3 = vsub.f32 %v4686_v15, %v4936_v28  ;;  %v5104_v15 = vsel %vm1944_vm8, %v4530_v11, 2147483647 }
 0x273   :  { %1520 = vadd.xlane.f32.xlu1 %v2831_v55  ;;  %v1458_v55 = vmul.f32 1.442695, %v1407_v5  ;;  %v2841_v40 = vpop.eup %2840  ;;  %6183 = vst [vmem:[#allocation48_spill] sm:$0xff] %v5104_v15 }
 0x275   :  { %v4970_v62 = vpop.xlane.xlu2 %1348  ;;  %v4972_v22 = vpop.xlane.xlu0 %1350  ;;  %2844 = vpow2.f32 %v1458_v55 }
 0x276   :  { %v4968_v44 = vpop.xlane.xlu1 %1334  ;;  %v1400_v45 = vsub.f32 %v4694_v19, %v4970_v62  ;;  %2846 = vpow2.f32 %v1460_v43  ;;  %v1416_v43 = vsub.f32 %v4718_v25, %v4960_v60  ;;  %vm1945_vm2 = vcmp.eq.f32.partialorder %v4694_v19, %v4970_v62 }
 0x277   :  { %v1393_v56 = vsub.f32 %v4730_v16, %v4968_v44  ;;  %vm1938_vm4 = vcmp.eq.f32.partialorder %v4730_v16, %v4968_v44  ;;  %v5170_v8 = vsel %vm1945_vm2, %v4530_v11, 2147483647  ;;  %vm1946_vm3 = vcmp.eq.f32.partialorder %v4735_v14, %v4972_v22 }
 0x278   :  { %v1444_v2 = vmul.f32 1.442695, %v1400_v45  ;;  %v2843_v39 = vpop.eup %2842  ;;  %6196 = vst [vmem:[#allocation61_spill] sm:$0xff] %v5170_v8 }
 0x279   :  { %v1430_v61 = vmul.f32 1.442695, %v1393_v56 }
 0x27a   :  { %1506 = vadd.xlane.f32.xlu0 %v2841_v40  ;;  %1504 = vadd.xlane.f32.xlu2 %v2839_v36  ;;  %2848 = vpow2.f32 %v1444_v2 }
 0x27b   :  { %1490 = vadd.xlane.f32.xlu1 %v2837_v58  ;;  %v1428_v58 = vmul.f32 1.442695, %v1392_v3  ;;  %v2845_v55 = vpop.eup %2844 }
 0x27c   :  { %v2847_v21 = vpop.eup %2846 }
 0x27d   :  { %v4982_v49 = vpop.xlane.xlu2 %1814  ;;  %v4984_v57 = vpop.xlane.xlu0 %1816  ;;  %2850 = vpow2.f32 %v1428_v58 }
 0x27e   :  { %v4980_v5 = vpop.xlane.xlu1 %1830  ;;  %6167 = vst [vmem:[#allocation32_spill] sm:$0xff] %v4984_v57  ;;  %2852 = vpow2.f32 %v1430_v61  ;;  %v1401_v61 = vsub.f32 %v4735_v14, %v4972_v22  ;;  %v5199_v14 = vsel %vm1953_vm14, %v4530_v11, 2147483647 }
 0x27f   :  { %6166 = vst [vmem:[#allocation31_spill] sm:$0xff] %v4980_v5  ;;  %v1476_v5 = vmul.f32 1.442695, %v1416_v43 }
 0x280   :  { %v2849_v40 = vpop.eup %2848  ;;  %6201 = vst [vmem:[#allocation66_spill] sm:$0xff] %v5199_v14 }
 0x281   :  { %2854 = vpow2.f32 %v1476_v5 }
 0x282   :  { %1524 = vadd.xlane.f32.xlu0 %v2847_v21  ;;  %1522 = vadd.xlane.f32.xlu2 %v2845_v55 }
 0x283   :  { %1538 = vadd.xlane.f32.xlu1 %v2843_v39  ;;  %v2851_v25 = vpop.eup %2850 }
 0x284   :  { %v2853_v58 = vpop.eup %2852 }
 0x285   :  { %v4992_v3 = vpop.xlane.xlu2 %1366  ;;  %v4994_v56 = vpop.xlane.xlu0 %1368 }
 0x286   :  { %v4988_v36 = vpop.xlane.xlu1 %1382  ;;  %6169 = vst [vmem:[#allocation34_spill] sm:$0xff] %v4994_v56  ;;  %v1409_v2 = vsub.f32 %v4771_v18, %v4992_v3 }
 0x287   :  { %6168 = vst [vmem:[#allocation33_spill] sm:$0xff] %v4988_v36  ;;  %v1417_v45 = vsub.f32 %v4762_v9, %v4988_v36  ;;  %v1446_v9 = vmul.f32 1.442695, %v1401_v61 }
 0x288   :  { %v1462_v21 = vmul.f32 1.442695, %v1409_v2 }
 0x289   :  { %v1478_v39 = vmul.f32 1.442695, %v1417_v45 }
 0x28a   :  { %2856 = vpow2.f32 %v1462_v21  ;;  %1494 = vadd.xlane.f32.xlu0 %v2853_v58  ;;  %1492 = vadd.xlane.f32.xlu2 %v2851_v25  ;;  %v1410_v25 = vsub.f32 %v4775_v23, %v4994_v56 }
 0x28b   :  { %1508 = vadd.xlane.f32.xlu1 %v2849_v40  ;;  %2858 = vpow2.f32 %v1478_v39  ;;  %v2855_v40 = vpop.eup %2854 }
 0x28c   :  { %2860 = vpow2.f32 %v1446_v9 }
 0x28d   :  { %v5004_v18 = vpop.xlane.xlu2 %1336  ;;  %v5006_v45 = vpop.xlane.xlu0 %1338 }
 0x28e   :  { %v5000_v55 = vpop.xlane.xlu1 %1352  ;;  %v1394_v5 = vsub.f32 %v4745_v31, %v5004_v18  ;;  %vm1939_vm9 = vcmp.eq.f32.partialorder %v4745_v31, %v5004_v18  ;;  %vm1940_vm10 = vcmp.eq.f32.partialorder %v4788_v54, %v5006_v45 }
 0x28f   :  { %v1402_v43 = vsub.f32 %v4781_v52, %v5000_v55  ;;  %vm1947_vm0 = vcmp.eq.f32.partialorder %v4781_v52, %v5000_v55 }
 0x290   :  { %v2857_v57 = vpop.eup %2856  ;;  %v1432_v21 = vmul.f32 1.442695, %v1394_v5  ;;  %v1464_v5 = vmul.f32 1.442695, %v1410_v25 }
 0x291   :  { %v1448_v2 = vmul.f32 1.442695, %v1402_v43  ;;  %v2859_v58 = vpop.eup %2858 }
 0x292   :  { %2862 = vpow2.f32 %v1432_v21  ;;  %1542 = vadd.xlane.f32.xlu0 %v2859_v58  ;;  %1540 = vadd.xlane.f32.xlu2 %v2855_v40  ;;  %v2861_v43 = vpop.eup %2860  ;;  %v5021_v21 = vsel %vm1935_vm1, %v4530_v11, 2147483647  ;;  %v1395_v40 = vsub.f32 %v4788_v54, %v5006_v45  ;;  %v5137_v54 = vsel %vm1947_vm0, %v4530_v11, 2147483647 }
 0x293   :  { %1526 = vadd.xlane.f32.xlu1 %v2857_v57  ;;  %2864 = vpow2.f32 %v1448_v2  ;;  %6172 = vst [vmem:[#allocation37_spill] sm:$0xff] %v5021_v21  ;;  %v2026_v34 = vshra.s32 %v5021_v21, 16 }
 0x294   :  { %2866 = vpow2.f32 %v1464_v5  ;;  %v1434_v25 = vmul.f32 1.442695, %v1395_v40  ;;  %6189 = vst [vmem:[#allocation54_spill] sm:$0xff] %v5137_v54 }
 0x295   :  { %v5014_v61 = vpop.xlane.xlu2 %1832  ;;  %v5016_v36 = vpop.xlane.xlu0 %1834 }
 0x296   :  { %v5012_v39 = vpop.xlane.xlu1 %1818  ;;  %6171 = vst [vmem:[#allocation36_spill] sm:$0xff] %v5016_v36  ;;  %2868 = vpow2.f32 %v1434_v25 }
 0x297   :  { %6170 = vst [vmem:[#allocation35_spill] sm:$0xff] %v5012_v39 }
 0x298   :  { %v2863_v9 = vpop.eup %2862 }
 0x299   :  { %v2865_v57 = vpop.eup %2864 }
 0x29a   :  { %1512 = vadd.xlane.f32.xlu0 %v2865_v57  ;;  %1510 = vadd.xlane.f32.xlu2 %v2861_v43  ;;  %v5036_v57 = vcvt.s32.f32 %v2026_v34  ;;  %v2867_v43 = vpop.eup %2866 }
 0x29b   :  { %1496 = vadd.xlane.f32.xlu1 %v2863_v9 }
 0x29c   :  { %6174 = vst [vmem:[#allocation39_spill] sm:$0xff] %v5036_v57 }
 0x29d   :  { %v5030_v23 = vpop.xlane.xlu2 %1384  ;;  %v5032_v36 = vpop.xlane.xlu0 %1386 }
 0x29e   :  { %v5025_v2 = vpop.xlane.xlu1 %1370  ;;  %6173 = vst [vmem:[#allocation38_spill] sm:$0xff] %v5032_v36  ;;  %v1418_v39 = vsub.f32 %v4822_v38, %v5030_v23  ;;  %v1419_v40 = vsub.f32 %v4826_v37, %v5032_v36 }
 0x29f   :  { %v1411_v58 = vsub.f32 %v4817_v0, %v5025_v2 }
 0x2a0   :  { %v1480_v9 = vmul.f32 1.442695, %v1418_v39  ;;  %v1482_v34 = vmul.f32 1.442695, %v1419_v40 }
 0x2a1   :  { %v1466_v56 = vmul.f32 1.442695, %v1411_v58  ;;  %v2869_v58 = vpop.eup %2868 }
 0x2a2   :  { %2870 = vpow2.f32 %v1480_v9  ;;  %2029 = vmin.xlane.f32.xlu0 %v5036_v57  ;;  %1528 = vadd.xlane.f32.xlu2 %v2867_v43  ;;  %v5052_v43 = vsel %vm1938_vm4, %v4530_v11, 2147483647  ;;  %v5107_v57 = vsel %vm1939_vm9, %v4530_v11, 2147483647  ;;  %vm1949_vm4 = vcmp.eq.f32.partialorder %v4598_v63, %v4803_v27 }
 0x2a3   :  { %2872 = vpow2.f32 %v1466_v56  ;;  %6175 = vst [vmem:[#allocation40_spill] sm:$0xff] %v5052_v43  ;;  %v2068_v16 = vshra.s32 %v5052_v43, 16 }
 0x2a4   :  { %6184 = vst [vmem:[#allocation49_spill] sm:$0xff] %v5107_v57 }
 0x2a5   :  { %v5043_v0 = vpop.xlane.xlu2 %1354  ;;  %v5045_v21 = vpop.xlane.xlu0 %1840 }
 0x2a6   :  { %v5039_v5 = vpop.xlane.xlu1 %1842  ;;  %v1403_v39 = vsub.f32 %v4798_v13, %v5043_v0  ;;  %vm1948_vm1 = vcmp.eq.f32.partialorder %v4798_v13, %v5043_v0 }
 0x2a8   :  { %v2871_v25 = vpop.eup %2870  ;;  %v1450_v9 = vmul.f32 1.442695, %v1403_v39 }
 0x2a9   :  { %v2873_v56 = vpop.eup %2872  ;;  %1544 = vadd.xlane.f32.xlu1 %v2871_v25 }
 0x2aa   :  { %2874 = vpow2.f32 %v1450_v9  ;;  %1530 = vadd.xlane.f32.xlu0 %v2873_v56  ;;  %1498 = vadd.xlane.f32.xlu2 %v2869_v58  ;;  %v5067_v58 = vcvt.s32.f32 %v2068_v16  ;;  %v5073_v9 = vsel %vm1936_vm7, %v4530_v11, 2147483647  ;;  %v2110_v56 = vshra.s32 %v5076_v20, 16 }
 0x2ab   :  { %2876 = vpow2.f32 %v1482_v34  ;;  %v5070_v34 = vsel %vm1934_vm13, %v4530_v11, 2147483647  ;;  %6178 = vst [vmem:[#allocation43_spill] sm:$0xff] %v5073_v9  ;;  %v2040_v16 = vshra.s32 %v5073_v9, 16  ;;  %vm1952_vm13 = vcmp.eq.f32.partialorder %v4671_v30, %v4921_v32 }
 0x2ac   :  { %6176 = vst [vmem:[#allocation41_spill] sm:$0xff] %v5067_v58  ;;  %v2012_v42 = vshra.s32 %v5070_v34, 16  ;;  %vm1951_vm7 = vcmp.eq.f32.partialorder %v4654_v48, %v4892_v24 }
 0x2ad   :  { %v5059_v38 = vpop.xlane.xlu2 %1844  ;;  %v5061_v40 = vpop.xlane.xlu0 %1846  ;;  %6177 = vst [vmem:[#allocation42_spill] sm:$0xff] %v5070_v34  ;;  %v5097_v34 = vsel %vm1937_vm6, %v4530_v11, 2147483647  ;;  %v5101_v9 = vcvt.s32.f32 %v2040_v16  ;;  %v5254_v48 = vsel %vm1951_vm7, %v4530_v11, 2147483647 }
 0x2ae   :  { %v5054_v37 = vpop.xlane.xlu1 %1848  ;;  %6180 = vst [vmem:[#allocation45_spill] sm:$0xff] %v5097_v34  ;;  %v2054_v31 = vshra.s32 %v5097_v34, 16 }
 0x2af   :  { %6182 = vst [vmem:[#allocation47_spill] sm:$0xff] %v5101_v9 }
 0x2b0   :  { %v2875_v39 = vpop.eup %2874 }
 0x2b1   :  { %v2877_v25 = vpop.eup %2876  ;;  %1514 = vadd.xlane.f32.xlu1 %v2875_v39 }
 0x2b2   :  { %2071 = vmin.xlane.f32.xlu0 %v5067_v58  ;;  %1546 = vadd.xlane.f32.xlu2 %v2877_v25  ;;  %v5094_v25 = vcvt.s32.f32 %v2012_v42  ;;  %v5099_v58 = vcvt.s32.f32 %v2110_v56  ;;  %v2152_v42 = vshra.s32 %v5104_v15, 16  ;;  %v2082_v56 = vshra.s32 %v5107_v57, 16 }
 0x2b3   :  { %v5141_v15 = vsel %vm1942_vm11, %v4530_v11, 2147483647 }
 0x2b4   :  { %6179 = vst [vmem:[#allocation44_spill] sm:$0xff] %v5094_v25  ;;  %v5132_v34 = vcvt.s32.f32 %v2152_v42  ;;  %v5134_v57 = vcvt.s32.f32 %v2082_v56  ;;  %v2124_v42 = vshra.s32 %v5141_v15, 16 }
 0x2b5   :  { %v5086_v43 = vpop.xlane.xlu2 %1850  ;;  %v5088_v39 = vpop.xlane.xlu0 %1852  ;;  %6181 = vst [vmem:[#allocation46_spill] sm:$0xff] %v5099_v58 }
 0x2b6   :  { %v5079_v10 = vpop.xlane.xlu1 %1854  ;;  %6187 = vst [vmem:[#allocation52_spill] sm:$0xff] %v5132_v34 }
 0x2b7   :  { %6188 = vst [vmem:[#allocation53_spill] sm:$0xff] %v5134_v57 }
 0x2b8   :  { %6190 = vst [vmem:[#allocation55_spill] sm:$0xff] %v5141_v15  ;;  %v5174_v15 = vsel %vm1950_vm15, %v4530_v11, 2147483647 }
 0x2b9   :  { %2015 = vmin.xlane.f32.xlu1 %v5094_v25  ;;  %v5127_v25 = vcvt.s32.f32 %v2054_v31  ;;  %v2194_v31 = vshra.s32 %v5137_v54, 16  ;;  %6197 = vst [vmem:[#allocation62_spill] sm:$0xff] %v5174_v15 }
 0x2ba   :  { %2113 = vmin.xlane.f32.xlu0 %v5099_v58  ;;  %2043 = vmin.xlane.f32.xlu2 %v5101_v9  ;;  %v5130_v9 = vsel %vm1940_vm10, %v4530_v11, 2147483647 }
 0x2bb   :  { %6185 = vst [vmem:[#allocation50_spill] sm:$0xff] %v5127_v25  ;;  %v2096_v52 = vshra.s32 %v5130_v9, 16  ;;  %v5165_v54 = vcvt.s32.f32 %v2194_v31  ;;  %v2166_v31 = vshra.s32 %v5170_v8, 16  ;;  %v5202_v8 = vsel %vm1948_vm1, %v4530_v11, 2147483647 }
 0x2bc   :  { %6186 = vst [vmem:[#allocation51_spill] sm:$0xff] %v5130_v9  ;;  %v5163_v9 = vsel %vm1943_vm12, %v4530_v11, 2147483647 }
 0x2bd   :  { %v5119_v16 = vpop.xlane.xlu2 %1856  ;;  %v5121_v36 = vpop.xlane.xlu0 %1858  ;;  %6193 = vst [vmem:[#allocation58_spill] sm:$0xff] %v5163_v9  ;;  %v2138_v19 = vshra.s32 %v5163_v9, 16  ;;  %v5196_v9 = vcvt.s32.f32 %v2166_v31  ;;  %v2278_v31 = vshra.s32 %v5199_v14, 16 }
 0x2be   :  { %v5112_v47 = vpop.xlane.xlu1 %1860  ;;  %6194 = vst [vmem:[#allocation59_spill] sm:$0xff] %v5165_v54 }
 0x2c1   :  { %2057 = vmin.xlane.f32.xlu1 %v5127_v25 }
 0x2c2   :  { %2155 = vmin.xlane.f32.xlu0 %v5132_v34  ;;  %2085 = vmin.xlane.f32.xlu2 %v5134_v57  ;;  %v5160_v57 = vcvt.s32.f32 %v2096_v52  ;;  %v5167_v34 = vcvt.s32.f32 %v2124_v42  ;;  %v2236_v52 = vshra.s32 %v5174_v15, 16 }
 0x2c4   :  { %6192 = vst [vmem:[#allocation57_spill] sm:$0xff] %v5160_v57  ;;  %v5194_v15 = vcvt.s32.f32 %v2236_v52 }
 0x2c5   :  { %v5152_v56 = vpop.xlane.xlu2 %1862  ;;  %v5154_v25 = vpop.xlane.xlu0 %1864  ;;  %6195 = vst [vmem:[#allocation60_spill] sm:$0xff] %v5167_v34 }
 0x2c6   :  { %v5145_v6 = vpop.xlane.xlu1 %1866  ;;  %6200 = vst [vmem:[#allocation65_spill] sm:$0xff] %v5194_v15 }
 0x2c7   :  { %6191 = vst [vmem:[#allocation56_spill] sm:$0xff] %v5145_v6 }
 0x2c9   :  { %2099 = vmin.xlane.f32.xlu1 %v5160_v57 }
 0x2ca   :  { %2197 = vmin.xlane.f32.xlu0 %v5165_v54  ;;  %2127 = vmin.xlane.f32.xlu2 %v5167_v34  ;;  %v5189_v54 = vcvt.s32.f32 %v2138_v19  ;;  %v2208_v34 = vshra.s32 %v5202_v8, 16 }
 0x2cc   :  { %6198 = vst [vmem:[#allocation63_spill] sm:$0xff] %v5189_v54  ;;  %v5221_v63 = vcvt.s32.f32 %v2208_v34 }
 0x2cd   :  { %v5183_v42 = vpop.xlane.xlu2 %2001  ;;  %v1501_v57 = vpop.xlane.xlu0 %1500 }
 0x2ce   :  { %v1485_v4 = vpop.xlane.xlu1 %1484 }
 0x2cf   :  { %2878 = vlog2.f32 %v1485_v4  ;;  %v5192_v4 = vsel %vm1946_vm3, %v4530_v11, 2147483647 }
 0x2d0   :  { %2880 = vlog2.f32 %v1501_v57  ;;  %6199 = vst [vmem:[#allocation64_spill] sm:$0xff] %v5192_v4  ;;  %v2180_v19 = vshra.s32 %v5192_v4, 16  ;;  %v5219_v4 = vcvt.s32.f32 %v2278_v31 }
 0x2d1   :  { %2141 = vmin.xlane.f32.xlu1 %v5189_v54 }
 0x2d2   :  { %2239 = vmin.xlane.f32.xlu0 %v5194_v15  ;;  %2169 = vmin.xlane.f32.xlu2 %v5196_v9  ;;  %v5217_v14 = vcvt.s32.f32 %v2180_v19  ;;  %6202 = vst [vmem:[#allocation67_spill] sm:$0xff] %v5219_v4 }
 0x2d5   :  { %v2879_v17 = vpop.eup %2878  ;;  %v1517_v58 = vpop.xlane.xlu2 %1516 }
 0x2d6   :  { %v1549_v13 = vmul.f32 0.6931472, %v2879_v17  ;;  %v1533_v57 = vpop.xlane.xlu1 %1532  ;;  %v2881_v52 = vpop.eup %2880 }
 0x2d7   :  { %2882 = vlog2.f32 %v1533_v57  ;;  %v1565_v6 = vmul.f32 0.6931472, %v2881_v52  ;;  %v1519_v15 = vpop.xlane.xlu0 %1518 }
 0x2d8   :  { %v1612_v54 = vadd.f32 %v1549_v13, %v4790_v12  ;;  %2884 = vlog2.f32 %v1517_v58  ;;  %v5224_v12 = vsel %vm1949_vm4, %v4530_v11, 2147483647  ;;  %v5227_v13 = vsel %vm1952_vm13, %v4530_v11, 2147483647 }
 0x2d9   :  { %v1620_v57 = vadd.f32 %v1565_v6, %v4792_v26  ;;  %2886 = vlog2.f32 %v1519_v15  ;;  %6203 = vst [vmem:[#allocation68_spill] sm:$0xff] %v5227_v13  ;;  %2183 = vmin.xlane.f32.xlu1 %v5217_v14  ;;  %v2222_v15 = vshra.s32 %v5224_v12, 16 }
 0x2da   :  { %v1868_v17 = vsub.f32 %v1612_v54, %v4813_v59  ;;  %v1997_v59 = vand.u32 65535, %v4910_v7  ;;  %2281 = vmin.xlane.f32.xlu0 %v5219_v4  ;;  %2211 = vmin.xlane.f32.xlu2 %v5221_v63  ;;  %v6204_v7 = vld [vmem:[#allocation19_spill] sm:$0xff] }
 0x2db   :  { %v1876_v30 = vsub.f32 %v1620_v57, %v4834_v1  ;;  %v2264_v1 = vshra.s32 %v5227_v13, 16  ;;  %v6205_v57 = vld [vmem:[#allocation25_spill] sm:$0xff]  ;;  %v5251_v13 = vcvt.s32.f32 %v2222_v15 }
 0x2dc   :  { %1901 = vst.msk [vmem:[%s5992_s3] sm:$0xff] %vm1900_vm5, %v1868_v17  ;;  %vm2003_vm6 = vcmp.eq.f32.partialorder %v6205_v57, %v5183_v42  ;;  %v6207_v15 = vld [vmem:[#allocation21_spill] sm:$0xff] }
 0x2dd   :  { %v2883_v26 = vpop.eup %2882  ;;  %1909 = vst.msk [vmem:[%s5992_s3 + $0x40] sm:$0xff] %vm1900_vm5, %v1876_v30  ;;  %v1487_v31 = vpop.xlane.xlu2 %1486 }
 0x2de   :  { %v1597_v58 = vmul.f32 0.6931472, %v2883_v26  ;;  %v1503_v34 = vpop.xlane.xlu1 %1502  ;;  %v2885_v54 = vpop.eup %2884  ;;  %v1999_v26 = vcvt.s32.f32 %v1997_v59  ;;  %v6206_v59 = vld [vmem:[#allocation13_spill] sm:$0xff] }
 0x2df   :  { %2888 = vlog2.f32 %v1503_v34  ;;  %v2887_v6 = vpop.eup %2886  ;;  %v1581_v52 = vmul.f32 0.6931472, %v2885_v54  ;;  %v1489_v17 = vpop.xlane.xlu0 %1488  ;;  %v5257_v54 = vcvt.s32.f32 %v2264_v1 }
 0x2e0   :  { %v1636_v19 = vadd.f32 %v1597_v58, %v6204_v7  ;;  %v1583_v30 = vmul.f32 0.6931472, %v2887_v6  ;;  %2890 = vlog2.f32 %v1487_v31 }
 0x2e1   :  { %v1628_v34 = vadd.f32 %v1581_v52, %v4803_v27  ;;  %2892 = vlog2.f32 %v1489_v17  ;;  %2225 = vmin.xlane.f32.xlu1 %v5251_v13  ;;  %v2004_v27 = vsel %vm2003_vm6, %v1999_v26, inf }
 0x2e2   :  { %v1892_v4 = vsub.f32 %v1636_v19, %v5088_v39  ;;  %v1629_v58 = vadd.f32 %v1583_v30, %v4845_v33  ;;  %2005 = vmin.xlane.f32.xlu0 %v2004_v27  ;;  %2267 = vmin.xlane.f32.xlu2 %v5257_v54 }
 0x2e3   :  { %v1884_v6 = vsub.f32 %v1628_v34, %v6206_v59 }
 0x2e4   :  { %1925 = vst.msk [vmem:[%s5992_s3 + $0xc0] sm:$0xff] %vm1900_vm5, %v1892_v4  ;;  %v1885_v19 = vsub.f32 %v1629_v58, %v6207_v15  ;;  %v2250_v4 = vshra.s32 %v5254_v48, 16  ;;  %v6208_v58 = vld [vmem:[#allocation18_spill] sm:$0xff] }
 0x2e5   :  { %v2889_v39 = vpop.eup %2888  ;;  %1917 = vst.msk [vmem:[%s5992_s3 + $0x80] sm:$0xff] %vm1900_vm5, %v1884_v6  ;;  %v1535_v30 = vpop.xlane.xlu2 %1534 }
 0x2e6   :  { %v1567_v52 = vmul.f32 0.6931472, %v2889_v39  ;;  %v1521_v33 = vpop.xlane.xlu1 %1520  ;;  %v2891_v1 = vpop.eup %2890  ;;  %1918 = vst.msk [vmem:[%s5992_s3 + $0x88] sm:$0xff] %vm1900_vm5, %v1885_v19  ;;  %v5279_v27 = vcvt.s32.f32 %v2250_v4 }
 0x2e7   :  { %2894 = vlog2.f32 %v1521_v33  ;;  %v2893_v31 = vpop.eup %2892  ;;  %v1551_v57 = vmul.f32 0.6931472, %v2891_v1  ;;  %v1537_v26 = vpop.xlane.xlu0 %1536 }
 0x2e8   :  { %v1621_v17 = vadd.f32 %v1567_v52, %v4858_v29  ;;  %v1553_v34 = vmul.f32 0.6931472, %v2893_v31  ;;  %2896 = vlog2.f32 %v1535_v30  ;;  %v6209_v29 = vld [vmem:[#allocation17_spill] sm:$0xff]  ;;  %v6210_v52 = vld [vmem:[#allocation23_spill] sm:$0xff] }
 0x2e9   :  { %v1613_v6 = vadd.f32 %v1551_v57, %v4828_v50  ;;  %2898 = vlog2.f32 %v1537_v26  ;;  %2253 = vmin.xlane.f32.xlu1 %v5279_v27 }
 0x2ea   :  { %v1877_v59 = vsub.f32 %v1621_v17, %v6208_v58  ;;  %v1614_v39 = vadd.f32 %v1553_v34, %v4865_v46  ;;  %v6211_v58 = vld [vmem:[#allocation20_spill] sm:$0xff] }
 0x2eb   :  { %v1869_v15 = vsub.f32 %v1613_v6, %v6209_v29  ;;  %v6212_v6 = vld [vmem:[#allocation24_spill] sm:$0xff] }
 0x2ec   :  { %1910 = vst.msk [vmem:[%s5992_s3 + $0x48] sm:$0xff] %vm1900_vm5, %v1877_v59  ;;  %v1870_v33 = vsub.f32 %v1614_v39, %v6210_v52 }
 0x2ed   :  { %v2895_v19 = vpop.eup %2894  ;;  %1902 = vst.msk [vmem:[%s5992_s3 + $0x8] sm:$0xff] %vm1900_vm5, %v1869_v15  ;;  %v1505_v57 = vpop.xlane.xlu2 %1504 }
 0x2ee   :  { %v1585_v1 = vmul.f32 0.6931472, %v2895_v19  ;;  %v1491_v50 = vpop.xlane.xlu1 %1490  ;;  %v2897_v46 = vpop.eup %2896  ;;  %1903 = vst.msk [vmem:[%s5992_s3 + $0x10] sm:$0xff] %vm1900_vm5, %v1870_v33 }
 0x2ef   :  { %2900 = vlog2.f32 %v1491_v50  ;;  %v2899_v4 = vpop.eup %2898  ;;  %v1599_v17 = vmul.f32 0.6931472, %v2897_v46  ;;  %v1507_v30 = vpop.xlane.xlu0 %1506 }
 0x2f0   :  { %v1630_v31 = vadd.f32 %v1585_v1, %v4892_v24  ;;  %v1601_v26 = vmul.f32 0.6931472, %v2899_v4  ;;  %2902 = vlog2.f32 %v1505_v57  ;;  %v6213_v4 = vld [vmem:[#allocation26_spill] sm:$0xff] }
 0x2f1   :  { %v1637_v59 = vadd.f32 %v1599_v17, %v6211_v58  ;;  %2904 = vlog2.f32 %v1507_v30  ;;  %v6214_v30 = vld [vmem:[#allocation22_spill] sm:$0xff] }
 0x2f2   :  { %v1886_v34 = vsub.f32 %v1630_v31, %v5045_v21  ;;  %v1638_v39 = vadd.f32 %v1601_v26, %v6212_v6 }
 0x2f3   :  { %v1893_v29 = vsub.f32 %v1637_v59, %v5079_v10 }
 0x2f4   :  { %1919 = vst.msk [vmem:[%s5992_s3 + $0x90] sm:$0xff] %vm1900_vm5, %v1886_v34  ;;  %v1894_v15 = vsub.f32 %v1638_v39, %v5119_v16  ;;  %v6215_v34 = vld [vmem:[#allocation28_spill] sm:$0xff] }
 0x2f5   :  { %v2901_v24 = vpop.eup %2900  ;;  %1926 = vst.msk [vmem:[%s5992_s3 + $0xc8] sm:$0xff] %vm1900_vm5, %v1893_v29  ;;  %v1523_v50 = vpop.xlane.xlu2 %1522 }
 0x2f6   :  { %v1555_v19 = vmul.f32 0.6931472, %v2901_v24  ;;  %v1539_v21 = vpop.xlane.xlu1 %1538  ;;  %v2903_v52 = vpop.eup %2902  ;;  %1927 = vst.msk [vmem:[%s5992_s3 + $0xd0] sm:$0xff] %vm1900_vm5, %v1894_v15  ;;  %v6216_v24 = vld [vmem:[#allocation30_spill] sm:$0xff] }
 0x2f7   :  { %2906 = vlog2.f32 %v1539_v21  ;;  %v2905_v33 = vpop.eup %2904  ;;  %v1569_v1 = vmul.f32 0.6931472, %v2903_v52  ;;  %v1525_v16 = vpop.xlane.xlu0 %1524 }
 0x2f8   :  { %v1615_v10 = vadd.f32 %v1555_v19, %v4919_v53  ;;  %v1571_v46 = vmul.f32 0.6931472, %v2905_v33  ;;  %2908 = vlog2.f32 %v1523_v50 }
 0x2f9   :  { %v1622_v17 = vadd.f32 %v1569_v1, %v4875_v35  ;;  %2910 = vlog2.f32 %v1525_v16 }
 0x2fa   :  { %v1871_v31 = vsub.f32 %v1615_v10, %v6213_v4  ;;  %v1623_v57 = vadd.f32 %v1571_v46, %v4932_v51 }
 0x2fb   :  { %v1878_v26 = vsub.f32 %v1622_v17, %v6214_v30 }
 0x2fc   :  { %1904 = vst.msk [vmem:[%s5992_s3 + $0x18] sm:$0xff] %vm1900_vm5, %v1871_v31  ;;  %v1879_v59 = vsub.f32 %v1623_v57, %v6215_v34 }
 0x2fd   :  { %v2907_v53 = vpop.eup %2906  ;;  %1911 = vst.msk [vmem:[%s5992_s3 + $0x50] sm:$0xff] %vm1900_vm5, %v1878_v26  ;;  %v1493_v21 = vpop.xlane.xlu2 %1492  ;;  %v6217_v26 = vld [vmem:[#allocation29_spill] sm:$0xff] }
 0x2fe   :  { %v1603_v39 = vmul.f32 0.6931472, %v2907_v53  ;;  %v1509_v35 = vpop.xlane.xlu1 %1508  ;;  %v2909_v29 = vpop.eup %2908  ;;  %1912 = vst.msk [vmem:[%s5992_s3 + $0x58] sm:$0xff] %vm1900_vm5, %v1879_v59 }
 0x2ff   :  { %2912 = vlog2.f32 %v1509_v35  ;;  %v2911_v51 = vpop.eup %2910  ;;  %v1587_v19 = vmul.f32 0.6931472, %v2909_v29  ;;  %v1495_v52 = vpop.xlane.xlu0 %1494 }
 0x300   :  { %v1639_v15 = vadd.f32 %v1603_v39, %v6216_v24  ;;  %v1589_v33 = vmul.f32 0.6931472, %v2911_v51  ;;  %2914 = vlog2.f32 %v1493_v21  ;;  %v6218_v39 = vld [vmem:[#allocation27_spill] sm:$0xff] }
 0x301   :  { %v1631_v1 = vadd.f32 %v1587_v19, %v4921_v32  ;;  %2916 = vlog2.f32 %v1495_v52 }
 0x302   :  { %v1895_v10 = vsub.f32 %v1639_v15, %v5121_v36  ;;  %v1632_v50 = vadd.f32 %v1589_v33, %v4956_v41 }
 0x303   :  { %v1887_v16 = vsub.f32 %v1631_v1, %v5039_v5 }
 0x304   :  { %1928 = vst.msk [vmem:[%s5992_s3 + $0xd8] sm:$0xff] %vm1900_vm5, %v1895_v10  ;;  %v1888_v4 = vsub.f32 %v1632_v50, %v5059_v38  ;;  %v6219_v50 = vld [vmem:[#allocation33_spill] sm:$0xff] }
 0x305   :  { %v2913_v46 = vpop.eup %2912  ;;  %1920 = vst.msk [vmem:[%s5992_s3 + $0x98] sm:$0xff] %vm1900_vm5, %v1887_v16  ;;  %v1541_v57 = vpop.xlane.xlu2 %1540 }
 0x306   :  { %v1573_v31 = vmul.f32 0.6931472, %v2913_v46  ;;  %v2915_v32 = vpop.eup %2914  ;;  %1921 = vst.msk [vmem:[%s5992_s3 + $0xa0] sm:$0xff] %vm1900_vm5, %v1888_v4  ;;  %v1527_v41 = vpop.xlane.xlu1 %1526 }
 0x307   :  { %v2917_v36 = vpop.eup %2916  ;;  %v1557_v5 = vmul.f32 0.6931472, %v2915_v32  ;;  %2918 = vlog2.f32 %v1527_v41  ;;  %v1543_v38 = vpop.xlane.xlu0 %1542 }
 0x308   :  { %v1624_v17 = vadd.f32 %v1573_v31, %v4970_v62  ;;  %v1559_v30 = vmul.f32 0.6931472, %v2917_v36  ;;  %2920 = vlog2.f32 %v1541_v57 }
 0x309   :  { %v1616_v34 = vadd.f32 %v1557_v5, %v4936_v28  ;;  %2922 = vlog2.f32 %v1543_v38  ;;  %v6220_v38 = vld [vmem:[#allocation32_spill] sm:$0xff] }
 0x30a   :  { %v1880_v53 = vsub.f32 %v1624_v17, %v6217_v26  ;;  %v1617_v59 = vadd.f32 %v1559_v30, %v4968_v44 }
 0x30b   :  { %v1872_v62 = vsub.f32 %v1616_v34, %v6218_v39 }
 0x30c   :  { %1913 = vst.msk [vmem:[%s5992_s3 + $0x60] sm:$0xff] %vm1900_vm5, %v1880_v53  ;;  %v1873_v35 = vsub.f32 %v1617_v59, %v4982_v49  ;;  %v6221_v53 = vld [vmem:[#allocation31_spill] sm:$0xff] }
 0x30d   :  { %v2919_v29 = vpop.eup %2918  ;;  %1905 = vst.msk [vmem:[%s5992_s3 + $0x20] sm:$0xff] %vm1900_vm5, %v1872_v62  ;;  %v1511_v21 = vpop.xlane.xlu2 %1510 }
 0x30e   :  { %v2921_v51 = vpop.eup %2920  ;;  %1906 = vst.msk [vmem:[%s5992_s3 + $0x28] sm:$0xff] %vm1900_vm5, %v1873_v35  ;;  %v1591_v28 = vmul.f32 0.6931472, %v2919_v29  ;;  %v1497_v44 = vpop.xlane.xlu1 %1496  ;;  %v6222_v35 = vld [vmem:[#allocation34_spill] sm:$0xff] }
 0x30f   :  { %v2923_v15 = vpop.eup %2922  ;;  %v1605_v19 = vmul.f32 0.6931472, %v2921_v51  ;;  %2924 = vlog2.f32 %v1497_v44  ;;  %v1513_v52 = vpop.xlane.xlu0 %1512 }
 0x310   :  { %v1633_v49 = vadd.f32 %v1591_v28, %v4992_v3  ;;  %v1607_v33 = vmul.f32 0.6931472, %v2923_v15  ;;  %2926 = vlog2.f32 %v1511_v21 }
 0x311   :  { %v1640_v10 = vadd.f32 %v1605_v19, %v4960_v60  ;;  %2928 = vlog2.f32 %v1513_v52 }
 0x312   :  { %v1889_v1 = vsub.f32 %v1633_v49, %v5061_v40  ;;  %v1641_v16 = vadd.f32 %v1607_v33, %v6219_v50 }
 0x313   :  { %v1896_v46 = vsub.f32 %v1640_v10, %v5112_v47 }
 0x314   :  { %1922 = vst.msk [vmem:[%s5992_s3 + $0xa8] sm:$0xff] %vm1900_vm5, %v1889_v1  ;;  %v1897_v4 = vsub.f32 %v1641_v16, %v5152_v56 }
 0x315   :  { %v2925_v31 = vpop.eup %2924  ;;  %1929 = vst.msk [vmem:[%s5992_s3 + $0xe0] sm:$0xff] %vm1900_vm5, %v1896_v46  ;;  %v1529_v36 = vpop.xlane.xlu2 %1528  ;;  %v6223_v46 = vld [vmem:[#allocation35_spill] sm:$0xff] }
 0x316   :  { %v2927_v32 = vpop.eup %2926  ;;  %1930 = vst.msk [vmem:[%s5992_s3 + $0xe8] sm:$0xff] %vm1900_vm5, %v1897_v4  ;;  %v1561_v40 = vmul.f32 0.6931472, %v2925_v31  ;;  %2930 = vlog2.f32 %v1529_v36  ;;  %v2109_v31 = vand.u32 65535, %v5076_v20 }
 0x317   :  { %v2929_v47 = vpop.eup %2928  ;;  %v1575_v41 = vmul.f32 0.6931472, %v2927_v32  ;;  %v5387_v17 = vpop.xlane.xlu0 %2029 }
 0x318   :  { %v1618_v56 = vadd.f32 %v1561_v40, %v5004_v18  ;;  %v1577_v5 = vmul.f32 0.6931472, %v2929_v47 }
 0x319   :  { %v1625_v57 = vadd.f32 %v1575_v41, %v4972_v22 }
 0x31a   :  { %v1874_v30 = vsub.f32 %v1618_v56, %v6220_v38  ;;  %v1626_v26 = vadd.f32 %v1577_v5, %v5000_v55  ;;  %v2111_v56 = vcvt.s32.f32 %v2109_v31  ;;  %v6226_v38 = vld [vmem:[#allocation38_spill] sm:$0xff] }
 0x31b   :  { %v1881_v34 = vsub.f32 %v1625_v57, %v6221_v53  ;;  %v6225_v57 = vld [vmem:[#allocation46_spill] sm:$0xff]  ;;  %v6227_v53 = vld [vmem:[#allocation36_spill] sm:$0xff] }
 0x31c   :  { %1907 = vst.msk [vmem:[%s5992_s3 + $0x30] sm:$0xff] %vm1900_vm5, %v1874_v30  ;;  %v1882_v59 = vsub.f32 %v1626_v26, %v5014_v61  ;;  %v2931_v18 = vpop.eup %2930  ;;  %v1545_v22 = vpop.xlane.xlu1 %1544 }
 0x31d   :  { %1914 = vst.msk [vmem:[%s5992_s3 + $0x68] sm:$0xff] %vm1900_vm5, %v1881_v34  ;;  %v1593_v55 = vmul.f32 0.6931472, %v2931_v18  ;;  %2932 = vlog2.f32 %v1545_v22  ;;  %v1499_v39 = vpop.xlane.xlu2 %1498 }
 0x31e   :  { %1915 = vst.msk [vmem:[%s5992_s3 + $0x70] sm:$0xff] %vm1900_vm5, %v1882_v59  ;;  %2934 = vlog2.f32 %v1499_v39  ;;  %v6228_v59 = vld [vmem:[#allocation56_spill] sm:$0xff] }
 0x31f   :  { %v1531_v62 = vpop.xlane.xlu0 %1530  ;;  %v1634_v29 = vadd.f32 %v1593_v55, %v6222_v35 }
 0x320   :  { %2936 = vlog2.f32 %v1531_v62 }
 0x321   :  { %v1890_v61 = vsub.f32 %v1634_v29, %v5054_v37  ;;  %v6229_v29 = vld [vmem:[#allocation55_spill] sm:$0xff] }
 0x323   :  { %v2933_v51 = vpop.eup %2932  ;;  %1923 = vst.msk [vmem:[%s5992_s3 + $0xb0] sm:$0xff] %vm1900_vm5, %v1890_v61  ;;  %v2123_v61 = vand.u32 65535, %v6229_v29 }
 0x324   :  { %v2935_v28 = vpop.eup %2934  ;;  %v1609_v44 = vmul.f32 0.6931472, %v2933_v51  ;;  %v1515_v15 = vpop.xlane.xlu1 %1514  ;;  %v6230_v51 = vld [vmem:[#allocation37_spill] sm:$0xff] }
 0x325   :  { %v1563_v21 = vmul.f32 0.6931472, %v2935_v28  ;;  %2938 = vlog2.f32 %v1515_v15  ;;  %v1547_v52 = vpop.xlane.xlu2 %1546  ;;  %v2025_v28 = vand.u32 65535, %v6230_v51  ;;  %v6232_v15 = vld [vmem:[#allocation39_spill] sm:$0xff]  ;;  %v6242_v51 = vld [vmem:[#allocation57_spill] sm:$0xff] }
 0x326   :  { %v2937_v19 = vpop.eup %2936  ;;  %v1642_v33 = vadd.f32 %v1609_v44, %v5030_v23  ;;  %2940 = vlog2.f32 %v1547_v52  ;;  %v6231_v44 = vld [vmem:[#allocation14_spill] sm:$0xff]  ;;  %vm2031_vm11 = vcmp.eq.f32.partialorder %v6232_v15, %v5387_v17 }
 0x327   :  { %v5413_v49 = vpop.xlane.xlu0 %2071  ;;  %v1595_v10 = vmul.f32 0.6931472, %v2937_v19  ;;  %v1619_v37 = vadd.f32 %v1563_v21, %v5006_v45  ;;  %vm1956_vm10 = vcmp.eq.f32.partialorder %v6231_v44, %v5025_v2 }
 0x328   :  { %v1898_v1 = vsub.f32 %v1642_v33, %v5154_v25  ;;  %v6224_v25 = vld [vmem:[#allocation11_spill] sm:$0xff]  ;;  %v2125_v33 = vcvt.s32.f32 %v2123_v61 }
 0x329   :  { %v1635_v16 = vadd.f32 %v1595_v10, %v5025_v2  ;;  %v1875_v4 = vsub.f32 %v1619_v37, %v6223_v46  ;;  %vm1954_vm8 = vcmp.eq.f32.partialorder %v6224_v25, %v4992_v3  ;;  %v2027_v10 = vcvt.s32.f32 %v2025_v28  ;;  %v6233_v37 = vld [vmem:[#allocation60_spill] sm:$0xff]  ;;  %v6241_v61 = vld [vmem:[#allocation47_spill] sm:$0xff] }
 0x32a   :  { %1931 = vst.msk [vmem:[%s5992_s3 + $0xf0] sm:$0xff] %vm1900_vm5, %v1898_v1  ;;  %v5446_v3 = vsel %vm1954_vm8, %v4530_v11, 2147483647  ;;  %v5484_v1 = vsel %vm1956_vm10, %v4530_v11, 2147483647  ;;  %v6234_v2 = vld [vmem:[#allocation48_spill] sm:$0xff] }
 0x32b   :  { %v1891_v32 = vsub.f32 %v1635_v16, %v5086_v43  ;;  %v2939_v40 = vpop.eup %2938  ;;  %1908 = vst.msk [vmem:[%s5992_s3 + $0x38] sm:$0xff] %vm1900_vm5, %v1875_v4  ;;  %v2032_v46 = vsel %vm2031_vm11, %v2027_v10, inf  ;;  %v2151_v4 = vand.u32 65535, %v6234_v2  ;;  %v2320_v31 = vshra.s32 %v5484_v1, 16  ;;  %v6237_v25 = vld [vmem:[#allocation52_spill] sm:$0xff] }
 0x32c   :  { %v2941_v45 = vpop.eup %2940  ;;  %v1579_v20 = vmul.f32 0.6931472, %v2939_v40  ;;  %v5436_v47 = vpop.xlane.xlu1 %2015 }
 0x32d   :  { %1924 = vst.msk [vmem:[%s5992_s3 + $0xb8] sm:$0xff] %vm1900_vm5, %v1891_v32  ;;  %v1611_v41 = vmul.f32 0.6931472, %v2941_v45  ;;  %v5438_v43 = vpop.xlane.xlu2 %2043  ;;  %v6235_v32 = vld [vmem:[#allocation45_spill] sm:$0xff]  ;;  %v6236_v45 = vld [vmem:[#allocation8_spill] sm:$0xff] }
 0x32e   :  { %v1627_v5 = vadd.f32 %v1579_v20, %v5043_v0  ;;  %v2292_v0 = vshra.s32 %v5446_v3, 16  ;;  %v2053_v40 = vand.u32 65535, %v6235_v32  ;;  %vm1957_vm12 = vcmp.eq.f32.partialorder %v6236_v45, %v6204_v7  ;;  %v6244_v32 = vld [vmem:[#allocation40_spill] sm:$0xff] }
 0x32f   :  { %v5440_v36 = vpop.xlane.xlu0 %2113  ;;  %v1643_v30 = vadd.f32 %v1611_v41, %v6226_v38  ;;  %v6238_v41 = vld [vmem:[#allocation50_spill] sm:$0xff]  ;;  %vm2045_vm3 = vcmp.eq.f32.partialorder %v6241_v61, %v5438_v43  ;;  %v2008_v45 = vcvt.f32.s32 %v5183_v42 }
 0x330   :  { %vm2115_vm9 = vcmp.eq.f32.partialorder %v6225_v57, %v5440_v36  ;;  %v1883_v34 = vsub.f32 %v1627_v5, %v6227_v53  ;;  %v5466_v62 = vcvt.s32.f32 %v2292_v0  ;;  %v2153_v5 = vcvt.s32.f32 %v2151_v4  ;;  %v6243_v4 = vld [vmem:[#allocation61_spill] sm:$0xff] }
 0x331   :  { %v2116_v26 = vsel %vm2115_vm9, %v2111_v56, inf  ;;  %v1899_v18 = vsub.f32 %v1643_v30, %v6228_v59  ;;  %v5499_v57 = vcvt.s32.f32 %v2320_v31  ;;  %v2055_v30 = vcvt.s32.f32 %v2053_v40 }
 0x332   :  { %2117 = vmin.xlane.f32.xlu1 %v2116_v26  ;;  %1916 = vst.msk [vmem:[%s5992_s3 + $0x78] sm:$0xff] %vm1900_vm5, %v1883_v34  ;;  %v5502_v53 = vsel %vm1957_vm12, %v4530_v11, 2147483647  ;;  %v6239_v34 = vld [vmem:[#allocation43_spill] sm:$0xff]  ;;  %v2165_v31 = vand.u32 65535, %v6243_v4  ;;  %v2067_v40 = vand.u32 65535, %v6244_v32 }
 0x333   :  { %1932 = vst.msk [vmem:[%s5992_s3 + $0xf8] sm:$0xff] %vm1900_vm5, %v1899_v18  ;;  %v2039_v59 = vand.u32 65535, %v6239_v34  ;;  %v6240_v18 = vld [vmem:[#allocation51_spill] sm:$0xff]  ;;  %v2334_v29 = vshra.s32 %v5502_v53, 16  ;;  %v3034_v4 = vmov 0.0   ;;  %v6250_v32 = vld [vmem:[#allocation6_spill] sm:$0xff] }
 0x334   :  { %v5460_v22 = vpop.xlane.xlu1 %2057  ;;  %v2095_v0 = vand.u32 65535, %v6240_v18  ;;  %v2069_v34 = vcvt.s32.f32 %v2067_v40  ;;  %vm1960_vm9 = vcmp.eq.f32.partialorder %v6250_v32, %v6216_v24  ;;  %v6251_v40 = vld [vmem:[#allocation59_spill] sm:$0xff]  ;;  %v6252_v24 = vld [vmem:[#allocation58_spill] sm:$0xff]  ;;  %v2207_v32 = vand.u32 65535, %v5202_v8 }
 0x335   :  { %v5462_v55 = vpop.xlane.xlu2 %2085  ;;  %vm2059_vm2 = vcmp.eq.f32.partialorder %v6238_v41, %v5460_v22  ;;  %v2041_v15 = vcvt.s32.f32 %v2039_v59  ;;  %v5518_v10 = vcvt.s32.f32 %v2334_v29  ;;  %v6246_v41 = vld [vmem:[#allocation41_spill] sm:$0xff]  ;;  %v2009_v59 = vshll.u32 %v2008_v45, 16 }
 0x336   :  { %v5505_v7 = vsel %vm2059_vm2, %v2055_v30, inf  ;;  %vm2073_vm4 = vcmp.eq.f32.partialorder %v6246_v41, %v5413_v49 }
 0x337   :  { %v5464_v39 = vpop.xlane.xlu0 %2155  ;;  %v2074_v29 = vsel %vm2073_vm4, %v2069_v34, inf  ;;  %v2137_v34 = vand.u32 65535, %v6252_v24 }
 0x338   :  { %vm2157_vm15 = vcmp.eq.f32.partialorder %v6237_v25, %v5464_v39  ;;  %v6245_v25 = vld [vmem:[#allocation5_spill] sm:$0xff] }
 0x339   :  { %v2158_v26 = vsel %vm2157_vm15, %v2153_v5, inf  ;;  %vm1959_vm1 = vcmp.eq.f32.partialorder %v6245_v25, %v6212_v6 }
 0x33a   :  { %2295 = vmin.xlane.f32.xlu1 %v5466_v62  ;;  %v5540_v6 = vsel %vm1959_vm1, %v4530_v11, 2147483647 }
 0x33c   :  { %v5475_v19 = vpop.xlane.xlu1 %2099 }
 0x33d   :  { %v5477_v21 = vpop.xlane.xlu2 %2127  ;;  %vm2101_vm14 = vcmp.eq.f32.partialorder %v6242_v51, %v5475_v19 }
 0x33e   :  { %vm2129_vm0 = vcmp.eq.f32.partialorder %v6233_v37, %v5477_v21  ;;  %v2046_v37 = vsel %vm2045_vm3, %v2041_v15, inf  ;;  %v6248_v15 = vld [vmem:[#allocation54_spill] sm:$0xff] }
 0x33f   :  { %v5479_v52 = vpop.xlane.xlu0 %2197  ;;  %v2130_v16 = vsel %vm2129_vm0, %v2125_v33, inf  ;;  %v2097_v33 = vcvt.s32.f32 %v2095_v0 }
 0x340   :  { %2131 = vmin.xlane.f32.xlu0 %v2130_v16  ;;  %vm2199_vm10 = vcmp.eq.f32.partialorder %v6251_v40, %v5479_v52 }
 0x341   :  { %v5520_v16 = vsel %vm2101_vm14, %v2097_v33, inf  ;;  %v2193_v33 = vand.u32 65535, %v6248_v15 }
 0x342   :  { %2033 = vmin.xlane.f32.xlu1 %v2032_v46  ;;  %v2221_v46 = vand.u32 65535, %v5224_v12 }
 0x343   :  { %v2195_v25 = vcvt.s32.f32 %v2193_v33 }
 0x344   :  { %v5493_v20 = vpop.xlane.xlu1 %2141  ;;  %v2223_v12 = vcvt.s32.f32 %v2221_v46  ;;  %v6249_v46 = vld [vmem:[#allocation44_spill] sm:$0xff] }
 0x345   :  { %v5524_v2 = vpop.xlane.xlu2 %2169  ;;  %vm2017_vm8 = vcmp.eq.f32.partialorder %v6249_v46, %v5436_v47 }
 0x346   :  { %vm2171_vm13 = vcmp.eq.f32.partialorder %v5196_v9, %v5524_v2  ;;  %v6247_v9 = vld [vmem:[#allocation42_spill] sm:$0xff] }
 0x347   :  { %v5497_v56 = vpop.xlane.xlu0 %2239  ;;  %v2011_v51 = vand.u32 65535, %v6247_v9  ;;  %v6257_v9 = vld [vmem:[#allocation53_spill] sm:$0xff] }
 0x348   :  { %2323 = vmin.xlane.f32.xlu0 %v5499_v57  ;;  %vm2087_vm15 = vcmp.eq.f32.partialorder %v6257_v9, %v5462_v55 }
 0x349   :  { %v2013_v45 = vcvt.s32.f32 %v2011_v51  ;;  %v2139_v51 = vcvt.s32.f32 %v2137_v34 }
 0x34a   :  { %2159 = vmin.xlane.f32.xlu1 %v2158_v26  ;;  %v2167_v26 = vcvt.s32.f32 %v2165_v31 }
 0x34b   :  { %v2018_v41 = vsel %vm2017_vm8, %v2013_v45, inf  ;;  %v6258_v45 = vld [vmem:[#allocation10_spill] sm:$0xff] }
 0x34c   :  { %v5514_v28 = vpop.xlane.xlu1 %2183  ;;  %v2172_v0 = vsel %vm2171_vm13, %v2167_v26, inf  ;;  %v2200_v26 = vsel %vm2199_vm10, %v2195_v25, inf  ;;  %vm1962_vm2 = vcmp.eq.f32.partialorder %v6258_v45, %v6219_v50  ;;  %v2249_v50 = vand.u32 65535, %v5254_v48  ;;  %v6261_v48 = vld [vmem:[#allocation7_spill] sm:$0xff] }
 0x34d   :  { %v5599_v24 = vsel %vm1962_vm2, %v4530_v11, 2147483647  ;;  %vm1958_vm1 = vcmp.eq.f32.partialorder %v6261_v48, %v6211_v58  ;;  %vm2185_vm4 = vcmp.eq.f32.partialorder %v5217_v14, %v5514_v28  ;;  %v6264_v58 = vld [vmem:[#allocation67_spill] sm:$0xff] }
 0x34f   :  { %v5516_v44 = vpop.xlane.xlu0 %2281 }
 0x350   :  { %2047 = vmin.xlane.f32.xlu0 %v2046_v37  ;;  %v2362_v37 = vshra.s32 %v5540_v6, 16 }
 0x352   :  { %2337 = vmin.xlane.f32.xlu1 %v5518_v10 }
 0x354   :  { %v5535_v5 = vpop.xlane.xlu1 %2225 }
 0x355   :  { %vm2227_vm7 = vcmp.eq.f32.partialorder %v5251_v13, %v5535_v5  ;;  %v2972_v13 = vld [vmem:[%s5991_s2] sm:$0xff] }
 0x356   :  { %v2228_v18 = vsel %vm2227_vm7, %v2223_v12, inf  ;;  %v5559_v12 = vcvt.s32.f32 %v2362_v37  ;;  %vm2283_vm7 = vcmp.eq.f32.partialorder %v6264_v58, %v5516_v44  ;;  %v2134_v58 = vcvt.f32.s32 %v5477_v21 }
 0x357   :  { %v2006_v30 = vpop.xlane.xlu0 %2005  ;;  %2229 = vmin.xlane.f32.xlu2 %v2228_v18 }
 0x358   :  { %v2007_v42 = vcvt.f32.s32 %v2006_v30  ;;  %2173 = vmin.xlane.f32.xlu0 %v2172_v0  ;;  %v5562_v30 = vsel %vm1960_vm9, %v4530_v11, 2147483647  ;;  %v6254_v0 = vld [vmem:[#allocation12_spill] sm:$0xff] }
 0x359   :  { %v2376_v18 = vshra.s32 %v5562_v30, 16  ;;  %vm1955_vm11 = vcmp.eq.f32.partialorder %v6254_v0, %v6222_v35  ;;  %v6259_v0 = vld [vmem:[#allocation64_spill] sm:$0xff] }
 0x35a   :  { %v2010_v61 = vadd.s32 %v2009_v59, %v2007_v42  ;;  %2075 = vmin.xlane.f32.xlu1 %v2074_v29  ;;  %v6253_v59 = vld [vmem:[#allocation49_spill] sm:$0xff]  ;;  %v6255_v29 = vld [vmem:[#allocation63_spill] sm:$0xff]  ;;  %v5577_v33 = vsel %vm1955_vm11, %v4530_v11, 2147483647 }
 0x35b   :  { %v2081_v42 = vand.u32 65535, %v6253_v59  ;;  %vm2143_vm0 = vcmp.eq.f32.partialorder %v6255_v29, %v5493_v20  ;;  %v5579_v37 = vcvt.s32.f32 %v2376_v18  ;;  %v2251_v59 = vcvt.s32.f32 %v2249_v50 }
 0x35c   :  { %vm2445_vm6 = vcmp.eq.s32.totalorder %v2010_v61, %v2972_v13  ;;  %v6256_v61 = vld [vmem:[#allocation15_spill] sm:$0xff]  ;;  %v2144_v13 = vsel %vm2143_vm0, %v2139_v51, inf  ;;  %v5603_v8 = vpop.xlane.xlu1 %2253  ;;  %v2179_v29 = vand.u32 65535, %v6259_v0 }
 0x35d   :  { %v2614_v31 = vsel %vm2445_vm6, 1.0, %v3034_v4  ;;  %vm1963_vm12 = vcmp.eq.f32.partialorder %v6256_v61, %v5030_v23  ;;  %v2083_v15 = vcvt.s32.f32 %v2081_v42  ;;  %v5585_v23 = vpop.xlane.xlu2 %2211  ;;  %vm2255_vm14 = vcmp.eq.f32.partialorder %v5279_v27, %v5603_v8  ;;  %v6260_v61 = vld [vmem:[#allocation62_spill] sm:$0xff]  ;;  %v6262_v27 = vld [vmem:[#allocation65_spill] sm:$0xff] }
 0x35e   :  { %2541 = vst.msk [vmem:[%s5993_s4] sm:$0xff] %vm1900_vm5, %v2614_v31  ;;  %v5582_v46 = vsel %vm1963_vm12, %v4530_v11, 2147483647  ;;  %v2306_v31 = vshra.s32 %v5577_v33, 16  ;;  %vm2213_vm3 = vcmp.eq.f32.partialorder %v5221_v63, %v5585_v23  ;;  %v2404_v63 = vshra.s32 %v5599_v24, 16 }
 0x35f   :  { %2019 = vmin.xlane.f32.xlu2 %v2018_v41  ;;  %v2088_v35 = vsel %vm2087_vm15, %v2083_v15, inf  ;;  %v2418_v40 = vshra.s32 %v5582_v46, 16  ;;  %v2209_v41 = vcvt.s32.f32 %v2207_v32  ;;  %v2256_v18 = vsel %vm2255_vm14, %v2251_v59, inf  ;;  %v6263_v32 = vld [vmem:[#allocation66_spill] sm:$0xff]  ;;  %v6266_v59 = vld [vmem:[#allocation16_spill] sm:$0xff] }
 0x360   :  { %2365 = vmin.xlane.f32.xlu0 %v5559_v12  ;;  %v5594_v25 = vcvt.s32.f32 %v2306_v31  ;;  %v5609_v42 = vcvt.s32.f32 %v2404_v63  ;;  %v2235_v9 = vand.u32 65535, %v6260_v61  ;;  %vm2241_vm13 = vcmp.eq.f32.partialorder %v6262_v27, %v5497_v56 }
 0x361   :  { %v2214_v34 = vsel %vm2213_vm3, %v2209_v41, inf  ;;  %v2181_v51 = vcvt.s32.f32 %v2179_v29  ;;  %vm1964_vm8 = vcmp.eq.f32.partialorder %v6266_v59, %v6226_v38 }
 0x362   :  { %2201 = vmin.xlane.f32.xlu1 %v2200_v26  ;;  %v5596_v26 = vcvt.s32.f32 %v2418_v40  ;;  %v2237_v15 = vcvt.s32.f32 %v2235_v9  ;;  %v2277_v40 = vand.u32 65535, %v6263_v32  ;;  %v5643_v0 = vsel %vm1964_vm8, %v4530_v11, 2147483647  ;;  %v6267_v9 = vld [vmem:[#allocation68_spill] sm:$0xff] }
 0x363   :  { %v2432_v29 = vshra.s32 %v5643_v0, 16  ;;  %v2263_v48 = vand.u32 65535, %v6267_v9 }
 0x364   :  { %v2279_v45 = vcvt.s32.f32 %v2277_v40 }
 0x365   :  { %v5651_v61 = vpop.xlane.xlu2 %2267 }
 0x366   :  { %v2284_v41 = vsel %vm2283_vm7, %v2279_v45, inf  ;;  %vm2269_vm9 = vcmp.eq.f32.partialorder %v5257_v54, %v5651_v61 }
 0x367   :  { %2145 = vmin.xlane.f32.xlu2 %v2144_v13  ;;  %v2186_v13 = vsel %vm2185_vm4, %v2181_v51, inf  ;;  %v2265_v51 = vcvt.s32.f32 %v2263_v48  ;;  %v2319_v48 = vand.u32 65535, %v5484_v1 }
 0x368   :  { %2089 = vmin.xlane.f32.xlu0 %v2088_v35  ;;  %v2242_v35 = vsel %vm2241_vm13, %v2237_v15, inf }
 0x36a   :  { %2379 = vmin.xlane.f32.xlu1 %v5579_v37 }
 0x36f   :  { %2309 = vmin.xlane.f32.xlu2 %v5594_v25 }
 0x370   :  { %2215 = vmin.xlane.f32.xlu0 %v2214_v34  ;;  %v6265_v34 = vld [vmem:[#allocation9_spill] sm:$0xff] }
 0x371   :  { %vm1961_vm6 = vcmp.eq.f32.partialorder %v6265_v34, %v4960_v60  ;;  %v5647_v60 = vcvt.s32.f32 %v2432_v29 }
 0x372   :  { %2421 = vmin.xlane.f32.xlu1 %v5596_v26  ;;  %v5634_v50 = vsel %vm1961_vm6, %v4530_v11, 2147483647 }
 0x373   :  { %v2390_v63 = vshra.s32 %v5634_v50, 16 }
 0x377   :  { %2061 = vmin.xlane.f32.xlu2 %v5505_v7  ;;  %v5622_v7 = vsel %vm1958_vm1, %v4530_v11, 2147483647 }
 0x378   :  { %2407 = vmin.xlane.f32.xlu0 %v5609_v42  ;;  %v2348_v31 = vshra.s32 %v5622_v7, 16 }
 0x37a   :  { %2257 = vmin.xlane.f32.xlu1 %v2256_v18  ;;  %v5628_v14 = vcvt.s32.f32 %v2348_v31  ;;  %v5640_v18 = vcvt.s32.f32 %v2390_v63  ;;  %v2135_v63 = vshll.u32 %v2134_v58, 16 }
 0x37f   :  { %2187 = vmin.xlane.f32.xlu2 %v2186_v13  ;;  %v2270_v13 = vsel %vm2269_vm9, %v2265_v51, inf }
 0x380   :  { %2243 = vmin.xlane.f32.xlu0 %v2242_v35  ;;  %v2291_v35 = vand.u32 65535, %v5446_v3  ;;  %v2036_v3 = vcvt.f32.s32 %v5387_v17  ;;  %v2975_v17 = vld [vmem:[%s5991_s2 + $0x48] sm:$0xff] }
 0x382   :  { %v2293_v32 = vcvt.s32.f32 %v2291_v35  ;;  %v2037_v34 = vshll.u32 %v2036_v3, 16 }
 0x387   :  { %2351 = vmin.xlane.f32.xlu2 %v5628_v14 }
 0x388   :  { %2285 = vmin.xlane.f32.xlu0 %v2284_v41 }
 0x38f   :  { %2103 = vmin.xlane.f32.xlu2 %v5520_v16  ;;  %v2120_v16 = vcvt.f32.s32 %v5440_v36  ;;  %v2973_v36 = vld [vmem:[%s5991_s2 + $0x40] sm:$0xff] }
 0x391   :  { %v2121_v11 = vshll.u32 %v2120_v16, 16 }
 0x397   :  { %2393 = vmin.xlane.f32.xlu2 %v5640_v18 }
 0x39f   :  { %2435 = vmin.xlane.f32.xlu2 %v5647_v60 }
 0x3a5   :  { %v2118_v38 = vpop.xlane.xlu1 %2117 }
 0x3a6   :  { %v2119_v27 = vcvt.f32.s32 %v2118_v38  ;;  %v2162_v38 = vcvt.f32.s32 %v5464_v39 }
 0x3a7   :  { %2271 = vmin.xlane.f32.xlu2 %v2270_v13 }
 0x3a8   :  { %v2122_v15 = vadd.s32 %v2121_v11, %v2119_v27  ;;  %v2321_v27 = vcvt.s32.f32 %v2319_v48  ;;  %v2163_v51 = vshll.u32 %v2162_v38, 16 }
 0x3aa   :  { %vm2453_vm10 = vcmp.eq.s32.totalorder %v2122_v15, %v2973_v36  ;;  %v2333_v36 = vand.u32 65535, %v5502_v53 }
 0x3ab   :  { %v2622_v31 = vsel %vm2453_vm10, 1.0, %v3034_v4 }
 0x3ac   :  { %2549 = vst.msk [vmem:[%s5993_s4 + $0x40] sm:$0xff] %vm1900_vm5, %v2622_v31  ;;  %v2050_v31 = vcvt.f32.s32 %v5438_v43  ;;  %v2335_v58 = vcvt.s32.f32 %v2333_v36  ;;  %v2979_v36 = vld [vmem:[%s5991_s2 + $0x28] sm:$0xff] }
 0x3ad   :  { %v5665_v54 = vpop.xlane.xlu1 %2295 }
 0x3ae   :  { %vm2297_vm11 = vcmp.eq.f32.partialorder %v5466_v62, %v5665_v54  ;;  %v2974_v62 = vld [vmem:[%s5991_s2 + $0x10] sm:$0xff] }
 0x3af   :  { %v2298_v40 = vsel %vm2297_vm11, %v2293_v32, inf  ;;  %v2976_v32 = vld [vmem:[%s5991_s2 + $0x58] sm:$0xff] }
 0x3b0   :  { %2299 = vmin.xlane.f32.xlu1 %v2298_v40 }
 0x3b3   :  { %v2132_v41 = vpop.xlane.xlu0 %2131 }
 0x3b4   :  { %v2133_v29 = vcvt.f32.s32 %v2132_v41 }
 0x3b5   :  { %v2034_v45 = vpop.xlane.xlu1 %2033 }
 0x3b6   :  { %v2035_v59 = vcvt.f32.s32 %v2034_v45  ;;  %v2136_v9 = vadd.s32 %v2135_v63, %v2133_v29  ;;  %v2051_v45 = vshll.u32 %v2050_v31, 16  ;;  %v2078_v63 = vcvt.f32.s32 %v5413_v49  ;;  %v2977_v29 = vld [vmem:[%s5991_s2 + $0x18] sm:$0xff] }
 0x3b8   :  { %v2038_v16 = vadd.s32 %v2037_v34, %v2035_v59  ;;  %vm2454_vm12 = vcmp.eq.s32.totalorder %v2136_v9, %v2975_v17  ;;  %v2232_v34 = vcvt.f32.s32 %v5535_v5  ;;  %v2176_v59 = vcvt.f32.s32 %v5524_v2 }
 0x3b9   :  { %v2623_v11 = vsel %vm2454_vm12, 1.0, %v3034_v4  ;;  %v2079_v49 = vshll.u32 %v2078_v63, 16 }
 0x3ba   :  { %vm2447_vm0 = vcmp.eq.s32.totalorder %v2038_v16, %v2974_v62  ;;  %2550 = vst.msk [vmem:[%s5993_s4 + $0x48] sm:$0xff] %vm1900_vm5, %v2623_v11  ;;  %v2233_v9 = vshll.u32 %v2232_v34, 16  ;;  %v2177_v62 = vshll.u32 %v2176_v59, 16  ;;  %v2148_v59 = vcvt.f32.s32 %v5493_v20 }
 0x3bb   :  { %v2616_v21 = vsel %vm2447_vm0, 1.0, %v3034_v4  ;;  %v5689_v1 = vpop.xlane.xlu0 %2323 }
 0x3bc   :  { %2543 = vst.msk [vmem:[%s5993_s4 + $0x10] sm:$0xff] %vm1900_vm5, %v2616_v21  ;;  %vm2325_vm15 = vcmp.eq.f32.partialorder %v5499_v57, %v5689_v1 }
 0x3bd   :  { %v2160_v39 = vpop.xlane.xlu1 %2159  ;;  %v2326_v13 = vsel %vm2325_vm15, %v2321_v27, inf  ;;  %v2022_v27 = vcvt.f32.s32 %v5436_v47  ;;  %v2980_v47 = vld [vmem:[%s5991_s2 + $0x60] sm:$0xff] }
 0x3be   :  { %v2161_v15 = vcvt.f32.s32 %v2160_v39  ;;  %2327 = vmin.xlane.f32.xlu0 %v2326_v13  ;;  %v2204_v13 = vcvt.f32.s32 %v5479_v52 }
 0x3c0   :  { %v2164_v35 = vadd.s32 %v2163_v51, %v2161_v15  ;;  %v2978_v51 = vld [vmem:[%s5991_s2 + $0x80] sm:$0xff]  ;;  %v2361_v15 = vand.u32 65535, %v5540_v6 }
 0x3c2   :  { %vm2456_vm2 = vcmp.eq.s32.totalorder %v2164_v35, %v2976_v32  ;;  %v2023_v32 = vshll.u32 %v2022_v27, 16  ;;  %v2983_v27 = vld [vmem:[%s5991_s2 + $0x50] sm:$0xff] }
 0x3c3   :  { %v2625_v40 = vsel %vm2456_vm2, 1.0, %v3034_v4  ;;  %v2048_v3 = vpop.xlane.xlu0 %2047 }
 0x3c4   :  { %2552 = vst.msk [vmem:[%s5993_s4 + $0x58] sm:$0xff] %vm1900_vm5, %v2625_v40  ;;  %v2049_v43 = vcvt.f32.s32 %v2048_v3 }
 0x3c5   :  { %v5703_v57 = vpop.xlane.xlu1 %2337 }
 0x3c6   :  { %vm2339_vm3 = vcmp.eq.f32.partialorder %v5518_v10, %v5703_v57  ;;  %v2052_v41 = vadd.s32 %v2051_v45, %v2049_v43  ;;  %v2363_v45 = vcvt.s32.f32 %v2361_v15  ;;  %v2205_v43 = vshll.u32 %v2204_v13, 16 }
 0x3c7   :  { %v2340_v53 = vsel %vm2339_vm3, %v2335_v58, inf  ;;  %v2218_v15 = vcvt.f32.s32 %v5585_v23 }
 0x3c8   :  { %2341 = vmin.xlane.f32.xlu1 %v2340_v53  ;;  %vm2448_vm14 = vcmp.eq.s32.totalorder %v2052_v41, %v2977_v29  ;;  %v2981_v29 = vld [vmem:[%s5991_s2 + $0x8] sm:$0xff] }
 0x3c9   :  { %v2617_v16 = vsel %vm2448_vm14, 1.0, %v3034_v4 }
 0x3ca   :  { %2544 = vst.msk [vmem:[%s5993_s4 + $0x18] sm:$0xff] %vm1900_vm5, %v2617_v16  ;;  %v2230_v10 = vpop.xlane.xlu2 %2229  ;;  %v2375_v16 = vand.u32 65535, %v5562_v30  ;;  %v2149_v30 = vshll.u32 %v2148_v59, 16 }
 0x3cb   :  { %v2231_v48 = vcvt.f32.s32 %v2230_v10  ;;  %v2174_v38 = vpop.xlane.xlu0 %2173  ;;  %v2092_v10 = vcvt.f32.s32 %v5462_v55 }
 0x3cc   :  { %v2175_v17 = vcvt.f32.s32 %v2174_v38 }
 0x3cd   :  { %v2076_v5 = vpop.xlane.xlu1 %2075  ;;  %v2234_v21 = vadd.s32 %v2233_v9, %v2231_v48 }
 0x3ce   :  { %v2077_v2 = vcvt.f32.s32 %v2076_v5  ;;  %v2178_v39 = vadd.s32 %v2177_v62, %v2175_v17  ;;  %v2093_v62 = vshll.u32 %v2092_v10, 16 }
 0x3cf   :  { %vm2461_vm1 = vcmp.eq.s32.totalorder %v2234_v21, %v2978_v51  ;;  %v2417_v51 = vand.u32 65535, %v5582_v46 }
 0x3d0   :  { %v2080_v11 = vadd.s32 %v2079_v49, %v2077_v2  ;;  %v2630_v35 = vsel %vm2461_vm1, 1.0, %v3034_v4  ;;  %vm2457_vm13 = vcmp.eq.s32.totalorder %v2178_v39, %v2980_v47  ;;  %v2377_v49 = vcvt.s32.f32 %v2375_v16 }
 0x3d1   :  { %2557 = vst.msk [vmem:[%s5993_s4 + $0x80] sm:$0xff] %vm1900_vm5, %v2630_v35  ;;  %v2626_v52 = vsel %vm2457_vm13, 1.0, %v3034_v4  ;;  %v2305_v39 = vand.u32 65535, %v5577_v33  ;;  %v2419_v47 = vcvt.s32.f32 %v2417_v51  ;;  %v2989_v51 = vld [vmem:[%s5991_s2 + $0x88] sm:$0xff] }
 0x3d2   :  { %vm2450_vm4 = vcmp.eq.s32.totalorder %v2080_v11, %v2979_v36  ;;  %v2020_v31 = vpop.xlane.xlu2 %2019  ;;  %2553 = vst.msk [vmem:[%s5993_s4 + $0x60] sm:$0xff] %vm1900_vm5, %v2626_v52 }
 0x3d3   :  { %v2619_v6 = vsel %vm2450_vm4, 1.0, %v3034_v4  ;;  %v2021_v40 = vcvt.f32.s32 %v2020_v31  ;;  %v5745_v58 = vpop.xlane.xlu0 %2365  ;;  %v2307_v23 = vcvt.s32.f32 %v2305_v39  ;;  %v2288_v39 = vcvt.f32.s32 %v5516_v44 }
 0x3d4   :  { %2546 = vst.msk [vmem:[%s5993_s4 + $0x28] sm:$0xff] %vm1900_vm5, %v2619_v6  ;;  %vm2367_vm7 = vcmp.eq.f32.partialorder %v5559_v12, %v5745_v58  ;;  %v2982_v12 = vld [vmem:[%s5991_s2 + $0x70] sm:$0xff]  ;;  %v2219_v6 = vshll.u32 %v2218_v15, 16 }
 0x3d5   :  { %v2202_v3 = vpop.xlane.xlu1 %2201  ;;  %v2024_v41 = vadd.s32 %v2023_v32, %v2021_v40  ;;  %v2368_v34 = vsel %vm2367_vm7, %v2363_v45, inf  ;;  %v2403_v45 = vand.u32 65535, %v5599_v24 }
 0x3d6   :  { %v2203_v53 = vcvt.f32.s32 %v2202_v3  ;;  %2369 = vmin.xlane.f32.xlu0 %v2368_v34  ;;  %v2064_v3 = vcvt.f32.s32 %v5460_v22 }
 0x3d7   :  { %vm2446_vm6 = vcmp.eq.s32.totalorder %v2024_v41, %v2981_v29  ;;  %v2405_v24 = vcvt.s32.f32 %v2403_v45 }
 0x3d8   :  { %v2206_v63 = vadd.s32 %v2205_v43, %v2203_v53  ;;  %v2615_v9 = vsel %vm2446_vm6, 1.0, %v3034_v4  ;;  %v2985_v43 = vld [vmem:[%s5991_s2 + $0x78] sm:$0xff]  ;;  %v2065_v41 = vshll.u32 %v2064_v3, 16  ;;  %v2389_v3 = vand.u32 65535, %v5634_v50 }
 0x3d9   :  { %2542 = vst.msk [vmem:[%s5993_s4 + $0x8] sm:$0xff] %vm1900_vm5, %v2615_v9  ;;  %v2190_v9 = vcvt.f32.s32 %v5514_v28  ;;  %v2431_v50 = vand.u32 65535, %v5643_v0  ;;  %v2992_v0 = vld [vmem:[%s5991_s2 + $0x98] sm:$0xff] }
 0x3da   :  { %vm2459_vm8 = vcmp.eq.s32.totalorder %v2206_v63, %v2982_v12  ;;  %v2146_v55 = vpop.xlane.xlu2 %2145  ;;  %v2986_v12 = vld [vmem:[%s5991_s2 + $0x20] sm:$0xff] }
 0x3db   :  { %v2628_v20 = vsel %vm2459_vm8, 1.0, %v3034_v4  ;;  %v2147_v48 = vcvt.f32.s32 %v2146_v55  ;;  %v2090_v38 = vpop.xlane.xlu0 %2089 }
 0x3dc   :  { %2555 = vst.msk [vmem:[%s5993_s4 + $0x70] sm:$0xff] %vm1900_vm5, %v2628_v20  ;;  %v2091_v2 = vcvt.f32.s32 %v2090_v38  ;;  %v2246_v20 = vcvt.f32.s32 %v5497_v56 }
 0x3dd   :  { %v5768_v5 = vpop.xlane.xlu1 %2379  ;;  %v2150_v17 = vadd.s32 %v2149_v30, %v2147_v48  ;;  %v2987_v30 = vld [vmem:[%s5991_s2 + $0x90] sm:$0xff] }
 0x3de   :  { %vm2381_vm9 = vcmp.eq.f32.partialorder %v5579_v37, %v5768_v5  ;;  %v2094_v11 = vadd.s32 %v2093_v62, %v2091_v2  ;;  %v2984_v37 = vld [vmem:[%s5991_s2 + $0x30] sm:$0xff] }
 0x3df   :  { %v2382_v21 = vsel %vm2381_vm9, %v2377_v49, inf  ;;  %vm2455_vm10 = vcmp.eq.s32.totalorder %v2150_v17, %v2983_v27  ;;  %v2247_v49 = vshll.u32 %v2246_v20, 16  ;;  %v2330_v20 = vcvt.f32.s32 %v5689_v1 }
 0x3e0   :  { %2383 = vmin.xlane.f32.xlu1 %v2382_v21  ;;  %v2624_v13 = vsel %vm2455_vm10, 1.0, %v3034_v4  ;;  %vm2451_vm11 = vcmp.eq.s32.totalorder %v2094_v11, %v2984_v37  ;;  %v2347_v21 = vand.u32 65535, %v5622_v7  ;;  %v2988_v11 = vld [vmem:[%s5991_s2 + $0x68] sm:$0xff]  ;;  %v2289_v37 = vshll.u32 %v2288_v39, 16 }
 0x3e1   :  { %2551 = vst.msk [vmem:[%s5993_s4 + $0x50] sm:$0xff] %vm1900_vm5, %v2624_v13  ;;  %v2620_v33 = vsel %vm2451_vm11, 1.0, %v3034_v4 }
 0x3e2   :  { %2547 = vst.msk [vmem:[%s5993_s4 + $0x30] sm:$0xff] %vm1900_vm5, %v2620_v33  ;;  %v5791_v46 = vpop.xlane.xlu2 %2309  ;;  %v2349_v15 = vcvt.s32.f32 %v2347_v21  ;;  %v2372_v21 = vcvt.f32.s32 %v5745_v58 }
 0x3e3   :  { %vm2311_vm0 = vcmp.eq.f32.partialorder %v5594_v25, %v5791_v46  ;;  %v2216_v36 = vpop.xlane.xlu0 %2215  ;;  %v2260_v25 = vcvt.f32.s32 %v5603_v8 }
 0x3e4   :  { %v2217_v52 = vcvt.f32.s32 %v2216_v36  ;;  %v2312_v31 = vsel %vm2311_vm0, %v2307_v23, inf  ;;  %v2373_v39 = vshll.u32 %v2372_v21, 16 }
 0x3e5   :  { %v5795_v35 = vpop.xlane.xlu1 %2421  ;;  %2313 = vmin.xlane.f32.xlu2 %v2312_v31  ;;  %v2261_v8 = vshll.u32 %v2260_v25, 16 }
 0x3e6   :  { %vm2423_vm12 = vcmp.eq.f32.partialorder %v5596_v26, %v5795_v35  ;;  %v2220_v40 = vadd.s32 %v2219_v6, %v2217_v52  ;;  %v2990_v6 = vld [vmem:[%s5991_s2 + $0xa0] sm:$0xff] }
 0x3e7   :  { %v2424_v32 = vsel %vm2423_vm12, %v2419_v47, inf  ;;  %v2106_v47 = vcvt.f32.s32 %v5475_v19  ;;  %v2991_v19 = vld [vmem:[%s5991_s2 + $0x38] sm:$0xff] }
 0x3e8   :  { %2425 = vmin.xlane.f32.xlu1 %v2424_v32  ;;  %vm2460_vm15 = vcmp.eq.s32.totalorder %v2220_v40, %v2985_v43  ;;  %v2391_v43 = vcvt.s32.f32 %v2389_v3 }
 0x3e9   :  { %v2629_v53 = vsel %vm2460_vm15, 1.0, %v3034_v4  ;;  %v2107_v31 = vshll.u32 %v2106_v47, 16  ;;  %v2997_v47 = vld [vmem:[%s5991_s2 + $0xd8] sm:$0xff] }
 0x3ea   :  { %2556 = vst.msk [vmem:[%s5993_s4 + $0x78] sm:$0xff] %vm1900_vm5, %v2629_v53  ;;  %v2062_v26 = vpop.xlane.xlu2 %2061 }
 0x3eb   :  { %v2063_v34 = vcvt.f32.s32 %v2062_v26  ;;  %v5810_v63 = vpop.xlane.xlu0 %2407 }
 0x3ec   :  { %vm2409_vm2 = vcmp.eq.f32.partialorder %v5609_v42, %v5810_v63  ;;  %v2191_v42 = vshll.u32 %v2190_v9, 16 }
 0x3ed   :  { %v2258_v22 = vpop.xlane.xlu1 %2257  ;;  %v2066_v29 = vadd.s32 %v2065_v41, %v2063_v34  ;;  %v2410_v16 = vsel %vm2409_vm2, %v2405_v24, inf  ;;  %v2433_v41 = vcvt.s32.f32 %v2431_v50 }
 0x3ee   :  { %v2259_v59 = vcvt.f32.s32 %v2258_v22  ;;  %2411 = vmin.xlane.f32.xlu0 %v2410_v16  ;;  %v2274_v22 = vcvt.f32.s32 %v5651_v61 }
 0x3ef   :  { %vm2449_vm3 = vcmp.eq.s32.totalorder %v2066_v29, %v2986_v12 }
 0x3f0   :  { %v2262_v10 = vadd.s32 %v2261_v8, %v2259_v59  ;;  %v2618_v55 = vsel %vm2449_vm3, 1.0, %v3034_v4  ;;  %v2275_v8 = vshll.u32 %v2274_v22, 16 }
 0x3f1   :  { %2545 = vst.msk [vmem:[%s5993_s4 + $0x20] sm:$0xff] %vm1900_vm5, %v2618_v55 }
 0x3f2   :  { %vm2463_vm14 = vcmp.eq.s32.totalorder %v2262_v10, %v2987_v30  ;;  %v2188_v56 = vpop.xlane.xlu2 %2187  ;;  %v2331_v30 = vshll.u32 %v2330_v20, 16 }
 0x3f3   :  { %v2632_v28 = vsel %vm2463_vm14, 1.0, %v3034_v4  ;;  %v2189_v48 = vcvt.f32.s32 %v2188_v56  ;;  %v2244_v38 = vpop.xlane.xlu0 %2243 }
 0x3f4   :  { %2559 = vst.msk [vmem:[%s5993_s4 + $0x90] sm:$0xff] %vm1900_vm5, %v2632_v28  ;;  %v2245_v62 = vcvt.f32.s32 %v2244_v38 }
 0x3f5   :  { %v2192_v2 = vadd.s32 %v2191_v42, %v2189_v48  ;;  %v2344_v42 = vcvt.f32.s32 %v5703_v57  ;;  %v2994_v48 = vld [vmem:[%s5991_s2 + $0xb8] sm:$0xff]  ;;  %v2995_v57 = vld [vmem:[%s5991_s2 + $0xc0] sm:$0xff] }
 0x3f6   :  { %v2248_v17 = vadd.s32 %v2247_v49, %v2245_v62 }
 0x3f7   :  { %vm2458_vm1 = vcmp.eq.s32.totalorder %v2192_v2, %v2988_v11  ;;  %v2345_v1 = vshll.u32 %v2344_v42, 16 }
 0x3f8   :  { %v2627_v27 = vsel %vm2458_vm1, 1.0, %v3034_v4  ;;  %vm2462_vm4 = vcmp.eq.s32.totalorder %v2248_v17, %v2989_v51 }
 0x3f9   :  { %2554 = vst.msk [vmem:[%s5993_s4 + $0x68] sm:$0xff] %vm1900_vm5, %v2627_v27  ;;  %v2631_v7 = vsel %vm2462_vm4, 1.0, %v3034_v4 }
 0x3fa   :  { %2558 = vst.msk [vmem:[%s5993_s4 + $0x88] sm:$0xff] %vm1900_vm5, %v2631_v7  ;;  %v5850_v44 = vpop.xlane.xlu2 %2351  ;;  %v2386_v7 = vcvt.f32.s32 %v5768_v5  ;;  %v2428_v5 = vcvt.f32.s32 %v5795_v35 }
 0x3fb   :  { %vm2353_vm13 = vcmp.eq.f32.partialorder %v5628_v14, %v5850_v44  ;;  %v2286_v13 = vpop.xlane.xlu0 %2285 }
 0x3fc   :  { %v2287_v33 = vcvt.f32.s32 %v2286_v13  ;;  %v2354_v23 = vsel %vm2353_vm13, %v2349_v15, inf  ;;  %v2996_v15 = vld [vmem:[%s5991_s2 + $0xd0] sm:$0xff]  ;;  %v2387_v58 = vshll.u32 %v2386_v7, 16 }
 0x3fd   :  { %2355 = vmin.xlane.f32.xlu2 %v2354_v23 }
 0x3fe   :  { %v2290_v36 = vadd.s32 %v2289_v37, %v2287_v33 }
 0x400   :  { %vm2465_vm7 = vcmp.eq.s32.totalorder %v2290_v36, %v2990_v6  ;;  %v2316_v36 = vcvt.f32.s32 %v5791_v46 }
 0x401   :  { %v2634_v52 = vsel %vm2465_vm7, 1.0, %v3034_v4 }
 0x402   :  { %2561 = vst.msk [vmem:[%s5993_s4 + $0xa0] sm:$0xff] %vm1900_vm5, %v2634_v52  ;;  %v2104_v14 = vpop.xlane.xlu2 %2103 }
 0x403   :  { %v2105_v32 = vcvt.f32.s32 %v2104_v14  ;;  %v2317_v14 = vshll.u32 %v2316_v36, 16 }
 0x405   :  { %v2108_v40 = vadd.s32 %v2107_v31, %v2105_v32 }
 0x407   :  { %vm2452_vm6 = vcmp.eq.s32.totalorder %v2108_v40, %v2991_v19  ;;  %v2429_v40 = vshll.u32 %v2428_v5, 16  ;;  %v2998_v19 = vld [vmem:[%s5991_s2 + $0xb0] sm:$0xff] }
 0x408   :  { %v2621_v45 = vsel %vm2452_vm6, 1.0, %v3034_v4 }
 0x409   :  { %2548 = vst.msk [vmem:[%s5993_s4 + $0x38] sm:$0xff] %vm1900_vm5, %v2621_v45  ;;  %v2414_v45 = vcvt.f32.s32 %v5810_v63 }
 0x40a   :  { %v5872_v25 = vpop.xlane.xlu2 %2393 }
 0x40b   :  { %vm2395_vm8 = vcmp.eq.f32.partialorder %v5640_v18, %v5872_v25  ;;  %v2302_v18 = vcvt.f32.s32 %v5665_v54  ;;  %v2993_v54 = vld [vmem:[%s5991_s2 + $0xa8] sm:$0xff] }
 0x40c   :  { %v2396_v53 = vsel %vm2395_vm8, %v2391_v43, inf }
 0x40d   :  { %2397 = vmin.xlane.f32.xlu2 %v2396_v53  ;;  %v2303_v61 = vshll.u32 %v2302_v18, 16  ;;  %v2999_v53 = vld [vmem:[%s5991_s2 + $0xf0] sm:$0xff] }
 0x412   :  { %v5877_v26 = vpop.xlane.xlu2 %2435 }
 0x413   :  { %vm2437_vm9 = vcmp.eq.f32.partialorder %v5647_v60, %v5877_v26  ;;  %v2442_v20 = vcvt.f32.s32 %v5877_v26  ;;  %v3003_v26 = vld [vmem:[%s5991_s2 + $0xf8] sm:$0xff] }
 0x414   :  { %v2438_v34 = vsel %vm2437_vm9, %v2433_v41, inf  ;;  %v2415_v41 = vshll.u32 %v2414_v45, 16 }
 0x415   :  { %2439 = vmin.xlane.f32.xlu2 %v2438_v34 }
 0x41a   :  { %v2272_v24 = vpop.xlane.xlu2 %2271 }
 0x41b   :  { %v2273_v59 = vcvt.f32.s32 %v2272_v24  ;;  %v3000_v24 = vld [vmem:[%s5991_s2 + $0xe8] sm:$0xff] }
 0x41d   :  { %v2276_v29 = vadd.s32 %v2275_v8, %v2273_v59  ;;  %v2358_v59 = vcvt.f32.s32 %v5850_v44 }
 0x41f   :  { %vm2464_vm10 = vcmp.eq.s32.totalorder %v2276_v29, %v2992_v0  ;;  %v2359_v18 = vshll.u32 %v2358_v59, 16 }
 0x420   :  { %v2633_v16 = vsel %vm2464_vm10, 1.0, %v3034_v4 }
 0x421   :  { %2560 = vst.msk [vmem:[%s5993_s4 + $0x98] sm:$0xff] %vm1900_vm5, %v2633_v16 }
 0x423   :  { %v2300_v60 = vpop.xlane.xlu1 %2299 }
 0x424   :  { %v2301_v10 = vcvt.f32.s32 %v2300_v60  ;;  %v3001_v60 = vld [vmem:[%s5991_s2 + $0xc8] sm:$0xff] }
 0x426   :  { %v2304_v9 = vadd.s32 %v2303_v61, %v2301_v10  ;;  %v2400_v10 = vcvt.f32.s32 %v5872_v25  ;;  %v2443_v25 = vshll.u32 %v2442_v20, 16 }
 0x428   :  { %vm2466_vm11 = vcmp.eq.s32.totalorder %v2304_v9, %v2993_v54  ;;  %v2401_v44 = vshll.u32 %v2400_v10, 16 }
 0x429   :  { %v2635_v12 = vsel %vm2466_vm11, 1.0, %v3034_v4 }
 0x42a   :  { %2562 = vst.msk [vmem:[%s5993_s4 + $0xa8] sm:$0xff] %vm1900_vm5, %v2635_v12 }
 0x431   :  { %v2328_v55 = vpop.xlane.xlu0 %2327 }
 0x432   :  { %v2329_v28 = vcvt.f32.s32 %v2328_v55  ;;  %v3002_v55 = vld [vmem:[%s5991_s2 + $0xe0] sm:$0xff] }
 0x434   :  { %v2332_v56 = vadd.s32 %v2331_v30, %v2329_v28 }
 0x436   :  { %vm2468_vm0 = vcmp.eq.s32.totalorder %v2332_v56, %v2994_v48 }
 0x437   :  { %v2637_v38 = vsel %vm2468_vm0, 1.0, %v3034_v4 }
 0x438   :  { %2564 = vst.msk [vmem:[%s5993_s4 + $0xb8] sm:$0xff] %vm1900_vm5, %v2637_v38 }
 0x43b   :  { %v2342_v49 = vpop.xlane.xlu1 %2341 }
 0x43c   :  { %v2343_v62 = vcvt.f32.s32 %v2342_v49 }
 0x43e   :  { %v2346_v2 = vadd.s32 %v2345_v1, %v2343_v62 }
 0x440   :  { %vm2469_vm12 = vcmp.eq.s32.totalorder %v2346_v2, %v2995_v57 }
 0x441   :  { %v2638_v17 = vsel %vm2469_vm12, 1.0, %v3034_v4 }
 0x442   :  { %2565 = vst.msk [vmem:[%s5993_s4 + $0xc0] sm:$0xff] %vm1900_vm5, %v2638_v17 }
 0x449   :  { %v2370_v11 = vpop.xlane.xlu0 %2369 }
 0x44a   :  { %v2371_v27 = vcvt.f32.s32 %v2370_v11 }
 0x44c   :  { %v2374_v51 = vadd.s32 %v2373_v39, %v2371_v27 }
 0x44e   :  { %vm2471_vm15 = vcmp.eq.s32.totalorder %v2374_v51, %v2996_v15 }
 0x44f   :  { %v2640_v13 = vsel %vm2471_vm15, 1.0, %v3034_v4 }
 0x450   :  { %2567 = vst.msk [vmem:[%s5993_s4 + $0xd0] sm:$0xff] %vm1900_vm5, %v2640_v13 }
 0x453   :  { %v2384_v37 = vpop.xlane.xlu1 %2383 }
 0x454   :  { %v2385_v33 = vcvt.f32.s32 %v2384_v37 }
 0x456   :  { %v2388_v23 = vadd.s32 %v2387_v58, %v2385_v33 }
 0x458   :  { %vm2472_vm2 = vcmp.eq.s32.totalorder %v2388_v23, %v2997_v47  ;;  %v2314_v52 = vpop.xlane.xlu2 %2313 }
 0x459   :  { %v2641_v6 = vsel %vm2472_vm2, 1.0, %v3034_v4  ;;  %v2315_v31 = vcvt.f32.s32 %v2314_v52 }
 0x45a   :  { %2568 = vst.msk [vmem:[%s5993_s4 + $0xd8] sm:$0xff] %vm1900_vm5, %v2641_v6 }
 0x45b   :  { %v2426_v32 = vpop.xlane.xlu1 %2425  ;;  %v2318_v3 = vadd.s32 %v2317_v14, %v2315_v31 }
 0x45c   :  { %v2427_v46 = vcvt.f32.s32 %v2426_v32 }
 0x45d   :  { %vm2467_vm3 = vcmp.eq.s32.totalorder %v2318_v3, %v2998_v19 }
 0x45e   :  { %v2430_v35 = vadd.s32 %v2429_v40, %v2427_v46  ;;  %v2636_v43 = vsel %vm2467_vm3, 1.0, %v3034_v4 }
 0x45f   :  { %2563 = vst.msk [vmem:[%s5993_s4 + $0xb0] sm:$0xff] %vm1900_vm5, %v2636_v43 }
 0x460   :  { %vm2475_vm14 = vcmp.eq.s32.totalorder %v2430_v35, %v2999_v53 }
 0x461   :  { %v2644_v50 = vsel %vm2475_vm14, 1.0, %v3034_v4  ;;  %v2412_v63 = vpop.xlane.xlu0 %2411 }
 0x462   :  { %2571 = vst.msk [vmem:[%s5993_s4 + $0xf0] sm:$0xff] %vm1900_vm5, %v2644_v50  ;;  %v2413_v34 = vcvt.f32.s32 %v2412_v63 }
 0x464   :  { %v2416_v22 = vadd.s32 %v2415_v41, %v2413_v34 }
 0x466   :  { %vm2474_vm1 = vcmp.eq.s32.totalorder %v2416_v22, %v3000_v24 }
 0x467   :  { %v2643_v8 = vsel %vm2474_vm1, 1.0, %v3034_v4 }
 0x468   :  { %2570 = vst.msk [vmem:[%s5993_s4 + $0xe8] sm:$0xff] %vm1900_vm5, %v2643_v8 }
 0x470   :  { %v2356_v29 = vpop.xlane.xlu2 %2355 }
 0x471   :  { %v2357_v0 = vcvt.f32.s32 %v2356_v29 }
 0x473   :  { %v2360_v16 = vadd.s32 %v2359_v18, %v2357_v0 }
 0x475   :  { %vm2470_vm4 = vcmp.eq.s32.totalorder %v2360_v16, %v3001_v60 }
 0x476   :  { %v2639_v61 = vsel %vm2470_vm4, 1.0, %v3034_v4 }
 0x477   :  { %2566 = vst.msk [vmem:[%s5993_s4 + $0xc8] sm:$0xff] %vm1900_vm5, %v2639_v61 }
 0x480   :  { %v2398_v9 = vpop.xlane.xlu2 %2397 }
 0x481   :  { %v2399_v54 = vcvt.f32.s32 %v2398_v9 }
 0x483   :  { %v2402_v12 = vadd.s32 %v2401_v44, %v2399_v54 }
 0x485   :  { %vm2473_vm13 = vcmp.eq.s32.totalorder %v2402_v12, %v3002_v55 }
 0x486   :  { %v2642_v30 = vsel %vm2473_vm13, 1.0, %v3034_v4 }
 0x487   :  { %2569 = vst.msk [vmem:[%s5993_s4 + $0xe0] sm:$0xff] %vm1900_vm5, %v2642_v30 }
 0x488   :  { %v2440_v28 = vpop.xlane.xlu2 %2439 }
 0x489   :  { %v2441_v56 = vcvt.f32.s32 %v2440_v28 }
 0x48b   :  { %v2444_v42 = vadd.s32 %v2443_v25, %v2441_v56 }
 0x48d   :  { %vm2476_vm7 = vcmp.eq.s32.totalorder %v2444_v42, %v3003_v26 }
 0x48e   :  { %v2645_v48 = vsel %vm2476_vm7, 1.0, %v3034_v4 }
 0x48f   :  { %2572 = vst.msk [vmem:[%s5993_s4 + $0xf8] sm:$0xff] %vm1900_vm5, %v2645_v48 }
 0x490   :  { %2581 = vsyncpa [#allocation3], 1 }

</bundles_post_ra>
